<compile_context>
chip_gen: v6e
topology: v6e:2x2x1
jax: 0.10.0
libtpu: 0.0.40
codegen_flags: <defaults>
</compile_context>

<pallas_src>
import math
from functools import partial

import jax
import jax.numpy as jnp
from jax.experimental import pallas as pl
from jax.experimental.pallas import tpu as pltpu

# ---------------- configuration (module hyper-parameters) ----------------
VOCAB = 20
D_MODEL = 32
N_LAYERS = 2
H = 4
DFF = 64
LATENT = 16
NCONDS = 3
DROPOUT = 0.1            # eval mode -> identity
USE_COND2DEC = False
USE_COND2LAT = True
EPS = 1e-6

B = 2
T_TRG = 8
T_SRC = 8


def _round_up(n, m):
    return ((n + m - 1) // m) * m


# ---------------- fused decoder-stack kernel ----------------
def _decoder_stack_kernel(
        x_ref, e_ref, tmask_ref, smask_ref,
        wqkv1_ref, bqkv1_ref, wo1_ref, bo1_ref,
        wq2_ref, bq2_ref, wkv2_ref, bkv2_ref, wo2_ref, bo2_ref,
        wff1_ref, bff1_ref, wff2_ref, bff2_ref,
        lna_ref, lnb_ref, fna_ref, fnb_ref,
        o_ref, *, h, d_model, n_layers):
    """All decoder layers + final Norm for one batch element; weights resident in VMEM."""
    dk = d_model // h

    x = x_ref[...]                 # (Tt, D)
    e = e_ref[...]                 # (Ts_pad, D)
    tmask = tmask_ref[...]         # (1, Tt, Tt)    additive mask, broadcasts over heads
    smask = smask_ref[...]         # (1, 1, Ts_pad) additive mask, broadcasts over heads & queries

    def layer_norm(v, a, b):
        # torch Norm: alpha * (v - mean) / (unbiased_std + eps) + bias
        mean = jnp.mean(v, axis=-1, keepdims=True)
        c = v - mean
        std = jnp.sqrt(jnp.sum(c * c, axis=-1, keepdims=True) * (1.0 / (d_model - 1)))
        return a * c * pl.reciprocal(std + EPS) + b      # exact reciprocal (EUP), torch parity

    def split_heads(m):
        # (T, D) -> (h, T, dk): static lane slices stacked on a new leading (batch) axis.
        return jnp.stack([m[:, i * dk:(i + 1) * dk] for i in range(h)], axis=0)

    def attention(q2, k2, v2, add_mask, wo, bo):
        # q2: (Tq, D); k2/v2: (Tk, D); wo: (h, dk, D); bo: (1, D)
        # 1/sqrt(dk) is already folded into the Q projection weights.
        qh = split_heads(q2)                                         # (h, Tq, dk)
        kh = split_heads(k2)                                         # (h, Tk, dk)
        vh = split_heads(v2)                                         # (h, Tk, dk)
        s = jnp.einsum('hqd,hkd->hqk', qh, kh,
                       preferred_element_type=jnp.float32)           # (h, Tq, Tk)
        s = s + add_mask                                             # masked_fill(mask==0, -1e9)
        s = s - jnp.max(s, axis=-1, keepdims=True)
        p = jnp.exp(s)
        p = p * pl.reciprocal(jnp.sum(p, axis=-1, keepdims=True), approx=True)
        o = jnp.einsum('hqk,hkd->hqd', p, vh,
                       preferred_element_type=jnp.float32)           # (h, Tq, dk)
        # per-head output projection, summed over the leading head axis (no lane concat)
        per_head = jnp.einsum('hqd,hdn->hqn', o, wo,
                              preferred_element_type=jnp.float32)    # (h, Tq, D)
        return jnp.sum(per_head, axis=0) + bo                        # (Tq, D)

    # ---- cross-attention K/V projections for ALL layers (layer-invariant input):
    #      one lane-dense (Ts_pad, 2*D*N_LAYERS) matmul hoisted out of the layer loop ----
    kv_all = jnp.dot(e, wkv2_ref[...],
                     preferred_element_type=jnp.float32) + bkv2_ref[...]

    for li in range(n_layers):                  # static loop, weights stay in VMEM
        a3 = lna_ref[li]                        # (3, D) norm scales for this layer
        b3 = lnb_ref[li]

        # ---- x = x + self_attn(norm_1(x), trg_mask) ----
        x2 = layer_norm(x, a3[0:1, :], b3[0:1, :])
        qkv = jnp.dot(x2, wqkv1_ref[li],
                      preferred_element_type=jnp.float32) + bqkv1_ref[li]
        x = x + attention(qkv[:, 0:d_model],
                          qkv[:, d_model:2 * d_model],
                          qkv[:, 2 * d_model:3 * d_model],
                          tmask, wo1_ref[li], bo1_ref[li])

        # ---- x = x + cross_attn(norm_2(x), e_outputs, src_mask) ----
        x2 = layer_norm(x, a3[1:2, :], b3[1:2, :])
        q = jnp.dot(x2, wq2_ref[li], preferred_element_type=jnp.float32) + bq2_ref[li]
        off = li * 2 * d_model
        x = x + attention(q,
                          kv_all[:, off:off + d_model],
                          kv_all[:, off + d_model:off + 2 * d_model],
                          smask, wo2_ref[li], bo2_ref[li])

        # ---- x = x + ff(norm_3(x)) ----
        x2 = layer_norm(x, a3[2:3, :], b3[2:3, :])
        hid = jnp.maximum(jnp.dot(x2, wff1_ref[li],
                                  preferred_element_type=jnp.float32) + bff1_ref[li], 0.0)
        x = x + jnp.dot(hid, wff2_ref[li],
                        preferred_element_type=jnp.float32) + bff2_ref[li]

    # final Norm
    o_ref[...] = layer_norm(x, fna_ref[...], fnb_ref[...])


def _resident_spec(shape):
    nd = len(shape)
    return pl.BlockSpec(shape, lambda b, _nd=nd: (0,) * _nd)


def decoder_stack_call(x_flat, e_flat, tmask_add, smask_add, packed, fna, fnb,
                       bsz, t_trg, ts_pad):
    d = D_MODEL
    dk = D_MODEL // H
    kernel = partial(_decoder_stack_kernel, h=H, d_model=D_MODEL, n_layers=N_LAYERS)
    operands = [x_flat, e_flat, tmask_add, smask_add, *packed, fna, fnb]

    in_specs = [
        pl.BlockSpec((t_trg, d), lambda b: (b, 0)),            # x: per-batch block
        pl.BlockSpec((ts_pad, d), lambda b: (b, 0)),           # e: per-batch block
        pl.BlockSpec((1, t_trg, t_trg), lambda b: (b, 0, 0)),  # trg additive mask
        pl.BlockSpec((1, 1, ts_pad), lambda b: (b, 0, 0)),     # src additive mask
    ] + [_resident_spec(op.shape) for op in operands[4:]]      # weight slabs: VMEM-resident
    out_specs = pl.BlockSpec((t_trg, d), lambda b: (b, 0))

    # Advisory cost hint so XLA schedules the custom call sensibly vs. the surrounding glue.
    per_layer_flops = (
        2 * t_trg * d * 3 * d                 # fused QKV projection
        + 2 * H * t_trg * t_trg * dk * 2      # self-attn scores + att@V
        + 2 * H * t_trg * dk * d              # self-attn output projection
        + 2 * t_trg * d * d                   # cross-attn Q projection
        + 2 * H * t_trg * ts_pad * dk * 2     # cross-attn scores + att@V
        + 2 * H * t_trg * dk * d              # cross-attn output projection
        + 2 * t_trg * d * DFF                 # ff1
        + 2 * t_trg * DFF * d                 # ff2
    )
    flops = bsz * (2 * ts_pad * d * (2 * d * N_LAYERS) + N_LAYERS * per_layer_flops)
    transcendentals = bsz * N_LAYERS * H * t_trg * (t_trg + ts_pad)
    bytes_accessed = 4 * (sum(int(op.size) for op in operands) + bsz * t_trg * d)

    return pl.pallas_call(
        kernel,
        out_shape=jax.ShapeDtypeStruct((bsz * t_trg, d), jnp.float32),
        grid=(bsz,),
        in_specs=in_specs,
        out_specs=out_specs,
        compiler_params=pltpu.CompilerParams(dimension_semantics=("parallel",)),
        cost_estimate=pl.CostEstimate(flops=flops,
                                      transcendentals=transcendentals,
                                      bytes_accessed=bytes_accessed),
    )(*operands)


# ---------------- parameters (deterministic, synthetic, torch layout) ----------------
def _dense(key, out_dim, in_dim, scale=0.05):
    kw, kb = jax.random.split(key)
    return (jax.random.normal(kw, (out_dim, in_dim), jnp.float32) * scale,
            jax.random.normal(kb, (out_dim,), jnp.float32) * scale)


def init_params(key):
    keys = iter(jax.random.split(key, 64))
    params = {
        'embed': jax.random.normal(next(keys), (VOCAB, D_MODEL), jnp.float32) * 0.1,
        'fc_z': _dense(next(keys), D_MODEL, LATENT),
        'norm_a': jnp.ones((D_MODEL,), jnp.float32),
        'norm_b': jnp.zeros((D_MODEL,), jnp.float32),
    }
    if USE_COND2DEC and NCONDS > 0:
        params['c2d'] = _dense(next(keys), D_MODEL * NCONDS, NCONDS)
    if USE_COND2LAT and NCONDS > 0:
        params['c2l'] = _dense(next(keys), D_MODEL * NCONDS, NCONDS)
    layers = []
    for _ in range(N_LAYERS):
        lp = {
            'n1_a': jnp.ones((D_MODEL,), jnp.float32), 'n1_b': jnp.zeros((D_MODEL,), jnp.float32),
            'n2_a': jnp.ones((D_MODEL,), jnp.float32), 'n2_b': jnp.zeros((D_MODEL,), jnp.float32),
            'n3_a': jnp.ones((D_MODEL,), jnp.float32), 'n3_b': jnp.zeros((D_MODEL,), jnp.float32),
            'attn1_q': _dense(next(keys), D_MODEL, D_MODEL),
            'attn1_k': _dense(next(keys), D_MODEL, D_MODEL),
            'attn1_v': _dense(next(keys), D_MODEL, D_MODEL),
            'attn1_o': _dense(next(keys), D_MODEL, D_MODEL),
            'attn2_q': _dense(next(keys), D_MODEL, D_MODEL),
            'attn2_k': _dense(next(keys), D_MODEL, D_MODEL),
            'attn2_v': _dense(next(keys), D_MODEL, D_MODEL),
            'attn2_o': _dense(next(keys), D_MODEL, D_MODEL),
            'ff_1': _dense(next(keys), DFF, D_MODEL),
            'ff_2': _dense(next(keys), D_MODEL, DFF),
        }
        layers.append(lp)
    params['layers'] = layers
    return params


def prep_weights(params):
    """One-time layout work (hoisted out of forward): transpose torch-layout weights,
    fuse QKV projections, fold 1/sqrt(dk) into Q, concatenate cross-attn K/V across layers,
    reshape output-projection weights head-major, and stack per-layer weights into slabs."""
    dk = D_MODEL // H
    inv_sqrt_dk = 1.0 / math.sqrt(dk)

    def t(wb): return wb[0].T                      # (in, out)
    def bb(wb): return wb[1].reshape(1, -1)        # (1, out)

    cols = {k: [] for k in ['wqkv1', 'bqkv1', 'wo1', 'bo1', 'wq2', 'bq2',
                            'wkv2', 'bkv2', 'wo2', 'bo2',
                            'wff1', 'bff1', 'wff2', 'bff2', 'lna', 'lnb']}
    for lp in params['layers']:
        # fused QKV, with 1/sqrt(dk) folded into the Q columns (weight AND bias)
        cols['wqkv1'].append(jnp.concatenate([t(lp['attn1_q']) * inv_sqrt_dk,
                                              t(lp['attn1_k']), t(lp['attn1_v'])], axis=1))
        cols['bqkv1'].append(jnp.concatenate([bb(lp['attn1_q']) * inv_sqrt_dk,
                                              bb(lp['attn1_k']), bb(lp['attn1_v'])], axis=1))
        # output projections: head-major (h, dk, D) so the kernel can project per head and sum
        cols['wo1'].append(t(lp['attn1_o']).reshape(H, dk, D_MODEL))
        cols['bo1'].append(bb(lp['attn1_o']))
        # cross-attn Q (scaled), and K/V fused per layer (concatenated across layers below)
        cols['wq2'].append(t(lp['attn2_q']) * inv_sqrt_dk)
        cols['bq2'].append(bb(lp['attn2_q']) * inv_sqrt_dk)
        cols['wkv2'].append(jnp.concatenate([t(lp['attn2_k']), t(lp['attn2_v'])], axis=1))
        cols['bkv2'].append(jnp.concatenate([bb(lp['attn2_k']), bb(lp['attn2_v'])], axis=1))
        cols['wo2'].append(t(lp['attn2_o']).reshape(H, dk, D_MODEL))
        cols['bo2'].append(bb(lp['attn2_o']))
        cols['wff1'].append(t(lp['ff_1'])); cols['bff1'].append(bb(lp['ff_1']))
        cols['wff2'].append(t(lp['ff_2'])); cols['bff2'].append(bb(lp['ff_2']))
        cols['lna'].append(jnp.stack([lp['n1_a'], lp['n2_a'], lp['n3_a']], axis=0))
        cols['lnb'].append(jnp.stack([lp['n1_b'], lp['n2_b'], lp['n3_b']], axis=0))

    # layer-invariant cross-attn K/V: one (D, 2*D*N_LAYERS) slab -> single 128-wide matmul
    wkv2_all = jnp.concatenate(cols['wkv2'], axis=1)       # (D, 2*D*N_LAYERS)
    bkv2_all = jnp.concatenate(cols['bkv2'], axis=1)       # (1, 2*D*N_LAYERS)

    stack_order = ['wqkv1', 'bqkv1', 'wo1', 'bo1', 'wq2', 'bq2']
    tail_order = ['wo2', 'bo2', 'wff1', 'bff1', 'wff2', 'bff2', 'lna', 'lnb']
    packed = ([jnp.stack(cols[k], axis=0) for k in stack_order]
              + [wkv2_all, bkv2_all]
              + [jnp.stack(cols[k], axis=0) for k in tail_order])

    prep = {
        'embed': params['embed'],
        'fcz_w': params['fc_z'][0].T, 'fcz_b': params['fc_z'][1],
        'packed': packed,
        'fna': params['norm_a'].reshape(1, -1),
        'fnb': params['norm_b'].reshape(1, -1),
    }
    if USE_COND2LAT and NCONDS > 0:
        prep['c2l_w'] = params['c2l'][0].T
        prep['c2l_b'] = params['c2l'][1]
    return prep


def sinusoid_pe(max_len, d_model):
    pos = jnp.arange(max_len, dtype=jnp.float32)[:, None]
    div = jnp.exp(jnp.arange(0, d_model, 2, dtype=jnp.float32) * (-math.log(10000.0) / d_model))
    ang = pos * div
    pe = jnp.zeros((max_len, d_model), jnp.float32)
    pe = pe.at[:, 0::2].set(jnp.sin(ang))
    pe = pe.at[:, 1::2].set(jnp.cos(ang))
    return pe


# ---------------- forward (tiny XLA glue + single fused Pallas kernel) ----------------
def decoder_forward(prep, trg, e_outputs, src_mask, trg_mask, dconds):
    Bb, Tt = trg.shape

    # Embeddings: lookup * sqrt(d_model)   (gather stays in plain JAX glue)
    x = jnp.take(prep['embed'], trg, axis=0) * math.sqrt(D_MODEL)

    # fc_z: microscopic matmul, left to XLA
    e = jnp.dot(e_outputs, prep['fcz_w']) + prep['fcz_b']              # (B, Ts, D)

    src_mask = src_mask.astype(jnp.float32)
    trg_mask = trg_mask.astype(jnp.float32)

    if USE_COND2DEC and NCONDS > 0:
        # TODO(synk): cond2dec path (prepends conditions to the decoder input) is not wired
        # into the fused kernel; this module configuration uses cond2lat.
        raise NotImplementedError("use_cond2dec path not implemented in the fused kernel")
    elif USE_COND2LAT and NCONDS > 0:
        c2l = (jnp.dot(dconds, prep['c2l_w']) + prep['c2l_b']).reshape(Bb, NCONDS, D_MODEL)
        e = jnp.concatenate([c2l, e], axis=1)                          # (B, nconds+Ts, D)

    # PositionalEncoding (dropout identity in eval)
    x = x + sinusoid_pe(x.shape[1], D_MODEL)[None, :, :]

    if USE_COND2LAT and NCONDS > 0:
        cond_mask = jnp.ones((Bb, 1, NCONDS), jnp.float32)
        src_mask = jnp.concatenate([cond_mask, src_mask], axis=2)      # (B, 1, nconds+Ts)

    # Pad memory length to a sublane multiple; padded key positions get a -1e9 additive mask
    # so exp underflows to exactly 0 (bit-identical softmax result).
    Ts_ext = e.shape[1]
    Ts_pad = _round_up(Ts_ext, 8)
    if Ts_pad != Ts_ext:
        e = jnp.pad(e, ((0, 0), (0, Ts_pad - Ts_ext), (0, 0)))
        src_mask = jnp.pad(src_mask, ((0, 0), (0, 0), (0, Ts_pad - Ts_ext)))

    # additive masks: 0 where visible, -1e9 where masked (replaces cmp+select in the kernel)
    tmask_add = (trg_mask - 1.0) * 1e9                                 # (B, Tt, Tt)
    smask_add = (src_mask - 1.0) * 1e9                                 # (B, 1, Ts_pad)

    x_flat = x.reshape(Bb * Tt, D_MODEL)
    e_flat = e.reshape(Bb * Ts_pad, D_MODEL)                           # flattened in the wrapper
    out = decoder_stack_call(x_flat, e_flat, tmask_add, smask_add,
                             prep['packed'], prep['fna'], prep['fnb'],
                             Bb, Tt, Ts_pad)
    return out.reshape(Bb, Tt, D_MODEL)


if __name__ == "__main__":
    key = jax.random.PRNGKey(0)
    kp, kt, ke, kd = jax.random.split(key, 4)

    params = init_params(kp)
    prep = prep_weights(params)      # one-time weight layout/packing (hoisted out of forward)

    trg = jax.random.randint(kt, (B, T_TRG), 0, VOCAB)                       # token ids
    e_outputs = jax.random.normal(ke, (B, T_SRC, LATENT), jnp.float32)       # latent memory
    dconds = jax.random.normal(kd, (B, NCONDS), jnp.float32)                 # conditions
    src_mask = jnp.ones((B, 1, T_SRC), jnp.float32).at[:, :, -1].set(0.0)    # (B,1,Ts)
    trg_mask = jnp.tril(jnp.ones((T_TRG, T_TRG), jnp.float32))[None].repeat(B, axis=0)  # causal

    fwd = jax.jit(decoder_forward)
    out = fwd(prep, trg, e_outputs, src_mask, trg_mask, dconds)
    out = jax.block_until_ready(out)
    assert out.shape == (B, T_TRG, D_MODEL)
    assert bool(jnp.all(jnp.isfinite(out)))
    print("KERNEL_OK")
</pallas_src>

<mosaic_0001>
module attributes {stable_mosaic.version = 11 : i64} {
  func.func @_decoder_stack_kernel(%arg0: i32, %arg1: memref<8x32xf32, #tpu.memory_space<vmem>>, %arg2: memref<16x32xf32, #tpu.memory_space<vmem>>, %arg3: memref<1x8x8xf32, #tpu.memory_space<vmem>>, %arg4: memref<1x1x16xf32, #tpu.memory_space<vmem>>, %arg5: memref<2x32x96xf32, #tpu.memory_space<vmem>>, %arg6: memref<2x1x96xf32, #tpu.memory_space<vmem>>, %arg7: memref<2x4x8x32xf32, #tpu.memory_space<vmem>>, %arg8: memref<2x1x32xf32, #tpu.memory_space<vmem>>, %arg9: memref<2x32x32xf32, #tpu.memory_space<vmem>>, %arg10: memref<2x1x32xf32, #tpu.memory_space<vmem>>, %arg11: memref<32x128xf32, #tpu.memory_space<vmem>>, %arg12: memref<1x128xf32, #tpu.memory_space<vmem>>, %arg13: memref<2x4x8x32xf32, #tpu.memory_space<vmem>>, %arg14: memref<2x1x32xf32, #tpu.memory_space<vmem>>, %arg15: memref<2x32x64xf32, #tpu.memory_space<vmem>>, %arg16: memref<2x1x64xf32, #tpu.memory_space<vmem>>, %arg17: memref<2x64x32xf32, #tpu.memory_space<vmem>>, %arg18: memref<2x1x32xf32, #tpu.memory_space<vmem>>, %arg19: memref<2x3x32xf32, #tpu.memory_space<vmem>>, %arg20: memref<2x3x32xf32, #tpu.memory_space<vmem>>, %arg21: memref<1x32xf32, #tpu.memory_space<vmem>>, %arg22: memref<1x32xf32, #tpu.memory_space<vmem>>, %arg23: memref<8x32xf32, #tpu.memory_space<vmem>>) attributes {dimension_semantics = [#tpu.dimension_semantics<parallel>], iteration_bounds = array<i64: 2>, scalar_prefetch = 0 : i64, scratch_operands = 0 : i64, tpu.core_type = #tpu.core_type<tc>, window_params = [{transform_indices = @transform_0, window_bounds = array<i64: 8, 32>}, {transform_indices = @transform_1, window_bounds = array<i64: 16, 32>}, {transform_indices = @transform_2, window_bounds = array<i64: 1, 8, 8>}, {transform_indices = @transform_3, window_bounds = array<i64: 1, 1, 16>}, {pipeline_mode = #tpu.pipeline_mode<synchronous>, transform_indices = @transform_4, window_bounds = array<i64: 2, 32, 96>}, {pipeline_mode = #tpu.pipeline_mode<synchronous>, transform_indices = @transform_5, window_bounds = array<i64: 2, 1, 96>}, {pipeline_mode = #tpu.pipeline_mode<synchronous>, transform_indices = @transform_6, window_bounds = array<i64: 2, 4, 8, 32>}, {pipeline_mode = #tpu.pipeline_mode<synchronous>, transform_indices = @transform_7, window_bounds = array<i64: 2, 1, 32>}, {pipeline_mode = #tpu.pipeline_mode<synchronous>, transform_indices = @transform_8, window_bounds = array<i64: 2, 32, 32>}, {pipeline_mode = #tpu.pipeline_mode<synchronous>, transform_indices = @transform_9, window_bounds = array<i64: 2, 1, 32>}, {pipeline_mode = #tpu.pipeline_mode<synchronous>, transform_indices = @transform_10, window_bounds = array<i64: 32, 128>}, {pipeline_mode = #tpu.pipeline_mode<synchronous>, transform_indices = @transform_11, window_bounds = array<i64: 1, 128>}, {pipeline_mode = #tpu.pipeline_mode<synchronous>, transform_indices = @transform_12, window_bounds = array<i64: 2, 4, 8, 32>}, {pipeline_mode = #tpu.pipeline_mode<synchronous>, transform_indices = @transform_13, window_bounds = array<i64: 2, 1, 32>}, {pipeline_mode = #tpu.pipeline_mode<synchronous>, transform_indices = @transform_14, window_bounds = array<i64: 2, 32, 64>}, {pipeline_mode = #tpu.pipeline_mode<synchronous>, transform_indices = @transform_15, window_bounds = array<i64: 2, 1, 64>}, {pipeline_mode = #tpu.pipeline_mode<synchronous>, transform_indices = @transform_16, window_bounds = array<i64: 2, 64, 32>}, {pipeline_mode = #tpu.pipeline_mode<synchronous>, transform_indices = @transform_17, window_bounds = array<i64: 2, 1, 32>}, {pipeline_mode = #tpu.pipeline_mode<synchronous>, transform_indices = @transform_18, window_bounds = array<i64: 2, 3, 32>}, {pipeline_mode = #tpu.pipeline_mode<synchronous>, transform_indices = @transform_19, window_bounds = array<i64: 2, 3, 32>}, {pipeline_mode = #tpu.pipeline_mode<synchronous>, transform_indices = @transform_20, window_bounds = array<i64: 1, 32>}, {pipeline_mode = #tpu.pipeline_mode<synchronous>, transform_indices = @transform_21, window_bounds = array<i64: 1, 32>}, {transform_indices = @transform_22, window_bounds = array<i64: 8, 32>}]} {
    %c0 = arith.constant 0 : index
    %c0_0 = arith.constant 0 : index
    %0 = vector.load %arg1[%c0, %c0_0] : memref<8x32xf32, #tpu.memory_space<vmem>>, vector<8x32xf32>
    %c0_1 = arith.constant 0 : index
    %c0_2 = arith.constant 0 : index
    %1 = vector.load %arg2[%c0_1, %c0_2] : memref<16x32xf32, #tpu.memory_space<vmem>>, vector<16x32xf32>
    %c0_3 = arith.constant 0 : index
    %c0_4 = arith.constant 0 : index
    %c0_5 = arith.constant 0 : index
    %2 = vector.load %arg3[%c0_3, %c0_4, %c0_5] : memref<1x8x8xf32, #tpu.memory_space<vmem>>, vector<1x8x8xf32>
    %c0_6 = arith.constant 0 : index
    %c0_7 = arith.constant 0 : index
    %c0_8 = arith.constant 0 : index
    %3 = vector.load %arg4[%c0_6, %c0_7, %c0_8] : memref<1x1x16xf32, #tpu.memory_space<vmem>>, vector<1x1x16xf32>
    %c0_9 = arith.constant 0 : index
    %c0_10 = arith.constant 0 : index
    %4 = vector.load %arg11[%c0_9, %c0_10] : memref<32x128xf32, #tpu.memory_space<vmem>>, vector<32x128xf32>
    %cst = arith.constant dense<0.000000e+00> : vector<16x128xf32>
    %5 = tpu.matmul %1, %4, %cst {dimension_numbers = #tpu.dot_dimension_numbers<[1], [0], [0], [1], [0, 0, 1, 1], [], []>} : vector<16x32xf32>, vector<32x128xf32>, vector<16x128xf32> -> vector<16x128xf32>
    %c0_11 = arith.constant 0 : index
    %c0_12 = arith.constant 0 : index
    %6 = vector.load %arg12[%c0_11, %c0_12] : memref<1x128xf32, #tpu.memory_space<vmem>>, vector<1x128xf32>
    %7 = vector.broadcast %6 : vector<1x128xf32> to vector<16x128xf32>
    %8 = arith.addf %5, %7 : vector<16x128xf32>
    %c0_13 = arith.constant 0 : index
    %c0_14 = arith.constant 0 : index
    %c0_15 = arith.constant 0 : index
    %9 = vector.load %arg19[%c0_13, %c0_14, %c0_15] : memref<2x3x32xf32, #tpu.memory_space<vmem>>, vector<1x3x32xf32>
    %10 = vector.shape_cast %9 : vector<1x3x32xf32> to vector<3x32xf32>
    %c0_16 = arith.constant 0 : index
    %c0_17 = arith.constant 0 : index
    %c0_18 = arith.constant 0 : index
    %11 = vector.load %arg20[%c0_16, %c0_17, %c0_18] : memref<2x3x32xf32, #tpu.memory_space<vmem>>, vector<1x3x32xf32>
    %12 = vector.shape_cast %11 : vector<1x3x32xf32> to vector<3x32xf32>
    %13 = vector.extract_strided_slice %10 {offsets = [0, 0], sizes = [1, 32], strides = [1, 1]} : vector<3x32xf32> to vector<1x32xf32>
    %14 = vector.extract_strided_slice %12 {offsets = [0, 0], sizes = [1, 32], strides = [1, 1]} : vector<3x32xf32> to vector<1x32xf32>
    %cst_19 = arith.constant dense<0.000000e+00> : vector<8xf32>
    %15 = vector.multi_reduction <add>, %0, %cst_19 [1] : vector<8x32xf32> to vector<8xf32>
    %16 = vector.shape_cast %15 : vector<8xf32> to vector<8x1xf32>
    %cst_20 = arith.constant 3.200000e+01 : f32
    %17 = vector.broadcast %cst_20 : f32 to vector<8x1xf32>
    %18 = arith.divf %16, %17 : vector<8x1xf32>
    %19 = vector.broadcast %18 : vector<8x1xf32> to vector<8x32xf32>
    %20 = arith.subf %0, %19 : vector<8x32xf32>
    %21 = arith.mulf %20, %20 : vector<8x32xf32>
    %cst_21 = arith.constant dense<0.000000e+00> : vector<8xf32>
    %22 = vector.multi_reduction <add>, %21, %cst_21 [1] : vector<8x32xf32> to vector<8xf32>
    %23 = vector.shape_cast %22 : vector<8xf32> to vector<8x1xf32>
    %cst_22 = arith.constant 0.0322580636 : f32
    %24 = vector.broadcast %cst_22 : f32 to vector<8x1xf32>
    %25 = arith.mulf %23, %24 : vector<8x1xf32>
    %26 = math.sqrt %25 : vector<8x1xf32>
    %27 = vector.broadcast %13 : vector<1x32xf32> to vector<8x32xf32>
    %28 = arith.mulf %27, %20 : vector<8x32xf32>
    %cst_23 = arith.constant 9.99999997E-7 : f32
    %29 = vector.broadcast %cst_23 : f32 to vector<8x1xf32>
    %30 = arith.addf %26, %29 : vector<8x1xf32>
    %31 = tpu.reciprocal %30 : vector<8x1xf32> -> vector<8x1xf32>
    %32 = vector.broadcast %31 : vector<8x1xf32> to vector<8x32xf32>
    %33 = arith.mulf %28, %32 : vector<8x32xf32>
    %34 = vector.broadcast %14 : vector<1x32xf32> to vector<8x32xf32>
    %35 = arith.addf %33, %34 : vector<8x32xf32>
    %c0_24 = arith.constant 0 : index
    %c0_25 = arith.constant 0 : index
    %c0_26 = arith.constant 0 : index
    %36 = vector.load %arg5[%c0_24, %c0_25, %c0_26] : memref<2x32x96xf32, #tpu.memory_space<vmem>>, vector<1x32x96xf32>
    %37 = vector.shape_cast %36 : vector<1x32x96xf32> to vector<32x96xf32>
    %cst_27 = arith.constant dense<0.000000e+00> : vector<8x96xf32>
    %38 = tpu.matmul %35, %37, %cst_27 {dimension_numbers = #tpu.dot_dimension_numbers<[1], [0], [0], [1], [0, 0, 1, 1], [], []>} : vector<8x32xf32>, vector<32x96xf32>, vector<8x96xf32> -> vector<8x96xf32>
    %c0_28 = arith.constant 0 : index
    %c0_29 = arith.constant 0 : index
    %c0_30 = arith.constant 0 : index
    %39 = vector.load %arg6[%c0_28, %c0_29, %c0_30] : memref<2x1x96xf32, #tpu.memory_space<vmem>>, vector<1x1x96xf32>
    %40 = vector.shape_cast %39 : vector<1x1x96xf32> to vector<1x96xf32>
    %41 = vector.broadcast %40 : vector<1x96xf32> to vector<8x96xf32>
    %42 = arith.addf %38, %41 : vector<8x96xf32>
    %43 = vector.extract_strided_slice %42 {offsets = [0, 0], sizes = [8, 32], strides = [1, 1]} : vector<8x96xf32> to vector<8x32xf32>
    %44 = vector.extract_strided_slice %42 {offsets = [0, 32], sizes = [8, 32], strides = [1, 1]} : vector<8x96xf32> to vector<8x32xf32>
    %45 = vector.extract_strided_slice %42 {offsets = [0, 64], sizes = [8, 32], strides = [1, 1]} : vector<8x96xf32> to vector<8x32xf32>
    %c0_31 = arith.constant 0 : index
    %c0_32 = arith.constant 0 : index
    %c0_33 = arith.constant 0 : index
    %c0_34 = arith.constant 0 : index
    %46 = vector.load %arg7[%c0_31, %c0_32, %c0_33, %c0_34] : memref<2x4x8x32xf32, #tpu.memory_space<vmem>>, vector<1x4x8x32xf32>
    %47 = vector.shape_cast %46 : vector<1x4x8x32xf32> to vector<4x8x32xf32>
    %c0_35 = arith.constant 0 : index
    %c0_36 = arith.constant 0 : index
    %c0_37 = arith.constant 0 : index
    %48 = vector.load %arg8[%c0_35, %c0_36, %c0_37] : memref<2x1x32xf32, #tpu.memory_space<vmem>>, vector<1x1x32xf32>
    %49 = vector.shape_cast %48 : vector<1x1x32xf32> to vector<1x32xf32>
    %50 = vector.extract_strided_slice %43 {offsets = [0, 0], sizes = [8, 8], strides = [1, 1]} : vector<8x32xf32> to vector<8x8xf32>
    %51 = vector.extract_strided_slice %43 {offsets = [0, 8], sizes = [8, 8], strides = [1, 1]} : vector<8x32xf32> to vector<8x8xf32>
    %52 = vector.extract_strided_slice %43 {offsets = [0, 16], sizes = [8, 8], strides = [1, 1]} : vector<8x32xf32> to vector<8x8xf32>
    %53 = vector.extract_strided_slice %43 {offsets = [0, 24], sizes = [8, 8], strides = [1, 1]} : vector<8x32xf32> to vector<8x8xf32>
    %54 = vector.shape_cast %50 : vector<8x8xf32> to vector<1x8x8xf32>
    %55 = vector.shape_cast %51 : vector<8x8xf32> to vector<1x8x8xf32>
    %56 = vector.shape_cast %52 : vector<8x8xf32> to vector<1x8x8xf32>
    %57 = vector.shape_cast %53 : vector<8x8xf32> to vector<1x8x8xf32>
    %58 = tpu.concatenate %54, %55, %56, %57 in 0 : vector<1x8x8xf32>, vector<1x8x8xf32>, vector<1x8x8xf32>, vector<1x8x8xf32> -> vector<4x8x8xf32>
    %59 = vector.extract_strided_slice %44 {offsets = [0, 0], sizes = [8, 8], strides = [1, 1]} : vector<8x32xf32> to vector<8x8xf32>
    %60 = vector.extract_strided_slice %44 {offsets = [0, 8], sizes = [8, 8], strides = [1, 1]} : vector<8x32xf32> to vector<8x8xf32>
    %61 = vector.extract_strided_slice %44 {offsets = [0, 16], sizes = [8, 8], strides = [1, 1]} : vector<8x32xf32> to vector<8x8xf32>
    %62 = vector.extract_strided_slice %44 {offsets = [0, 24], sizes = [8, 8], strides = [1, 1]} : vector<8x32xf32> to vector<8x8xf32>
    %63 = vector.shape_cast %59 : vector<8x8xf32> to vector<1x8x8xf32>
    %64 = vector.shape_cast %60 : vector<8x8xf32> to vector<1x8x8xf32>
    %65 = vector.shape_cast %61 : vector<8x8xf32> to vector<1x8x8xf32>
    %66 = vector.shape_cast %62 : vector<8x8xf32> to vector<1x8x8xf32>
    %67 = tpu.concatenate %63, %64, %65, %66 in 0 : vector<1x8x8xf32>, vector<1x8x8xf32>, vector<1x8x8xf32>, vector<1x8x8xf32> -> vector<4x8x8xf32>
    %68 = vector.extract_strided_slice %45 {offsets = [0, 0], sizes = [8, 8], strides = [1, 1]} : vector<8x32xf32> to vector<8x8xf32>
    %69 = vector.extract_strided_slice %45 {offsets = [0, 8], sizes = [8, 8], strides = [1, 1]} : vector<8x32xf32> to vector<8x8xf32>
    %70 = vector.extract_strided_slice %45 {offsets = [0, 16], sizes = [8, 8], strides = [1, 1]} : vector<8x32xf32> to vector<8x8xf32>
    %71 = vector.extract_strided_slice %45 {offsets = [0, 24], sizes = [8, 8], strides = [1, 1]} : vector<8x32xf32> to vector<8x8xf32>
    %72 = vector.shape_cast %68 : vector<8x8xf32> to vector<1x8x8xf32>
    %73 = vector.shape_cast %69 : vector<8x8xf32> to vector<1x8x8xf32>
    %74 = vector.shape_cast %70 : vector<8x8xf32> to vector<1x8x8xf32>
    %75 = vector.shape_cast %71 : vector<8x8xf32> to vector<1x8x8xf32>
    %76 = tpu.concatenate %72, %73, %74, %75 in 0 : vector<1x8x8xf32>, vector<1x8x8xf32>, vector<1x8x8xf32>, vector<1x8x8xf32> -> vector<4x8x8xf32>
    "tpu.trace_start"() <{level = 10 : i32, message = "hqd,hkd->hqk"}> : () -> ()
    %cst_38 = arith.constant dense<0.000000e+00> : vector<4x8x8xf32>
    %77 = tpu.matmul %58, %67, %cst_38 {dimension_numbers = #tpu.dot_dimension_numbers<[2], [2], [1], [1], [0, 0, 0, 1, 1, 1], [0], [0]>} : vector<4x8x8xf32>, vector<4x8x8xf32>, vector<4x8x8xf32> -> vector<4x8x8xf32>
    "tpu.trace_stop"() : () -> ()
    %78 = vector.broadcast %2 : vector<1x8x8xf32> to vector<4x8x8xf32>
    %79 = arith.addf %77, %78 : vector<4x8x8xf32>
    %cst_39 = arith.constant dense<0xFF800000> : vector<4x8xf32>
    %80 = vector.multi_reduction <maximumf>, %79, %cst_39 [2] : vector<4x8x8xf32> to vector<4x8xf32>
    %81 = vector.shape_cast %80 : vector<4x8xf32> to vector<4x8x1xf32>
    %82 = vector.broadcast %81 : vector<4x8x1xf32> to vector<4x8x8xf32>
    %83 = arith.subf %79, %82 : vector<4x8x8xf32>
    %84 = math.exp %83 : vector<4x8x8xf32>
    %cst_40 = arith.constant dense<0.000000e+00> : vector<4x8xf32>
    %85 = vector.multi_reduction <add>, %84, %cst_40 [2] : vector<4x8x8xf32> to vector<4x8xf32>
    %86 = vector.shape_cast %85 : vector<4x8xf32> to vector<4x8x1xf32>
    %87 = tpu.reciprocal %86 {approx = true} : vector<4x8x1xf32> -> vector<4x8x1xf32>
    %88 = vector.broadcast %87 : vector<4x8x1xf32> to vector<4x8x8xf32>
    %89 = arith.mulf %84, %88 : vector<4x8x8xf32>
    "tpu.trace_start"() <{level = 10 : i32, message = "hqk,hkd->hqd"}> : () -> ()
    %cst_41 = arith.constant dense<0.000000e+00> : vector<4x8x8xf32>
    %90 = tpu.matmul %89, %76, %cst_41 {dimension_numbers = #tpu.dot_dimension_numbers<[2], [1], [1], [2], [0, 0, 0, 1, 1, 2], [0], [0]>} : vector<4x8x8xf32>, vector<4x8x8xf32>, vector<4x8x8xf32> -> vector<4x8x8xf32>
    "tpu.trace_stop"() : () -> ()
    "tpu.trace_start"() <{level = 10 : i32, message = "hqd,hdn->hqn"}> : () -> ()
    %cst_42 = arith.constant dense<0.000000e+00> : vector<4x8x32xf32>
    %91 = tpu.matmul %90, %47, %cst_42 {dimension_numbers = #tpu.dot_dimension_numbers<[2], [1], [1], [2], [0, 0, 0, 1, 1, 2], [0], [0]>} : vector<4x8x8xf32>, vector<4x8x32xf32>, vector<4x8x32xf32> -> vector<4x8x32xf32>
    "tpu.trace_stop"() : () -> ()
    %cst_43 = arith.constant dense<0.000000e+00> : vector<8x32xf32>
    %92 = vector.multi_reduction <add>, %91, %cst_43 [0] : vector<4x8x32xf32> to vector<8x32xf32>
    %93 = vector.broadcast %49 : vector<1x32xf32> to vector<8x32xf32>
    %94 = arith.addf %92, %93 : vector<8x32xf32>
    %95 = arith.addf %0, %94 : vector<8x32xf32>
    %96 = vector.extract_strided_slice %10 {offsets = [1, 0], sizes = [1, 32], strides = [1, 1]} : vector<3x32xf32> to vector<1x32xf32>
    %97 = vector.extract_strided_slice %12 {offsets = [1, 0], sizes = [1, 32], strides = [1, 1]} : vector<3x32xf32> to vector<1x32xf32>
    %cst_44 = arith.constant dense<0.000000e+00> : vector<8xf32>
    %98 = vector.multi_reduction <add>, %95, %cst_44 [1] : vector<8x32xf32> to vector<8xf32>
    %99 = vector.shape_cast %98 : vector<8xf32> to vector<8x1xf32>
    %cst_45 = arith.constant 3.200000e+01 : f32
    %100 = vector.broadcast %cst_45 : f32 to vector<8x1xf32>
    %101 = arith.divf %99, %100 : vector<8x1xf32>
    %102 = vector.broadcast %101 : vector<8x1xf32> to vector<8x32xf32>
    %103 = arith.subf %95, %102 : vector<8x32xf32>
    %104 = arith.mulf %103, %103 : vector<8x32xf32>
    %cst_46 = arith.constant dense<0.000000e+00> : vector<8xf32>
    %105 = vector.multi_reduction <add>, %104, %cst_46 [1] : vector<8x32xf32> to vector<8xf32>
    %106 = vector.shape_cast %105 : vector<8xf32> to vector<8x1xf32>
    %cst_47 = arith.constant 0.0322580636 : f32
    %107 = vector.broadcast %cst_47 : f32 to vector<8x1xf32>
    %108 = arith.mulf %106, %107 : vector<8x1xf32>
    %109 = math.sqrt %108 : vector<8x1xf32>
    %110 = vector.broadcast %96 : vector<1x32xf32> to vector<8x32xf32>
    %111 = arith.mulf %110, %103 : vector<8x32xf32>
    %cst_48 = arith.constant 9.99999997E-7 : f32
    %112 = vector.broadcast %cst_48 : f32 to vector<8x1xf32>
    %113 = arith.addf %109, %112 : vector<8x1xf32>
    %114 = tpu.reciprocal %113 : vector<8x1xf32> -> vector<8x1xf32>
    %115 = vector.broadcast %114 : vector<8x1xf32> to vector<8x32xf32>
    %116 = arith.mulf %111, %115 : vector<8x32xf32>
    %117 = vector.broadcast %97 : vector<1x32xf32> to vector<8x32xf32>
    %118 = arith.addf %116, %117 : vector<8x32xf32>
    %c0_49 = arith.constant 0 : index
    %c0_50 = arith.constant 0 : index
    %c0_51 = arith.constant 0 : index
    %119 = vector.load %arg9[%c0_49, %c0_50, %c0_51] : memref<2x32x32xf32, #tpu.memory_space<vmem>>, vector<1x32x32xf32>
    %120 = vector.shape_cast %119 : vector<1x32x32xf32> to vector<32x32xf32>
    %cst_52 = arith.constant dense<0.000000e+00> : vector<8x32xf32>
    %121 = tpu.matmul %118, %120, %cst_52 {dimension_numbers = #tpu.dot_dimension_numbers<[1], [0], [0], [1], [0, 0, 1, 1], [], []>} : vector<8x32xf32>, vector<32x32xf32>, vector<8x32xf32> -> vector<8x32xf32>
    %c0_53 = arith.constant 0 : index
    %c0_54 = arith.constant 0 : index
    %c0_55 = arith.constant 0 : index
    %122 = vector.load %arg10[%c0_53, %c0_54, %c0_55] : memref<2x1x32xf32, #tpu.memory_space<vmem>>, vector<1x1x32xf32>
    %123 = vector.shape_cast %122 : vector<1x1x32xf32> to vector<1x32xf32>
    %124 = vector.broadcast %123 : vector<1x32xf32> to vector<8x32xf32>
    %125 = arith.addf %121, %124 : vector<8x32xf32>
    %126 = vector.extract_strided_slice %8 {offsets = [0, 0], sizes = [16, 32], strides = [1, 1]} : vector<16x128xf32> to vector<16x32xf32>
    %127 = vector.extract_strided_slice %8 {offsets = [0, 32], sizes = [16, 32], strides = [1, 1]} : vector<16x128xf32> to vector<16x32xf32>
    %c0_56 = arith.constant 0 : index
    %c0_57 = arith.constant 0 : index
    %c0_58 = arith.constant 0 : index
    %c0_59 = arith.constant 0 : index
    %128 = vector.load %arg13[%c0_56, %c0_57, %c0_58, %c0_59] : memref<2x4x8x32xf32, #tpu.memory_space<vmem>>, vector<1x4x8x32xf32>
    %129 = vector.shape_cast %128 : vector<1x4x8x32xf32> to vector<4x8x32xf32>
    %c0_60 = arith.constant 0 : index
    %c0_61 = arith.constant 0 : index
    %c0_62 = arith.constant 0 : index
    %130 = vector.load %arg14[%c0_60, %c0_61, %c0_62] : memref<2x1x32xf32, #tpu.memory_space<vmem>>, vector<1x1x32xf32>
    %131 = vector.shape_cast %130 : vector<1x1x32xf32> to vector<1x32xf32>
    %132 = vector.extract_strided_slice %125 {offsets = [0, 0], sizes = [8, 8], strides = [1, 1]} : vector<8x32xf32> to vector<8x8xf32>
    %133 = vector.extract_strided_slice %125 {offsets = [0, 8], sizes = [8, 8], strides = [1, 1]} : vector<8x32xf32> to vector<8x8xf32>
    %134 = vector.extract_strided_slice %125 {offsets = [0, 16], sizes = [8, 8], strides = [1, 1]} : vector<8x32xf32> to vector<8x8xf32>
    %135 = vector.extract_strided_slice %125 {offsets = [0, 24], sizes = [8, 8], strides = [1, 1]} : vector<8x32xf32> to vector<8x8xf32>
    %136 = vector.shape_cast %132 : vector<8x8xf32> to vector<1x8x8xf32>
    %137 = vector.shape_cast %133 : vector<8x8xf32> to vector<1x8x8xf32>
    %138 = vector.shape_cast %134 : vector<8x8xf32> to vector<1x8x8xf32>
    %139 = vector.shape_cast %135 : vector<8x8xf32> to vector<1x8x8xf32>
    %140 = tpu.concatenate %136, %137, %138, %139 in 0 : vector<1x8x8xf32>, vector<1x8x8xf32>, vector<1x8x8xf32>, vector<1x8x8xf32> -> vector<4x8x8xf32>
    %141 = vector.extract_strided_slice %126 {offsets = [0, 0], sizes = [16, 8], strides = [1, 1]} : vector<16x32xf32> to vector<16x8xf32>
    %142 = vector.extract_strided_slice %126 {offsets = [0, 8], sizes = [16, 8], strides = [1, 1]} : vector<16x32xf32> to vector<16x8xf32>
    %143 = vector.extract_strided_slice %126 {offsets = [0, 16], sizes = [16, 8], strides = [1, 1]} : vector<16x32xf32> to vector<16x8xf32>
    %144 = vector.extract_strided_slice %126 {offsets = [0, 24], sizes = [16, 8], strides = [1, 1]} : vector<16x32xf32> to vector<16x8xf32>
    %145 = vector.shape_cast %141 : vector<16x8xf32> to vector<1x16x8xf32>
    %146 = vector.shape_cast %142 : vector<16x8xf32> to vector<1x16x8xf32>
    %147 = vector.shape_cast %143 : vector<16x8xf32> to vector<1x16x8xf32>
    %148 = vector.shape_cast %144 : vector<16x8xf32> to vector<1x16x8xf32>
    %149 = tpu.concatenate %145, %146, %147, %148 in 0 : vector<1x16x8xf32>, vector<1x16x8xf32>, vector<1x16x8xf32>, vector<1x16x8xf32> -> vector<4x16x8xf32>
    %150 = vector.extract_strided_slice %127 {offsets = [0, 0], sizes = [16, 8], strides = [1, 1]} : vector<16x32xf32> to vector<16x8xf32>
    %151 = vector.extract_strided_slice %127 {offsets = [0, 8], sizes = [16, 8], strides = [1, 1]} : vector<16x32xf32> to vector<16x8xf32>
    %152 = vector.extract_strided_slice %127 {offsets = [0, 16], sizes = [16, 8], strides = [1, 1]} : vector<16x32xf32> to vector<16x8xf32>
    %153 = vector.extract_strided_slice %127 {offsets = [0, 24], sizes = [16, 8], strides = [1, 1]} : vector<16x32xf32> to vector<16x8xf32>
    %154 = vector.shape_cast %150 : vector<16x8xf32> to vector<1x16x8xf32>
    %155 = vector.shape_cast %151 : vector<16x8xf32> to vector<1x16x8xf32>
    %156 = vector.shape_cast %152 : vector<16x8xf32> to vector<1x16x8xf32>
    %157 = vector.shape_cast %153 : vector<16x8xf32> to vector<1x16x8xf32>
    %158 = tpu.concatenate %154, %155, %156, %157 in 0 : vector<1x16x8xf32>, vector<1x16x8xf32>, vector<1x16x8xf32>, vector<1x16x8xf32> -> vector<4x16x8xf32>
    "tpu.trace_start"() <{level = 10 : i32, message = "hqd,hkd->hqk"}> : () -> ()
    %cst_63 = arith.constant dense<0.000000e+00> : vector<4x8x16xf32>
    %159 = tpu.matmul %140, %149, %cst_63 {dimension_numbers = #tpu.dot_dimension_numbers<[2], [2], [1], [1], [0, 0, 0, 1, 1, 1], [0], [0]>} : vector<4x8x8xf32>, vector<4x16x8xf32>, vector<4x8x16xf32> -> vector<4x8x16xf32>
    "tpu.trace_stop"() : () -> ()
    %160 = vector.broadcast %3 : vector<1x1x16xf32> to vector<4x8x16xf32>
    %161 = arith.addf %159, %160 : vector<4x8x16xf32>
    %cst_64 = arith.constant dense<0xFF800000> : vector<4x8xf32>
    %162 = vector.multi_reduction <maximumf>, %161, %cst_64 [2] : vector<4x8x16xf32> to vector<4x8xf32>
    %163 = vector.shape_cast %162 : vector<4x8xf32> to vector<4x8x1xf32>
    %164 = vector.broadcast %163 : vector<4x8x1xf32> to vector<4x8x16xf32>
    %165 = arith.subf %161, %164 : vector<4x8x16xf32>
    %166 = math.exp %165 : vector<4x8x16xf32>
    %cst_65 = arith.constant dense<0.000000e+00> : vector<4x8xf32>
    %167 = vector.multi_reduction <add>, %166, %cst_65 [2] : vector<4x8x16xf32> to vector<4x8xf32>
    %168 = vector.shape_cast %167 : vector<4x8xf32> to vector<4x8x1xf32>
    %169 = tpu.reciprocal %168 {approx = true} : vector<4x8x1xf32> -> vector<4x8x1xf32>
    %170 = vector.broadcast %169 : vector<4x8x1xf32> to vector<4x8x16xf32>
    %171 = arith.mulf %166, %170 : vector<4x8x16xf32>
    "tpu.trace_start"() <{level = 10 : i32, message = "hqk,hkd->hqd"}> : () -> ()
    %cst_66 = arith.constant dense<0.000000e+00> : vector<4x8x8xf32>
    %172 = tpu.matmul %171, %158, %cst_66 {dimension_numbers = #tpu.dot_dimension_numbers<[2], [1], [1], [2], [0, 0, 0, 1, 1, 2], [0], [0]>} : vector<4x8x16xf32>, vector<4x16x8xf32>, vector<4x8x8xf32> -> vector<4x8x8xf32>
    "tpu.trace_stop"() : () -> ()
    "tpu.trace_start"() <{level = 10 : i32, message = "hqd,hdn->hqn"}> : () -> ()
    %cst_67 = arith.constant dense<0.000000e+00> : vector<4x8x32xf32>
    %173 = tpu.matmul %172, %129, %cst_67 {dimension_numbers = #tpu.dot_dimension_numbers<[2], [1], [1], [2], [0, 0, 0, 1, 1, 2], [0], [0]>} : vector<4x8x8xf32>, vector<4x8x32xf32>, vector<4x8x32xf32> -> vector<4x8x32xf32>
    "tpu.trace_stop"() : () -> ()
    %cst_68 = arith.constant dense<0.000000e+00> : vector<8x32xf32>
    %174 = vector.multi_reduction <add>, %173, %cst_68 [0] : vector<4x8x32xf32> to vector<8x32xf32>
    %175 = vector.broadcast %131 : vector<1x32xf32> to vector<8x32xf32>
    %176 = arith.addf %174, %175 : vector<8x32xf32>
    %177 = arith.addf %95, %176 : vector<8x32xf32>
    %178 = vector.extract_strided_slice %10 {offsets = [2, 0], sizes = [1, 32], strides = [1, 1]} : vector<3x32xf32> to vector<1x32xf32>
    %179 = vector.extract_strided_slice %12 {offsets = [2, 0], sizes = [1, 32], strides = [1, 1]} : vector<3x32xf32> to vector<1x32xf32>
    %cst_69 = arith.constant dense<0.000000e+00> : vector<8xf32>
    %180 = vector.multi_reduction <add>, %177, %cst_69 [1] : vector<8x32xf32> to vector<8xf32>
    %181 = vector.shape_cast %180 : vector<8xf32> to vector<8x1xf32>
    %cst_70 = arith.constant 3.200000e+01 : f32
    %182 = vector.broadcast %cst_70 : f32 to vector<8x1xf32>
    %183 = arith.divf %181, %182 : vector<8x1xf32>
    %184 = vector.broadcast %183 : vector<8x1xf32> to vector<8x32xf32>
    %185 = arith.subf %177, %184 : vector<8x32xf32>
    %186 = arith.mulf %185, %185 : vector<8x32xf32>
    %cst_71 = arith.constant dense<0.000000e+00> : vector<8xf32>
    %187 = vector.multi_reduction <add>, %186, %cst_71 [1] : vector<8x32xf32> to vector<8xf32>
    %188 = vector.shape_cast %187 : vector<8xf32> to vector<8x1xf32>
    %cst_72 = arith.constant 0.0322580636 : f32
    %189 = vector.broadcast %cst_72 : f32 to vector<8x1xf32>
    %190 = arith.mulf %188, %189 : vector<8x1xf32>
    %191 = math.sqrt %190 : vector<8x1xf32>
    %192 = vector.broadcast %178 : vector<1x32xf32> to vector<8x32xf32>
    %193 = arith.mulf %192, %185 : vector<8x32xf32>
    %cst_73 = arith.constant 9.99999997E-7 : f32
    %194 = vector.broadcast %cst_73 : f32 to vector<8x1xf32>
    %195 = arith.addf %191, %194 : vector<8x1xf32>
    %196 = tpu.reciprocal %195 : vector<8x1xf32> -> vector<8x1xf32>
    %197 = vector.broadcast %196 : vector<8x1xf32> to vector<8x32xf32>
    %198 = arith.mulf %193, %197 : vector<8x32xf32>
    %199 = vector.broadcast %179 : vector<1x32xf32> to vector<8x32xf32>
    %200 = arith.addf %198, %199 : vector<8x32xf32>
    %c0_74 = arith.constant 0 : index
    %c0_75 = arith.constant 0 : index
    %c0_76 = arith.constant 0 : index
    %201 = vector.load %arg15[%c0_74, %c0_75, %c0_76] : memref<2x32x64xf32, #tpu.memory_space<vmem>>, vector<1x32x64xf32>
    %202 = vector.shape_cast %201 : vector<1x32x64xf32> to vector<32x64xf32>
    %cst_77 = arith.constant dense<0.000000e+00> : vector<8x64xf32>
    %203 = tpu.matmul %200, %202, %cst_77 {dimension_numbers = #tpu.dot_dimension_numbers<[1], [0], [0], [1], [0, 0, 1, 1], [], []>} : vector<8x32xf32>, vector<32x64xf32>, vector<8x64xf32> -> vector<8x64xf32>
    %c0_78 = arith.constant 0 : index
    %c0_79 = arith.constant 0 : index
    %c0_80 = arith.constant 0 : index
    %204 = vector.load %arg16[%c0_78, %c0_79, %c0_80] : memref<2x1x64xf32, #tpu.memory_space<vmem>>, vector<1x1x64xf32>
    %205 = vector.shape_cast %204 : vector<1x1x64xf32> to vector<1x64xf32>
    %206 = vector.broadcast %205 : vector<1x64xf32> to vector<8x64xf32>
    %207 = arith.addf %203, %206 : vector<8x64xf32>
    %cst_81 = arith.constant 0.000000e+00 : f32
    %208 = vector.broadcast %cst_81 : f32 to vector<8x64xf32>
    %209 = arith.maximumf %207, %208 : vector<8x64xf32>
    %c0_82 = arith.constant 0 : index
    %c0_83 = arith.constant 0 : index
    %c0_84 = arith.constant 0 : index
    %210 = vector.load %arg17[%c0_82, %c0_83, %c0_84] : memref<2x64x32xf32, #tpu.memory_space<vmem>>, vector<1x64x32xf32>
    %211 = vector.shape_cast %210 : vector<1x64x32xf32> to vector<64x32xf32>
    %cst_85 = arith.constant dense<0.000000e+00> : vector<8x32xf32>
    %212 = tpu.matmul %209, %211, %cst_85 {dimension_numbers = #tpu.dot_dimension_numbers<[1], [0], [0], [1], [0, 0, 1, 1], [], []>} : vector<8x64xf32>, vector<64x32xf32>, vector<8x32xf32> -> vector<8x32xf32>
    %213 = arith.addf %177, %212 : vector<8x32xf32>
    %c0_86 = arith.constant 0 : index
    %c0_87 = arith.constant 0 : index
    %c0_88 = arith.constant 0 : index
    %214 = vector.load %arg18[%c0_86, %c0_87, %c0_88] : memref<2x1x32xf32, #tpu.memory_space<vmem>>, vector<1x1x32xf32>
    %215 = vector.shape_cast %214 : vector<1x1x32xf32> to vector<1x32xf32>
    %216 = vector.broadcast %215 : vector<1x32xf32> to vector<8x32xf32>
    %217 = arith.addf %213, %216 : vector<8x32xf32>
    %c1 = arith.constant 1 : index
    %c0_89 = arith.constant 0 : index
    %c0_90 = arith.constant 0 : index
    %218 = vector.load %arg19[%c1, %c0_89, %c0_90] : memref<2x3x32xf32, #tpu.memory_space<vmem>>, vector<1x3x32xf32>
    %219 = vector.shape_cast %218 : vector<1x3x32xf32> to vector<3x32xf32>
    %c1_91 = arith.constant 1 : index
    %c0_92 = arith.constant 0 : index
    %c0_93 = arith.constant 0 : index
    %220 = vector.load %arg20[%c1_91, %c0_92, %c0_93] : memref<2x3x32xf32, #tpu.memory_space<vmem>>, vector<1x3x32xf32>
    %221 = vector.shape_cast %220 : vector<1x3x32xf32> to vector<3x32xf32>
    %222 = vector.extract_strided_slice %219 {offsets = [0, 0], sizes = [1, 32], strides = [1, 1]} : vector<3x32xf32> to vector<1x32xf32>
    %223 = vector.extract_strided_slice %221 {offsets = [0, 0], sizes = [1, 32], strides = [1, 1]} : vector<3x32xf32> to vector<1x32xf32>
    %cst_94 = arith.constant dense<0.000000e+00> : vector<8xf32>
    %224 = vector.multi_reduction <add>, %217, %cst_94 [1] : vector<8x32xf32> to vector<8xf32>
    %225 = vector.shape_cast %224 : vector<8xf32> to vector<8x1xf32>
    %cst_95 = arith.constant 3.200000e+01 : f32
    %226 = vector.broadcast %cst_95 : f32 to vector<8x1xf32>
    %227 = arith.divf %225, %226 : vector<8x1xf32>
    %228 = vector.broadcast %227 : vector<8x1xf32> to vector<8x32xf32>
    %229 = arith.subf %217, %228 : vector<8x32xf32>
    %230 = arith.mulf %229, %229 : vector<8x32xf32>
    %cst_96 = arith.constant dense<0.000000e+00> : vector<8xf32>
    %231 = vector.multi_reduction <add>, %230, %cst_96 [1] : vector<8x32xf32> to vector<8xf32>
    %232 = vector.shape_cast %231 : vector<8xf32> to vector<8x1xf32>
    %cst_97 = arith.constant 0.0322580636 : f32
    %233 = vector.broadcast %cst_97 : f32 to vector<8x1xf32>
    %234 = arith.mulf %232, %233 : vector<8x1xf32>
    %235 = math.sqrt %234 : vector<8x1xf32>
    %236 = vector.broadcast %222 : vector<1x32xf32> to vector<8x32xf32>
    %237 = arith.mulf %236, %229 : vector<8x32xf32>
    %cst_98 = arith.constant 9.99999997E-7 : f32
    %238 = vector.broadcast %cst_98 : f32 to vector<8x1xf32>
    %239 = arith.addf %235, %238 : vector<8x1xf32>
    %240 = tpu.reciprocal %239 : vector<8x1xf32> -> vector<8x1xf32>
    %241 = vector.broadcast %240 : vector<8x1xf32> to vector<8x32xf32>
    %242 = arith.mulf %237, %241 : vector<8x32xf32>
    %243 = vector.broadcast %223 : vector<1x32xf32> to vector<8x32xf32>
    %244 = arith.addf %242, %243 : vector<8x32xf32>
    %c1_99 = arith.constant 1 : index
    %c0_100 = arith.constant 0 : index
    %c0_101 = arith.constant 0 : index
    %245 = vector.load %arg5[%c1_99, %c0_100, %c0_101] : memref<2x32x96xf32, #tpu.memory_space<vmem>>, vector<1x32x96xf32>
    %246 = vector.shape_cast %245 : vector<1x32x96xf32> to vector<32x96xf32>
    %cst_102 = arith.constant dense<0.000000e+00> : vector<8x96xf32>
    %247 = tpu.matmul %244, %246, %cst_102 {dimension_numbers = #tpu.dot_dimension_numbers<[1], [0], [0], [1], [0, 0, 1, 1], [], []>} : vector<8x32xf32>, vector<32x96xf32>, vector<8x96xf32> -> vector<8x96xf32>
    %c1_103 = arith.constant 1 : index
    %c0_104 = arith.constant 0 : index
    %c0_105 = arith.constant 0 : index
    %248 = vector.load %arg6[%c1_103, %c0_104, %c0_105] : memref<2x1x96xf32, #tpu.memory_space<vmem>>, vector<1x1x96xf32>
    %249 = vector.shape_cast %248 : vector<1x1x96xf32> to vector<1x96xf32>
    %250 = vector.broadcast %249 : vector<1x96xf32> to vector<8x96xf32>
    %251 = arith.addf %247, %250 : vector<8x96xf32>
    %252 = vector.extract_strided_slice %251 {offsets = [0, 0], sizes = [8, 32], strides = [1, 1]} : vector<8x96xf32> to vector<8x32xf32>
    %253 = vector.extract_strided_slice %251 {offsets = [0, 32], sizes = [8, 32], strides = [1, 1]} : vector<8x96xf32> to vector<8x32xf32>
    %254 = vector.extract_strided_slice %251 {offsets = [0, 64], sizes = [8, 32], strides = [1, 1]} : vector<8x96xf32> to vector<8x32xf32>
    %c1_106 = arith.constant 1 : index
    %c0_107 = arith.constant 0 : index
    %c0_108 = arith.constant 0 : index
    %c0_109 = arith.constant 0 : index
    %255 = vector.load %arg7[%c1_106, %c0_107, %c0_108, %c0_109] : memref<2x4x8x32xf32, #tpu.memory_space<vmem>>, vector<1x4x8x32xf32>
    %256 = vector.shape_cast %255 : vector<1x4x8x32xf32> to vector<4x8x32xf32>
    %c1_110 = arith.constant 1 : index
    %c0_111 = arith.constant 0 : index
    %c0_112 = arith.constant 0 : index
    %257 = vector.load %arg8[%c1_110, %c0_111, %c0_112] : memref<2x1x32xf32, #tpu.memory_space<vmem>>, vector<1x1x32xf32>
    %258 = vector.shape_cast %257 : vector<1x1x32xf32> to vector<1x32xf32>
    %259 = vector.extract_strided_slice %252 {offsets = [0, 0], sizes = [8, 8], strides = [1, 1]} : vector<8x32xf32> to vector<8x8xf32>
    %260 = vector.extract_strided_slice %252 {offsets = [0, 8], sizes = [8, 8], strides = [1, 1]} : vector<8x32xf32> to vector<8x8xf32>
    %261 = vector.extract_strided_slice %252 {offsets = [0, 16], sizes = [8, 8], strides = [1, 1]} : vector<8x32xf32> to vector<8x8xf32>
    %262 = vector.extract_strided_slice %252 {offsets = [0, 24], sizes = [8, 8], strides = [1, 1]} : vector<8x32xf32> to vector<8x8xf32>
    %263 = vector.shape_cast %259 : vector<8x8xf32> to vector<1x8x8xf32>
    %264 = vector.shape_cast %260 : vector<8x8xf32> to vector<1x8x8xf32>
    %265 = vector.shape_cast %261 : vector<8x8xf32> to vector<1x8x8xf32>
    %266 = vector.shape_cast %262 : vector<8x8xf32> to vector<1x8x8xf32>
    %267 = tpu.concatenate %263, %264, %265, %266 in 0 : vector<1x8x8xf32>, vector<1x8x8xf32>, vector<1x8x8xf32>, vector<1x8x8xf32> -> vector<4x8x8xf32>
    %268 = vector.extract_strided_slice %253 {offsets = [0, 0], sizes = [8, 8], strides = [1, 1]} : vector<8x32xf32> to vector<8x8xf32>
    %269 = vector.extract_strided_slice %253 {offsets = [0, 8], sizes = [8, 8], strides = [1, 1]} : vector<8x32xf32> to vector<8x8xf32>
    %270 = vector.extract_strided_slice %253 {offsets = [0, 16], sizes = [8, 8], strides = [1, 1]} : vector<8x32xf32> to vector<8x8xf32>
    %271 = vector.extract_strided_slice %253 {offsets = [0, 24], sizes = [8, 8], strides = [1, 1]} : vector<8x32xf32> to vector<8x8xf32>
    %272 = vector.shape_cast %268 : vector<8x8xf32> to vector<1x8x8xf32>
    %273 = vector.shape_cast %269 : vector<8x8xf32> to vector<1x8x8xf32>
    %274 = vector.shape_cast %270 : vector<8x8xf32> to vector<1x8x8xf32>
    %275 = vector.shape_cast %271 : vector<8x8xf32> to vector<1x8x8xf32>
    %276 = tpu.concatenate %272, %273, %274, %275 in 0 : vector<1x8x8xf32>, vector<1x8x8xf32>, vector<1x8x8xf32>, vector<1x8x8xf32> -> vector<4x8x8xf32>
    %277 = vector.extract_strided_slice %254 {offsets = [0, 0], sizes = [8, 8], strides = [1, 1]} : vector<8x32xf32> to vector<8x8xf32>
    %278 = vector.extract_strided_slice %254 {offsets = [0, 8], sizes = [8, 8], strides = [1, 1]} : vector<8x32xf32> to vector<8x8xf32>
    %279 = vector.extract_strided_slice %254 {offsets = [0, 16], sizes = [8, 8], strides = [1, 1]} : vector<8x32xf32> to vector<8x8xf32>
    %280 = vector.extract_strided_slice %254 {offsets = [0, 24], sizes = [8, 8], strides = [1, 1]} : vector<8x32xf32> to vector<8x8xf32>
    %281 = vector.shape_cast %277 : vector<8x8xf32> to vector<1x8x8xf32>
    %282 = vector.shape_cast %278 : vector<8x8xf32> to vector<1x8x8xf32>
    %283 = vector.shape_cast %279 : vector<8x8xf32> to vector<1x8x8xf32>
    %284 = vector.shape_cast %280 : vector<8x8xf32> to vector<1x8x8xf32>
    %285 = tpu.concatenate %281, %282, %283, %284 in 0 : vector<1x8x8xf32>, vector<1x8x8xf32>, vector<1x8x8xf32>, vector<1x8x8xf32> -> vector<4x8x8xf32>
    "tpu.trace_start"() <{level = 10 : i32, message = "hqd,hkd->hqk"}> : () -> ()
    %cst_113 = arith.constant dense<0.000000e+00> : vector<4x8x8xf32>
    %286 = tpu.matmul %267, %276, %cst_113 {dimension_numbers = #tpu.dot_dimension_numbers<[2], [2], [1], [1], [0, 0, 0, 1, 1, 1], [0], [0]>} : vector<4x8x8xf32>, vector<4x8x8xf32>, vector<4x8x8xf32> -> vector<4x8x8xf32>
    "tpu.trace_stop"() : () -> ()
    %287 = vector.broadcast %2 : vector<1x8x8xf32> to vector<4x8x8xf32>
    %288 = arith.addf %286, %287 : vector<4x8x8xf32>
    %cst_114 = arith.constant dense<0xFF800000> : vector<4x8xf32>
    %289 = vector.multi_reduction <maximumf>, %288, %cst_114 [2] : vector<4x8x8xf32> to vector<4x8xf32>
    %290 = vector.shape_cast %289 : vector<4x8xf32> to vector<4x8x1xf32>
    %291 = vector.broadcast %290 : vector<4x8x1xf32> to vector<4x8x8xf32>
    %292 = arith.subf %288, %291 : vector<4x8x8xf32>
    %293 = math.exp %292 : vector<4x8x8xf32>
    %cst_115 = arith.constant dense<0.000000e+00> : vector<4x8xf32>
    %294 = vector.multi_reduction <add>, %293, %cst_115 [2] : vector<4x8x8xf32> to vector<4x8xf32>
    %295 = vector.shape_cast %294 : vector<4x8xf32> to vector<4x8x1xf32>
    %296 = tpu.reciprocal %295 {approx = true} : vector<4x8x1xf32> -> vector<4x8x1xf32>
    %297 = vector.broadcast %296 : vector<4x8x1xf32> to vector<4x8x8xf32>
    %298 = arith.mulf %293, %297 : vector<4x8x8xf32>
    "tpu.trace_start"() <{level = 10 : i32, message = "hqk,hkd->hqd"}> : () -> ()
    %cst_116 = arith.constant dense<0.000000e+00> : vector<4x8x8xf32>
    %299 = tpu.matmul %298, %285, %cst_116 {dimension_numbers = #tpu.dot_dimension_numbers<[2], [1], [1], [2], [0, 0, 0, 1, 1, 2], [0], [0]>} : vector<4x8x8xf32>, vector<4x8x8xf32>, vector<4x8x8xf32> -> vector<4x8x8xf32>
    "tpu.trace_stop"() : () -> ()
    "tpu.trace_start"() <{level = 10 : i32, message = "hqd,hdn->hqn"}> : () -> ()
    %cst_117 = arith.constant dense<0.000000e+00> : vector<4x8x32xf32>
    %300 = tpu.matmul %299, %256, %cst_117 {dimension_numbers = #tpu.dot_dimension_numbers<[2], [1], [1], [2], [0, 0, 0, 1, 1, 2], [0], [0]>} : vector<4x8x8xf32>, vector<4x8x32xf32>, vector<4x8x32xf32> -> vector<4x8x32xf32>
    "tpu.trace_stop"() : () -> ()
    %cst_118 = arith.constant dense<0.000000e+00> : vector<8x32xf32>
    %301 = vector.multi_reduction <add>, %300, %cst_118 [0] : vector<4x8x32xf32> to vector<8x32xf32>
    %302 = vector.broadcast %258 : vector<1x32xf32> to vector<8x32xf32>
    %303 = arith.addf %301, %302 : vector<8x32xf32>
    %304 = arith.addf %217, %303 : vector<8x32xf32>
    %305 = vector.extract_strided_slice %219 {offsets = [1, 0], sizes = [1, 32], strides = [1, 1]} : vector<3x32xf32> to vector<1x32xf32>
    %306 = vector.extract_strided_slice %221 {offsets = [1, 0], sizes = [1, 32], strides = [1, 1]} : vector<3x32xf32> to vector<1x32xf32>
    %cst_119 = arith.constant dense<0.000000e+00> : vector<8xf32>
    %307 = vector.multi_reduction <add>, %304, %cst_119 [1] : vector<8x32xf32> to vector<8xf32>
    %308 = vector.shape_cast %307 : vector<8xf32> to vector<8x1xf32>
    %cst_120 = arith.constant 3.200000e+01 : f32
    %309 = vector.broadcast %cst_120 : f32 to vector<8x1xf32>
    %310 = arith.divf %308, %309 : vector<8x1xf32>
    %311 = vector.broadcast %310 : vector<8x1xf32> to vector<8x32xf32>
    %312 = arith.subf %304, %311 : vector<8x32xf32>
    %313 = arith.mulf %312, %312 : vector<8x32xf32>
    %cst_121 = arith.constant dense<0.000000e+00> : vector<8xf32>
    %314 = vector.multi_reduction <add>, %313, %cst_121 [1] : vector<8x32xf32> to vector<8xf32>
    %315 = vector.shape_cast %314 : vector<8xf32> to vector<8x1xf32>
    %cst_122 = arith.constant 0.0322580636 : f32
    %316 = vector.broadcast %cst_122 : f32 to vector<8x1xf32>
    %317 = arith.mulf %315, %316 : vector<8x1xf32>
    %318 = math.sqrt %317 : vector<8x1xf32>
    %319 = vector.broadcast %305 : vector<1x32xf32> to vector<8x32xf32>
    %320 = arith.mulf %319, %312 : vector<8x32xf32>
    %cst_123 = arith.constant 9.99999997E-7 : f32
    %321 = vector.broadcast %cst_123 : f32 to vector<8x1xf32>
    %322 = arith.addf %318, %321 : vector<8x1xf32>
    %323 = tpu.reciprocal %322 : vector<8x1xf32> -> vector<8x1xf32>
    %324 = vector.broadcast %323 : vector<8x1xf32> to vector<8x32xf32>
    %325 = arith.mulf %320, %324 : vector<8x32xf32>
    %326 = vector.broadcast %306 : vector<1x32xf32> to vector<8x32xf32>
    %327 = arith.addf %325, %326 : vector<8x32xf32>
    %c1_124 = arith.constant 1 : index
    %c0_125 = arith.constant 0 : index
    %c0_126 = arith.constant 0 : index
    %328 = vector.load %arg9[%c1_124, %c0_125, %c0_126] : memref<2x32x32xf32, #tpu.memory_space<vmem>>, vector<1x32x32xf32>
    %329 = vector.shape_cast %328 : vector<1x32x32xf32> to vector<32x32xf32>
    %cst_127 = arith.constant dense<0.000000e+00> : vector<8x32xf32>
    %330 = tpu.matmul %327, %329, %cst_127 {dimension_numbers = #tpu.dot_dimension_numbers<[1], [0], [0], [1], [0, 0, 1, 1], [], []>} : vector<8x32xf32>, vector<32x32xf32>, vector<8x32xf32> -> vector<8x32xf32>
    %c1_128 = arith.constant 1 : index
    %c0_129 = arith.constant 0 : index
    %c0_130 = arith.constant 0 : index
    %331 = vector.load %arg10[%c1_128, %c0_129, %c0_130] : memref<2x1x32xf32, #tpu.memory_space<vmem>>, vector<1x1x32xf32>
    %332 = vector.shape_cast %331 : vector<1x1x32xf32> to vector<1x32xf32>
    %333 = vector.broadcast %332 : vector<1x32xf32> to vector<8x32xf32>
    %334 = arith.addf %330, %333 : vector<8x32xf32>
    %335 = vector.extract_strided_slice %8 {offsets = [0, 64], sizes = [16, 32], strides = [1, 1]} : vector<16x128xf32> to vector<16x32xf32>
    %336 = vector.extract_strided_slice %8 {offsets = [0, 96], sizes = [16, 32], strides = [1, 1]} : vector<16x128xf32> to vector<16x32xf32>
    %c1_131 = arith.constant 1 : index
    %c0_132 = arith.constant 0 : index
    %c0_133 = arith.constant 0 : index
    %c0_134 = arith.constant 0 : index
    %337 = vector.load %arg13[%c1_131, %c0_132, %c0_133, %c0_134] : memref<2x4x8x32xf32, #tpu.memory_space<vmem>>, vector<1x4x8x32xf32>
    %338 = vector.shape_cast %337 : vector<1x4x8x32xf32> to vector<4x8x32xf32>
    %c1_135 = arith.constant 1 : index
    %c0_136 = arith.constant 0 : index
    %c0_137 = arith.constant 0 : index
    %339 = vector.load %arg14[%c1_135, %c0_136, %c0_137] : memref<2x1x32xf32, #tpu.memory_space<vmem>>, vector<1x1x32xf32>
    %340 = vector.shape_cast %339 : vector<1x1x32xf32> to vector<1x32xf32>
    %341 = vector.extract_strided_slice %334 {offsets = [0, 0], sizes = [8, 8], strides = [1, 1]} : vector<8x32xf32> to vector<8x8xf32>
    %342 = vector.extract_strided_slice %334 {offsets = [0, 8], sizes = [8, 8], strides = [1, 1]} : vector<8x32xf32> to vector<8x8xf32>
    %343 = vector.extract_strided_slice %334 {offsets = [0, 16], sizes = [8, 8], strides = [1, 1]} : vector<8x32xf32> to vector<8x8xf32>
    %344 = vector.extract_strided_slice %334 {offsets = [0, 24], sizes = [8, 8], strides = [1, 1]} : vector<8x32xf32> to vector<8x8xf32>
    %345 = vector.shape_cast %341 : vector<8x8xf32> to vector<1x8x8xf32>
    %346 = vector.shape_cast %342 : vector<8x8xf32> to vector<1x8x8xf32>
    %347 = vector.shape_cast %343 : vector<8x8xf32> to vector<1x8x8xf32>
    %348 = vector.shape_cast %344 : vector<8x8xf32> to vector<1x8x8xf32>
    %349 = tpu.concatenate %345, %346, %347, %348 in 0 : vector<1x8x8xf32>, vector<1x8x8xf32>, vector<1x8x8xf32>, vector<1x8x8xf32> -> vector<4x8x8xf32>
    %350 = vector.extract_strided_slice %335 {offsets = [0, 0], sizes = [16, 8], strides = [1, 1]} : vector<16x32xf32> to vector<16x8xf32>
    %351 = vector.extract_strided_slice %335 {offsets = [0, 8], sizes = [16, 8], strides = [1, 1]} : vector<16x32xf32> to vector<16x8xf32>
    %352 = vector.extract_strided_slice %335 {offsets = [0, 16], sizes = [16, 8], strides = [1, 1]} : vector<16x32xf32> to vector<16x8xf32>
    %353 = vector.extract_strided_slice %335 {offsets = [0, 24], sizes = [16, 8], strides = [1, 1]} : vector<16x32xf32> to vector<16x8xf32>
    %354 = vector.shape_cast %350 : vector<16x8xf32> to vector<1x16x8xf32>
    %355 = vector.shape_cast %351 : vector<16x8xf32> to vector<1x16x8xf32>
    %356 = vector.shape_cast %352 : vector<16x8xf32> to vector<1x16x8xf32>
    %357 = vector.shape_cast %353 : vector<16x8xf32> to vector<1x16x8xf32>
    %358 = tpu.concatenate %354, %355, %356, %357 in 0 : vector<1x16x8xf32>, vector<1x16x8xf32>, vector<1x16x8xf32>, vector<1x16x8xf32> -> vector<4x16x8xf32>
    %359 = vector.extract_strided_slice %336 {offsets = [0, 0], sizes = [16, 8], strides = [1, 1]} : vector<16x32xf32> to vector<16x8xf32>
    %360 = vector.extract_strided_slice %336 {offsets = [0, 8], sizes = [16, 8], strides = [1, 1]} : vector<16x32xf32> to vector<16x8xf32>
    %361 = vector.extract_strided_slice %336 {offsets = [0, 16], sizes = [16, 8], strides = [1, 1]} : vector<16x32xf32> to vector<16x8xf32>
    %362 = vector.extract_strided_slice %336 {offsets = [0, 24], sizes = [16, 8], strides = [1, 1]} : vector<16x32xf32> to vector<16x8xf32>
    %363 = vector.shape_cast %359 : vector<16x8xf32> to vector<1x16x8xf32>
    %364 = vector.shape_cast %360 : vector<16x8xf32> to vector<1x16x8xf32>
    %365 = vector.shape_cast %361 : vector<16x8xf32> to vector<1x16x8xf32>
    %366 = vector.shape_cast %362 : vector<16x8xf32> to vector<1x16x8xf32>
    %367 = tpu.concatenate %363, %364, %365, %366 in 0 : vector<1x16x8xf32>, vector<1x16x8xf32>, vector<1x16x8xf32>, vector<1x16x8xf32> -> vector<4x16x8xf32>
    "tpu.trace_start"() <{level = 10 : i32, message = "hqd,hkd->hqk"}> : () -> ()
    %cst_138 = arith.constant dense<0.000000e+00> : vector<4x8x16xf32>
    %368 = tpu.matmul %349, %358, %cst_138 {dimension_numbers = #tpu.dot_dimension_numbers<[2], [2], [1], [1], [0, 0, 0, 1, 1, 1], [0], [0]>} : vector<4x8x8xf32>, vector<4x16x8xf32>, vector<4x8x16xf32> -> vector<4x8x16xf32>
    "tpu.trace_stop"() : () -> ()
    %369 = vector.broadcast %3 : vector<1x1x16xf32> to vector<4x8x16xf32>
    %370 = arith.addf %368, %369 : vector<4x8x16xf32>
    %cst_139 = arith.constant dense<0xFF800000> : vector<4x8xf32>
    %371 = vector.multi_reduction <maximumf>, %370, %cst_139 [2] : vector<4x8x16xf32> to vector<4x8xf32>
    %372 = vector.shape_cast %371 : vector<4x8xf32> to vector<4x8x1xf32>
    %373 = vector.broadcast %372 : vector<4x8x1xf32> to vector<4x8x16xf32>
    %374 = arith.subf %370, %373 : vector<4x8x16xf32>
    %375 = math.exp %374 : vector<4x8x16xf32>
    %cst_140 = arith.constant dense<0.000000e+00> : vector<4x8xf32>
    %376 = vector.multi_reduction <add>, %375, %cst_140 [2] : vector<4x8x16xf32> to vector<4x8xf32>
    %377 = vector.shape_cast %376 : vector<4x8xf32> to vector<4x8x1xf32>
    %378 = tpu.reciprocal %377 {approx = true} : vector<4x8x1xf32> -> vector<4x8x1xf32>
    %379 = vector.broadcast %378 : vector<4x8x1xf32> to vector<4x8x16xf32>
    %380 = arith.mulf %375, %379 : vector<4x8x16xf32>
    "tpu.trace_start"() <{level = 10 : i32, message = "hqk,hkd->hqd"}> : () -> ()
    %cst_141 = arith.constant dense<0.000000e+00> : vector<4x8x8xf32>
    %381 = tpu.matmul %380, %367, %cst_141 {dimension_numbers = #tpu.dot_dimension_numbers<[2], [1], [1], [2], [0, 0, 0, 1, 1, 2], [0], [0]>} : vector<4x8x16xf32>, vector<4x16x8xf32>, vector<4x8x8xf32> -> vector<4x8x8xf32>
    "tpu.trace_stop"() : () -> ()
    "tpu.trace_start"() <{level = 10 : i32, message = "hqd,hdn->hqn"}> : () -> ()
    %cst_142 = arith.constant dense<0.000000e+00> : vector<4x8x32xf32>
    %382 = tpu.matmul %381, %338, %cst_142 {dimension_numbers = #tpu.dot_dimension_numbers<[2], [1], [1], [2], [0, 0, 0, 1, 1, 2], [0], [0]>} : vector<4x8x8xf32>, vector<4x8x32xf32>, vector<4x8x32xf32> -> vector<4x8x32xf32>
    "tpu.trace_stop"() : () -> ()
    %cst_143 = arith.constant dense<0.000000e+00> : vector<8x32xf32>
    %383 = vector.multi_reduction <add>, %382, %cst_143 [0] : vector<4x8x32xf32> to vector<8x32xf32>
    %384 = vector.broadcast %340 : vector<1x32xf32> to vector<8x32xf32>
    %385 = arith.addf %383, %384 : vector<8x32xf32>
    %386 = arith.addf %304, %385 : vector<8x32xf32>
    %387 = vector.extract_strided_slice %219 {offsets = [2, 0], sizes = [1, 32], strides = [1, 1]} : vector<3x32xf32> to vector<1x32xf32>
    %388 = vector.extract_strided_slice %221 {offsets = [2, 0], sizes = [1, 32], strides = [1, 1]} : vector<3x32xf32> to vector<1x32xf32>
    %cst_144 = arith.constant dense<0.000000e+00> : vector<8xf32>
    %389 = vector.multi_reduction <add>, %386, %cst_144 [1] : vector<8x32xf32> to vector<8xf32>
    %390 = vector.shape_cast %389 : vector<8xf32> to vector<8x1xf32>
    %cst_145 = arith.constant 3.200000e+01 : f32
    %391 = vector.broadcast %cst_145 : f32 to vector<8x1xf32>
    %392 = arith.divf %390, %391 : vector<8x1xf32>
    %393 = vector.broadcast %392 : vector<8x1xf32> to vector<8x32xf32>
    %394 = arith.subf %386, %393 : vector<8x32xf32>
    %395 = arith.mulf %394, %394 : vector<8x32xf32>
    %cst_146 = arith.constant dense<0.000000e+00> : vector<8xf32>
    %396 = vector.multi_reduction <add>, %395, %cst_146 [1] : vector<8x32xf32> to vector<8xf32>
    %397 = vector.shape_cast %396 : vector<8xf32> to vector<8x1xf32>
    %cst_147 = arith.constant 0.0322580636 : f32
    %398 = vector.broadcast %cst_147 : f32 to vector<8x1xf32>
    %399 = arith.mulf %397, %398 : vector<8x1xf32>
    %400 = math.sqrt %399 : vector<8x1xf32>
    %401 = vector.broadcast %387 : vector<1x32xf32> to vector<8x32xf32>
    %402 = arith.mulf %401, %394 : vector<8x32xf32>
    %cst_148 = arith.constant 9.99999997E-7 : f32
    %403 = vector.broadcast %cst_148 : f32 to vector<8x1xf32>
    %404 = arith.addf %400, %403 : vector<8x1xf32>
    %405 = tpu.reciprocal %404 : vector<8x1xf32> -> vector<8x1xf32>
    %406 = vector.broadcast %405 : vector<8x1xf32> to vector<8x32xf32>
    %407 = arith.mulf %402, %406 : vector<8x32xf32>
    %408 = vector.broadcast %388 : vector<1x32xf32> to vector<8x32xf32>
    %409 = arith.addf %407, %408 : vector<8x32xf32>
    %c1_149 = arith.constant 1 : index
    %c0_150 = arith.constant 0 : index
    %c0_151 = arith.constant 0 : index
    %410 = vector.load %arg15[%c1_149, %c0_150, %c0_151] : memref<2x32x64xf32, #tpu.memory_space<vmem>>, vector<1x32x64xf32>
    %411 = vector.shape_cast %410 : vector<1x32x64xf32> to vector<32x64xf32>
    %cst_152 = arith.constant dense<0.000000e+00> : vector<8x64xf32>
    %412 = tpu.matmul %409, %411, %cst_152 {dimension_numbers = #tpu.dot_dimension_numbers<[1], [0], [0], [1], [0, 0, 1, 1], [], []>} : vector<8x32xf32>, vector<32x64xf32>, vector<8x64xf32> -> vector<8x64xf32>
    %c1_153 = arith.constant 1 : index
    %c0_154 = arith.constant 0 : index
    %c0_155 = arith.constant 0 : index
    %413 = vector.load %arg16[%c1_153, %c0_154, %c0_155] : memref<2x1x64xf32, #tpu.memory_space<vmem>>, vector<1x1x64xf32>
    %414 = vector.shape_cast %413 : vector<1x1x64xf32> to vector<1x64xf32>
    %415 = vector.broadcast %414 : vector<1x64xf32> to vector<8x64xf32>
    %416 = arith.addf %412, %415 : vector<8x64xf32>
    %cst_156 = arith.constant 0.000000e+00 : f32
    %417 = vector.broadcast %cst_156 : f32 to vector<8x64xf32>
    %418 = arith.maximumf %416, %417 : vector<8x64xf32>
    %c1_157 = arith.constant 1 : index
    %c0_158 = arith.constant 0 : index
    %c0_159 = arith.constant 0 : index
    %419 = vector.load %arg17[%c1_157, %c0_158, %c0_159] : memref<2x64x32xf32, #tpu.memory_space<vmem>>, vector<1x64x32xf32>
    %420 = vector.shape_cast %419 : vector<1x64x32xf32> to vector<64x32xf32>
    %cst_160 = arith.constant dense<0.000000e+00> : vector<8x32xf32>
    %421 = tpu.matmul %418, %420, %cst_160 {dimension_numbers = #tpu.dot_dimension_numbers<[1], [0], [0], [1], [0, 0, 1, 1], [], []>} : vector<8x64xf32>, vector<64x32xf32>, vector<8x32xf32> -> vector<8x32xf32>
    %422 = arith.addf %386, %421 : vector<8x32xf32>
    %c1_161 = arith.constant 1 : index
    %c0_162 = arith.constant 0 : index
    %c0_163 = arith.constant 0 : index
    %423 = vector.load %arg18[%c1_161, %c0_162, %c0_163] : memref<2x1x32xf32, #tpu.memory_space<vmem>>, vector<1x1x32xf32>
    %424 = vector.shape_cast %423 : vector<1x1x32xf32> to vector<1x32xf32>
    %425 = vector.broadcast %424 : vector<1x32xf32> to vector<8x32xf32>
    %426 = arith.addf %422, %425 : vector<8x32xf32>
    %c0_164 = arith.constant 0 : index
    %c0_165 = arith.constant 0 : index
    %427 = vector.load %arg21[%c0_164, %c0_165] : memref<1x32xf32, #tpu.memory_space<vmem>>, vector<1x32xf32>
    %c0_166 = arith.constant 0 : index
    %c0_167 = arith.constant 0 : index
    %428 = vector.load %arg22[%c0_166, %c0_167] : memref<1x32xf32, #tpu.memory_space<vmem>>, vector<1x32xf32>
    %cst_168 = arith.constant dense<0.000000e+00> : vector<8xf32>
    %429 = vector.multi_reduction <add>, %426, %cst_168 [1] : vector<8x32xf32> to vector<8xf32>
    %430 = vector.shape_cast %429 : vector<8xf32> to vector<8x1xf32>
    %cst_169 = arith.constant 3.200000e+01 : f32
    %431 = vector.broadcast %cst_169 : f32 to vector<8x1xf32>
    %432 = arith.divf %430, %431 : vector<8x1xf32>
    %433 = vector.broadcast %432 : vector<8x1xf32> to vector<8x32xf32>
    %434 = arith.subf %426, %433 : vector<8x32xf32>
    %435 = arith.mulf %434, %434 : vector<8x32xf32>
    %cst_170 = arith.constant dense<0.000000e+00> : vector<8xf32>
    %436 = vector.multi_reduction <add>, %435, %cst_170 [1] : vector<8x32xf32> to vector<8xf32>
    %437 = vector.shape_cast %436 : vector<8xf32> to vector<8x1xf32>
    %cst_171 = arith.constant 0.0322580636 : f32
    %438 = vector.broadcast %cst_171 : f32 to vector<8x1xf32>
    %439 = arith.mulf %437, %438 : vector<8x1xf32>
    %440 = math.sqrt %439 : vector<8x1xf32>
    %441 = vector.broadcast %427 : vector<1x32xf32> to vector<8x32xf32>
    %442 = arith.mulf %441, %434 : vector<8x32xf32>
    %cst_172 = arith.constant 9.99999997E-7 : f32
    %443 = vector.broadcast %cst_172 : f32 to vector<8x1xf32>
    %444 = arith.addf %440, %443 : vector<8x1xf32>
    %445 = tpu.reciprocal %444 : vector<8x1xf32> -> vector<8x1xf32>
    %446 = vector.broadcast %445 : vector<8x1xf32> to vector<8x32xf32>
    %447 = arith.mulf %442, %446 : vector<8x32xf32>
    %448 = vector.broadcast %428 : vector<1x32xf32> to vector<8x32xf32>
    %449 = arith.addf %447, %448 : vector<8x32xf32>
    %c0_173 = arith.constant 0 : index
    %c0_174 = arith.constant 0 : index
    %450 = vector.load %arg23[%c0_173, %c0_174] : memref<8x32xf32, #tpu.memory_space<vmem>>, vector<8x32xf32>
    tpu.vector_store %arg23[%c0_173, %c0_174], %449 {strides = array<i32>} : memref<8x32xf32, #tpu.memory_space<vmem>>, vector<8x32xf32>,
    return
  }
  func.func @transform_0(%arg0: i32) -> (i32, i32) {
    %c0_i32 = arith.constant 0 : i32
    %c0_i32_0 = arith.constant 0 : i32
    return %arg0, %c0_i32 : i32, i32
  }
  func.func @transform_1(%arg0: i32) -> (i32, i32) {
    %c0_i32 = arith.constant 0 : i32
    %c0_i32_0 = arith.constant 0 : i32
    return %arg0, %c0_i32 : i32, i32
  }
  func.func @transform_2(%arg0: i32) -> (i32, i32, i32) {
    %c0_i32 = arith.constant 0 : i32
    %c0_i32_0 = arith.constant 0 : i32
    %c0_i32_1 = arith.constant 0 : i32
    return %arg0, %c0_i32, %c0_i32_0 : i32, i32, i32
  }
  func.func @transform_3(%arg0: i32) -> (i32, i32, i32) {
    %c0_i32 = arith.constant 0 : i32
    %c0_i32_0 = arith.constant 0 : i32
    %c0_i32_1 = arith.constant 0 : i32
    return %arg0, %c0_i32, %c0_i32_0 : i32, i32, i32
  }
  func.func @transform_4(%arg0: i32) -> (i32, i32, i32) {
    %c0_i32 = arith.constant 0 : i32
    %c0_i32_0 = arith.constant 0 : i32
    %c0_i32_1 = arith.constant 0 : i32
    %c0_i32_2 = arith.constant 0 : i32
    return %c0_i32, %c0_i32_0, %c0_i32_1 : i32, i32, i32
  }
  func.func @transform_5(%arg0: i32) -> (i32, i32, i32) {
    %c0_i32 = arith.constant 0 : i32
    %c0_i32_0 = arith.constant 0 : i32
    %c0_i32_1 = arith.constant 0 : i32
    %c0_i32_2 = arith.constant 0 : i32
    return %c0_i32, %c0_i32_0, %c0_i32_1 : i32, i32, i32
  }
  func.func @transform_6(%arg0: i32) -> (i32, i32, i32, i32) {
    %c0_i32 = arith.constant 0 : i32
    %c0_i32_0 = arith.constant 0 : i32
    %c0_i32_1 = arith.constant 0 : i32
    %c0_i32_2 = arith.constant 0 : i32
    %c0_i32_3 = arith.constant 0 : i32
    return %c0_i32, %c0_i32_0, %c0_i32_1, %c0_i32_2 : i32, i32, i32, i32
  }
  func.func @transform_7(%arg0: i32) -> (i32, i32, i32) {
    %c0_i32 = arith.constant 0 : i32
    %c0_i32_0 = arith.constant 0 : i32
    %c0_i32_1 = arith.constant 0 : i32
    %c0_i32_2 = arith.constant 0 : i32
    return %c0_i32, %c0_i32_0, %c0_i32_1 : i32, i32, i32
  }
  func.func @transform_8(%arg0: i32) -> (i32, i32, i32) {
    %c0_i32 = arith.constant 0 : i32
    %c0_i32_0 = arith.constant 0 : i32
    %c0_i32_1 = arith.constant 0 : i32
    %c0_i32_2 = arith.constant 0 : i32
    return %c0_i32, %c0_i32_0, %c0_i32_1 : i32, i32, i32
  }
  func.func @transform_9(%arg0: i32) -> (i32, i32, i32) {
    %c0_i32 = arith.constant 0 : i32
    %c0_i32_0 = arith.constant 0 : i32
    %c0_i32_1 = arith.constant 0 : i32
    %c0_i32_2 = arith.constant 0 : i32
    return %c0_i32, %c0_i32_0, %c0_i32_1 : i32, i32, i32
  }
  func.func @transform_10(%arg0: i32) -> (i32, i32) {
    %c0_i32 = arith.constant 0 : i32
    %c0_i32_0 = arith.constant 0 : i32
    %c0_i32_1 = arith.constant 0 : i32
    return %c0_i32, %c0_i32_0 : i32, i32
  }
  func.func @transform_11(%arg0: i32) -> (i32, i32) {
    %c0_i32 = arith.constant 0 : i32
    %c0_i32_0 = arith.constant 0 : i32
    %c0_i32_1 = arith.constant 0 : i32
    return %c0_i32, %c0_i32_0 : i32, i32
  }
  func.func @transform_12(%arg0: i32) -> (i32, i32, i32, i32) {
    %c0_i32 = arith.constant 0 : i32
    %c0_i32_0 = arith.constant 0 : i32
    %c0_i32_1 = arith.constant 0 : i32
    %c0_i32_2 = arith.constant 0 : i32
    %c0_i32_3 = arith.constant 0 : i32
    return %c0_i32, %c0_i32_0, %c0_i32_1, %c0_i32_2 : i32, i32, i32, i32
  }
  func.func @transform_13(%arg0: i32) -> (i32, i32, i32) {
    %c0_i32 = arith.constant 0 : i32
    %c0_i32_0 = arith.constant 0 : i32
    %c0_i32_1 = arith.constant 0 : i32
    %c0_i32_2 = arith.constant 0 : i32
    return %c0_i32, %c0_i32_0, %c0_i32_1 : i32, i32, i32
  }
  func.func @transform_14(%arg0: i32) -> (i32, i32, i32) {
    %c0_i32 = arith.constant 0 : i32
    %c0_i32_0 = arith.constant 0 : i32
    %c0_i32_1 = arith.constant 0 : i32
    %c0_i32_2 = arith.constant 0 : i32
    return %c0_i32, %c0_i32_0, %c0_i32_1 : i32, i32, i32
  }
  func.func @transform_15(%arg0: i32) -> (i32, i32, i32) {
    %c0_i32 = arith.constant 0 : i32
    %c0_i32_0 = arith.constant 0 : i32
    %c0_i32_1 = arith.constant 0 : i32
    %c0_i32_2 = arith.constant 0 : i32
    return %c0_i32, %c0_i32_0, %c0_i32_1 : i32, i32, i32
  }
  func.func @transform_16(%arg0: i32) -> (i32, i32, i32) {
    %c0_i32 = arith.constant 0 : i32
    %c0_i32_0 = arith.constant 0 : i32
    %c0_i32_1 = arith.constant 0 : i32
    %c0_i32_2 = arith.constant 0 : i32
    return %c0_i32, %c0_i32_0, %c0_i32_1 : i32, i32, i32
  }
  func.func @transform_17(%arg0: i32) -> (i32, i32, i32) {
    %c0_i32 = arith.constant 0 : i32
    %c0_i32_0 = arith.constant 0 : i32
    %c0_i32_1 = arith.constant 0 : i32
    %c0_i32_2 = arith.constant 0 : i32
    return %c0_i32, %c0_i32_0, %c0_i32_1 : i32, i32, i32
  }
  func.func @transform_18(%arg0: i32) -> (i32, i32, i32) {
    %c0_i32 = arith.constant 0 : i32
    %c0_i32_0 = arith.constant 0 : i32
    %c0_i32_1 = arith.constant 0 : i32
    %c0_i32_2 = arith.constant 0 : i32
    return %c0_i32, %c0_i32_0, %c0_i32_1 : i32, i32, i32
  }
  func.func @transform_19(%arg0: i32) -> (i32, i32, i32) {
    %c0_i32 = arith.constant 0 : i32
    %c0_i32_0 = arith.constant 0 : i32
    %c0_i32_1 = arith.constant 0 : i32
    %c0_i32_2 = arith.constant 0 : i32
    return %c0_i32, %c0_i32_0, %c0_i32_1 : i32, i32, i32
  }
  func.func @transform_20(%arg0: i32) -> (i32, i32) {
    %c0_i32 = arith.constant 0 : i32
    %c0_i32_0 = arith.constant 0 : i32
    %c0_i32_1 = arith.constant 0 : i32
    return %c0_i32, %c0_i32_0 : i32, i32
  }
  func.func @transform_21(%arg0: i32) -> (i32, i32) {
    %c0_i32 = arith.constant 0 : i32
    %c0_i32_0 = arith.constant 0 : i32
    %c0_i32_1 = arith.constant 0 : i32
    return %c0_i32, %c0_i32_0 : i32, i32
  }
  func.func @transform_22(%arg0: i32) -> (i32, i32) {
    %c0_i32 = arith.constant 0 : i32
    %c0_i32_0 = arith.constant 0 : i32
    return %arg0, %c0_i32 : i32, i32
  }
}

</mosaic_0001>

<bundles_post_ra>
// kernel: decoder_forward.1
= control target key start
LH: loop header
LB: loop body
LE: loop exit
PB: predicated region body
PF: predicated region fallthrough
CT: control target
= control target key end

     0   :  { %s7759_s0 = inlined_call_operand.vmem [shape: f32[16,32], index: 0, kind: input, shape index: {}]   ;;  %s7760_s1 = inlined_call_operand.vmem [shape: f32[32,32], index: 1, kind: input, shape index: {}]   ;;  %s7761_s2 = inlined_call_operand.vmem [shape: f32[2,8,8], index: 2, kind: input, shape index: {}]   ;;  %s7762_s3 = inlined_call_operand.vmem [shape: f32[2,1,16], index: 3, kind: input, shape index: {}]   ;;  %s7763_s4 = inlined_call_operand.vmem [shape: f32[2,32,96], index: 4, kind: input, shape index: {}]   ;;  %s7764_s5 = inlined_call_operand.vmem [shape: f32[2,1,96], index: 5, kind: input, shape index: {}]   ;;  %s7765_s6 = inlined_call_operand.vmem [shape: f32[2,4,8,32], index: 6, kind: input, shape index: {}]   ;;  %s7766_s7 = inlined_call_operand.vmem [shape: f32[2,1,32], index: 7, kind: input, shape index: {}]   ;;  %s7767_s8 = inlined_call_operand.vmem [shape: f32[2,32,32], index: 8, kind: input, shape index: {}]   ;;  %s7768_s9 = inlined_call_operand.vmem [shape: f32[2,1,32], index: 9, kind: input, shape index: {}]   ;;  %s7769_s10 = inlined_call_operand.vmem [shape: f32[32,128], index: 10, kind: input, shape index: {}]   ;;  %s7770_s11 = inlined_call_operand.vmem [shape: f32[1,128], index: 11, kind: input, shape index: {}]   ;;  %s7771_s12 = inlined_call_operand.vmem [shape: f32[2,4,8,32], index: 12, kind: input, shape index: {}]   ;;  %s7772_s13 = inlined_call_operand.vmem [shape: f32[2,1,32], index: 13, kind: input, shape index: {}]   ;;  %s7773_s14 = inlined_call_operand.vmem [shape: f32[2,32,64], index: 14, kind: input, shape index: {}]   ;;  %s7774_s15 = inlined_call_operand.vmem [shape: f32[2,1,64], index: 15, kind: input, shape index: {}]   ;;  %s7775_s16 = inlined_call_operand.vmem [shape: f32[2,64,32], index: 16, kind: input, shape index: {}]   ;;  %s7776_s17 = inlined_call_operand.vmem [shape: f32[2,1,32], index: 17, kind: input, shape index: {}]   ;;  %s7777_s18 = inlined_call_operand.vmem [shape: f32[2,3,32], index: 18, kind: input, shape index: {}]   ;;  %s7778_s19 = inlined_call_operand.vmem [shape: f32[2,3,32], index: 19, kind: input, shape index: {}]   ;;  %s7779_s20 = inlined_call_operand.vmem [shape: f32[1,32], index: 20, kind: input, shape index: {}]   ;;  %s7780_s21 = inlined_call_operand.vmem [shape: f32[1,32], index: 21, kind: input, shape index: {}]   ;;  %s7781_s22 = inlined_call_operand.hbm [shape: f32[16,32], index: 22, kind: output, shape index: {}]  }
   0x1   :  { %7804 = sst [smem:[#allocation11_spill]] %s7759_s0 }
   0x2   :  { %7805 = sst [smem:[#allocation12_spill]] %s7760_s1 }
   0x3   :  { %7806 = sst [smem:[#allocation13_spill]] %s7761_s2 }
   0x4   :  { %7807 = sst [smem:[#allocation14_spill]] %s7762_s3 }
   0x5   :  { %7808 = sst [smem:[#allocation15_spill]] %s7763_s4 }
   0x6   :  { %7809 = sst [smem:[#allocation16_spill]] %s7764_s5 }
   0x7   :  { %7810 = sst [smem:[#allocation17_spill]] %s7765_s6 }
   0x8   :  { %7811 = sst [smem:[#allocation18_spill]] %s7769_s10 }
   0x9   :  { %7812 = sst [smem:[#allocation19_spill]] %s7770_s11 }
   0xa   :  { %7813 = sst [smem:[#allocation20_spill]] %s7780_s21 }
   0xb   :  { %7814 = sst [smem:[#allocation21_spill]] %s7781_s22 }
   0xc   :  { %27 = vsyncpa [#allocation3], 0 }
   0xd   :  { %29 = vsyncpa [#allocation3 + $0x1], 0  ;;  %s6832_s3 = smov 0   ;;  %s6834_s28 = smov 0  }
   0xe   :  { %s6836_s29 = smov 0   ;;  %s6838_s30 = smov 0  }
   0xf LB: > { %7815 = sst [smem:[#allocation5_spill]] %s6694_s3  ;;  %s6853_s4 = sadd.s32 4294967295, %s6706_s30   ;;  %s6706_s30 = sphi %s6838_s30, %s7843_s30   ;;  %s6702_s29 = sphi %s6836_s29, %s7845_s29   ;;  %s6698_s28 = sphi %s6834_s28, %s7847_s28   ;;  %s6694_s3 = sphi %s6832_s3, %s7846_s3  }
  0x10   : > { %7816 = sst [smem:[#allocation6_spill]] %s6702_s29  ;;  %s5805_s0 = sadd.s32 4294967294, %s6706_s30  }
  0x11   : > { %7817 = sst [smem:[#allocation7_spill]] %s6706_s30  ;;  %s6857_s23 = sadd.s32 1, %s6706_s30  }
  0x12   : > { %7818 = sst [smem:[#allocation8_spill]] %s6857_s23  ;;  %s524_s1 = sadd.s32 1, %s6702_s29 }
  0x13   : > { %s521_s5 = ssub.s32 %s6706_s30, %s6857_s23  ;;  %p534_p0 = scmp.ne.s32.totalorder %s6702_s29, %s6698_s28 }
  0x14   : > { %p522_p1 = scmp.eq.s32.totalorder %s521_s5, 0  ;;  %p535_p2 = scmp.eq.s32.totalorder %s6853_s4, 1 }
  0x15   : > { %p540_p3 = scmp.ne.s32.totalorder %s6698_s28, %s6694_s3  ;;  %p541_p4 = scmp.eq.s32.totalorder %s5805_s0, 1 }
  0x16   : > { %s6868_s24 = scalar_select %p522_p1, %s6702_s29, %s524_s1  }
  0x17   : > { %p6870_p5 = por %p535_p2, %p534_p0  ;;  %p6874_p6 = por %p541_p4, %p540_p3 }
  0x18   : > { %7819 = sst [smem:[#allocation9_spill]] %s6868_s24  ;;  %p5808_p7 = scmp.ge.s32.totalorder %s6706_s30, 1 }
  0x19   : > { %s7821_s25 = scalar_select %p6874_p6, 1, 0 }
  0x1a   : > { %p642_p8 = scmp.lt.s32.totalorder %s6706_s30, 3 }
  0x1b   : > { %7822 = sst [smem:[#allocation10_spill]] %s7821_s25 }
  0x1c   : > { %p643_p9 = pnand %p5808_p7, %p642_p8 }
  0x1d   : > { %p715_p10 = scmp.lt.s32.totalorder (!%p643_p9), %s6853_s4, 1  ;;  %s7823_s1 = sld [smem:[#allocation11_spill]] (!%p643_p9) }
  0x1e   : > { %646 = sbr.rel (%p643_p9) target bundleno = 8220 (0x201c), region = 108  ;;  %s7824_s23 = sld [smem:[#allocation15_spill]] (!%p643_p9) }
  0x1f   : > { %s7825_s10 = sld [smem:[#allocation18_spill]] (!%p643_p9)  ;;  %s5811_s27 = sshll.u32 (!%p643_p9), %s6853_s4, 1 }
  0x20   : > { %p720_p11 = scmp.lt.s32.totalorder (!%p643_p9), %s5811_s27, 3  ;;  %s7826_s22 = sld [smem:[#allocation12_spill]] (!%p643_p9) }
  0x21   : > { %s7827_s0 = sld [smem:[#allocation16_spill]] (!%p643_p9)  ;;  %s7797_s3 = smov (!%p643_p9), 112  }
  0x22   : > { %s7795_s30 = smov (!%p643_p9), 96   ;;  %s7829_s29 = sld [smem:[#allocation13_spill]] (!%p643_p9) }
  0x23   : > { %s6882_s26 = scalar_select %p715_p10, %s6853_s4, 1  ;;  %vm748_vm0 = vcmask 261120   ;;  %v6708_v8 = vmov 0.0   ;;  %vm6709_vm1 = vmmov 0   ;;  %v850_v17 = vlaneseq  ;;  %v6923_v23 = vld [vmem:[%s7777_s18] sm:$0x7] }
  0x24   : > { %v866_v7 = vld [vmem:[%s7824_s23 + $0x18] sm:$0xff]  ;;  %6129 = vmatprep.subr.mxu1 %v6708_v8  ;;  %v865_v9 = vld [vmem:[%s7824_s23 + $0x10] sm:$0xff]  ;;  %6137 = vmatprep.mubr.msk.f32.mxu1 %vm6709_vm1, %v6708_v8  ;;  %v864_v10 = vld [vmem:[%s7824_s23 + $0x8] sm:$0xff]  ;;  %s7849_s27 = smov (!%p720_p11, %s5811_s27), 3  ;;  %vm961_vm4 = vcmask 64512   ;;  %s7831_s11 = sld [smem:[#allocation19_spill]] }
  0x25   : > { %s7788_s2 = sshll.u32 %s6882_s26, 3  ;;  %6130 = vmatpush3.msra.mxu1 %v866_v7  ;;  %v863_v11 = vld [vmem:[%s7824_s23] sm:$0xff]  ;;  %v6915_v21 = vshrl.u32 %v850_v17, 7  ;;  %v740_v31 = vld [vmem:[%s7825_s10 + $0x18] sm:$0xff]  ;;  %v739_v32 = vld [vmem:[%s7825_s10 + $0x10] sm:$0xff]  ;;  %s5812_s25 = sshll.u32 %s7849_s27, 3 }
  0x26   : > { %s718_s5 = scalar_lea.vmem %s7823_s1, %s7788_s2  ;;  %6131 = vmatprep.subr.mxu1 %v6708_v8  ;;  %v6930_v25 = vld [vmem:[%s7778_s19] sm:$0x7]  ;;  %6118 = vmatprep.subr.mxu0 %v740_v31  ;;  %v738_v33 = vld [vmem:[%s7825_s10 + $0x8] sm:$0xff]  ;;  %s723_s21 = scalar_lea.vmem %s7826_s22, %s5812_s25  ;;  %vm2369_vm7 = vcmask 130048   ;;  %vm3160_vm10 = vcmask 523264  }
  0x27   : > { %v6890_v0 = vld [vmem:[%s718_s5] sm:$0xff]  ;;  %6132 = vmatpush3.msra.mxu1 %v865_v9  ;;  %v6918_v22 = vsub.s32 0, %v6915_v21  ;;  %6119 = vmatpush3.msra.mxu0 %v740_v31  ;;  %v734_v36 = vld [vmem:[%s723_s21 + $0x8] sm:$0xff]  ;;  %s7801_s22 = smov 104   ;;  %s7828_s25 = sshll.u32 %s6882_s26, 3 }
  0x28   : > { %v832_v1 = vsel %vm748_vm0, %v6890_v0, 0.0  ;;  %6133 = vmatprep.subr.mxu1 %v6708_v8  ;;  %6120 = vmatprep.subr.mxu0 %v739_v32  ;;  %v737_v34 = vld [vmem:[%s7825_s10] sm:$0xff]  ;;  %s7003_s24 = scalar_lea.vmem %s7829_s29, %s7828_s25  ;;  %s7793_s2 = smov 64  }
  0x29   : > { %833 = vadd.xlane.f32.xlu0 %v832_v1  ;;  %6134 = vmatpush3.msra.mxu1 %v864_v10  ;;  %v853_v24 = vrot.slane %v6923_v23, %v6918_v22  ;;  %v861_v27 = vrot.slane %v6930_v25, %v6918_v22  ;;  %v733_v35 = vld [vmem:[%s723_s21] sm:$0xff]  ;;  %s7799_s21 = smov 120   ;;  %s7830_s1 = sld [smem:[#allocation17_spill]] }
  0x2a   : > { %6135 = vmatprep.subr.mxu1 %v6708_v8  ;;  %6121 = vmatpush3.msra.mxu0 %v739_v32  ;;  %v5817_v37 = vld [vmem:[%s7827_s0] ss:$0 sm:$0xff]  ;;  %s7833_s5 = smov 112   ;;  %s7836_s29 = smov 104  }
  0x2b   : > { %6136 = vmatpush3.msra.mxu1 %v863_v11  ;;  %6122 = vmatprep.subr.mxu0 %v738_v33  ;;  %v735_v50 = vld [vmem:[%s7003_s24] sm:$0xff]  ;;  %s7839_s10 = sld [smem:[#allocation21_spill]] }
  0x2c   : > { %6155 = vmatprep.subr.mxu1 %v6708_v8  ;;  %6123 = vmatpush3.msra.mxu0 %v738_v33 }
  0x2d   : > { %6124 = vmatprep.subr.mxu0 %v737_v34  ;;  %6126 = vmatprep.mubr.msk.f32.mxu0 %vm748_vm0, %v733_v35 }
  0x2e   : > { %6125 = vmatpush3.msra.mxu0 %v737_v34 }
  0x2f   : > { %6127 = vmatmul.mubr.msk.f32.vlgmr.msra.gmra.mxu0 %vm748_vm0, %v734_v36  ;;  %6140 = vmatprep.subr.mxu0 %v6708_v8 }
  0x30   : > { %6142 = vmatprep.mubr.msk.f32.mxu0 %vm6709_vm1, %v6708_v8 }
  0xb2   : > { %v834_v2 = vpop.xlane.xlu0 %833 }
  0xb3   : > { %v836_v3 = vmul.f32 0.03125, %v834_v2 }
  0xb5   : > { %v837_v4 = vsub.f32 %v6890_v0, %v836_v3 }
  0xb7   : > { %v838_v5 = vmul.f32 %v837_v4, %v837_v4  ;;  %v854_v26 = vmul.f32 %v853_v24, %v837_v4 }
  0xb9   : > { %v839_v6 = vsel %vm748_vm0, %v838_v5, 0.0 }
  0xba   : > { %840 = vadd.xlane.f32.xlu0 %v839_v6 }
  0xef   : > { %v6996_v48 = vpop.f32.mrf.mxu0 }
  0xf1   : > { %v7005_v49 = vpop.f32.mrf.mxu0 }
 0x143   : > { %v841_v12 = vpop.xlane.xlu0 %840 }
 0x144   : > { %v842_v13 = vmul.f32 0.032258064, %v841_v12 }
 0x146   : > { %6552 = vrsqrt.f32 %v842_v13  ;;  %vm845_vm2 = vcmp.eq.f32.partialorder %v842_v13, inf  ;;  %v848_v16 = vand.u32 2147483648, %v842_v13  ;;  %vm847_vm3 = vcmp.eq.f32.partialorder %v842_v13, 0.0 }
 0x153   : > { %v6553_v14 = vpop.eup %6552 }
 0x154   : > { %v844_v15 = vmul.f32 %v6553_v14, %v842_v13 }
 0x156   : > { %v846_v18 = vsel %vm845_vm2, %v842_v13, %v844_v15 }
 0x157   : > { %v849_v19 = vsel %vm847_vm3, %v848_v16, %v846_v18 }
 0x158   : > { %v855_v20 = vadd.f32 1e-06, %v849_v19 }
 0x15a   : > { %6554 = vrcp.f32 %v855_v20 }
 0x167   : > { %v6555_v28 = vpop.eup %6554 }
 0x168   : > { %v857_v29 = vmul.f32 %v6555_v28, %v854_v26 }
 0x16a   : > { %v862_v30 = vadd.f32 %v861_v27, %v857_v29 }
 0x16c   : > { %6138 = vmatmul.mubr.msk.f32.vlgmr.msra.gmra.mxu1 %vm748_vm0, %v862_v30 }
 0x16d   : > { %6157 = vmatprep.mubr.msk.f32.mxu1 %vm6709_vm1, %v6708_v8 }
 0x22c   : > { %v943_v38 = vpop.f32.mrf.mxu1 }
 0x22d   : > { %v944_v39 = vadd.f32 %v5817_v37, %v943_v38 }
 0x22e   : > { %v6139_v40 = vpop.f32.mrf.mxu1 }
 0x22f   : > { %957 = vrot.lane.b32.xlu0 %v944_v39, %s7801_s22  ;;  %953 = vrot.lane.b32.xlu1 %v944_v39, %s7799_s21 }
 0x233   : > { %955 = vrot.lane.b32.xlu1 %v944_v39, %s7797_s3 }
 0x237   : > { %959 = vrot.lane.b32.xlu1 %v944_v39, %s7795_s30 }
 0x2a1   : > { %v6965_v41 = vpop.permute.xlu1 %953  ;;  %v6970_v43 = vpop.permute.xlu0 %957 }
 0x2a2   : > { %1036 = vrot.lane.b32.xlu1 %v6965_v41, %s7795_s30 }
 0x2a5   : > { %v956_v42 = vpop.permute.xlu1 %955 }
 0x2a6   : > { %1112 = vrot.lane.b32.xlu1 %v956_v42, %s7795_s30 }
 0x2a9   : > { %v960_v44 = vpop.permute.xlu1 %959 }
 0x2aa   : > { %1188 = vrot.lane.b32.xlu1 %v6970_v43, %s7795_s30  ;;  %6141 = vmatpush3.xpose.msk.msra.mxu0 %vm961_vm4, %v960_v44  ;;  %s7832_s30 = smov 120  }
 0x2ab   : > { %6145 = vmatprep.subr.mxu0 %v6708_v8 }
 0x2ad   : > { %6143 = vmatmul.mubr.msk.f32.vlgmr.msra.gmra.mxu0 %vm961_vm4, %v944_v39 }
 0x2ae   : > { %6147 = vmatprep.mubr.msk.f32.mxu0 %vm6709_vm1, %v6708_v8 }
 0x314   : > { %v1037_v45 = vpop.permute.xlu1 %1036 }
 0x315   : > { %6146 = vmatpush3.xpose.msk.msra.mxu0 %vm961_vm4, %v1037_v45 }
 0x316   : > { %6150 = vmatprep.subr.mxu0 %v6708_v8 }
 0x318   : > { %6148 = vmatmul.mubr.msk.f32.vlgmr.msra.gmra.mxu0 %vm961_vm4, %v6965_v41  ;;  %v1113_v46 = vpop.permute.xlu1 %1112 }
 0x319   : > { %6151 = vmatpush3.xpose.msk.msra.mxu0 %vm961_vm4, %v1113_v46  ;;  %6152 = vmatprep.mubr.msk.f32.mxu0 %vm6709_vm1, %v6708_v8  ;;  %v948_v46 = vld [vmem:[%s7830_s1 + $0x8] sm:$0xff] }
 0x31a   : > { %6160 = vmatprep.subr.mxu0 %v6708_v8 }
 0x31c   : > { %6153 = vmatmul.mubr.msk.f32.vlgmr.msra.gmra.mxu0 %vm961_vm4, %v956_v42  ;;  %v1189_v47 = vpop.permute.xlu1 %1188 }
 0x31d   : > { %6156 = vmatpush3.xpose.msk.msra.mxu1 %vm961_vm4, %v1189_v47  ;;  %6162 = vmatprep.mubr.msk.f32.mxu0 %vm6709_vm1, %v6708_v8  ;;  %v949_v47 = vld [vmem:[%s7830_s1 + $0x10] sm:$0xff] }
 0x31e   : > { %6165 = vmatprep.subr.mxu1 %v6708_v8 }
 0x320   : > { %6158 = vmatmul.mubr.msk.f32.vlgmr.msra.gmra.mxu1 %vm961_vm4, %v6970_v43 }
 0x321   : > { %6167 = vmatprep.mubr.msk.f32.mxu1 %vm6709_vm1, %v6708_v8 }
 0x36d   : > { %v1032_v51 = vpop.f32.mrf.mxu0 }
 0x36e   : > { %v1033_v52 = vadd.f32 %v1032_v51, %v735_v50 }
 0x36f   : > { %v6144_v53 = vpop.f32.mrf.mxu0 }
 0x370   : > { %v1264_v54 = vsel %vm961_vm4, %v1033_v52, -inf }
 0x371   : > { %1265 = vmax.xlane.f32.xlu1 %v1264_v54 }
 0x3d8   : > { %v1108_v55 = vpop.f32.mrf.mxu0 }
 0x3d9   : > { %v1109_v56 = vadd.f32 %v1108_v55, %v735_v50 }
 0x3da   : > { %v6149_v57 = vpop.f32.mrf.mxu0 }
 0x3db   : > { %v1267_v58 = vsel %vm961_vm4, %v1109_v56, -inf }
 0x3dc   : > { %1268 = vmax.xlane.f32.xlu0 %v1267_v58  ;;  %v1184_v59 = vpop.f32.mrf.mxu0 }
 0x3dd   : > { %v1185_v60 = vadd.f32 %v1184_v59, %v735_v50 }
 0x3de   : > { %v6154_v61 = vpop.f32.mrf.mxu0 }
 0x3df   : > { %v1270_v62 = vsel %vm961_vm4, %v1185_v60, -inf }
 0x3e0   : > { %1271 = vmax.xlane.f32.xlu1 %v1270_v62  ;;  %v1260_v63 = vpop.f32.mrf.mxu1 }
 0x3e1   : > { %v1261_v1 = vadd.f32 %v1260_v63, %v735_v50 }
 0x3e2   : > { %v6159_v2 = vpop.f32.mrf.mxu1 }
 0x3e3   : > { %v1273_v3 = vsel %vm961_vm4, %v1261_v1, -inf }
 0x3e4   : > { %1274 = vmax.xlane.f32.xlu0 %v1273_v3 }
 0x3f1   : > { %1308 = vrot.lane.b32.xlu1 %v944_v39, %s7793_s2 }
 0x3fa   : > { %v1266_v4 = vpop.xlane.xlu1 %1265 }
 0x3fb   : > { %v1276_v5 = vsub.f32 %v1033_v52, %v1266_v4  ;;  %v950_v52 = vld [vmem:[%s7830_s1 + $0x18] sm:$0xff] }
 0x3fd   : > { %v1280_v6 = vmul.f32 1.442695, %v1276_v5 }
 0x3ff   : > { %6556 = vpow2.f32 %v1280_v6 }
 0x40c   : > { %v6557_v7 = vpop.eup %6556 }
 0x40d   : > { %v1288_v9 = vsel %vm961_vm4, %v6557_v7, 0.0 }
 0x415   : > { %1289 = vadd.xlane.f32.xlu1 %v1288_v9 }
 0x426   : > { %1460 = vrot.lane.b32.xlu1 %v956_v42, %s7793_s2 }
 0x465   : > { %v1269_v10 = vpop.xlane.xlu0 %1268 }
 0x466   : > { %v1277_v11 = vsub.f32 %v1109_v56, %v1269_v10  ;;  %v5814_v56 = vld [vmem:[%s7831_s11] ss:$0 sm:$0xff] }
 0x467   : > { %v7067_v58 = vadd.f32 %v6996_v48, %v5814_v56  ;;  %v7076_v61 = vadd.f32 %v5814_v56, %v7005_v49  ;;  %v5835_v10 = vld [vmem:[%s7766_s7] ss:$0 sm:$0xff] }
 0x468   : > { %v1282_v12 = vmul.f32 1.442695, %v1277_v11 }
 0x469   : > { %v1272_v13 = vpop.xlane.xlu1 %1271 }
 0x46a   : > { %6558 = vpow2.f32 %v1282_v12  ;;  %v1278_v14 = vsub.f32 %v1185_v60, %v1272_v13 }
 0x46c   : > { %v1284_v15 = vmul.f32 1.442695, %v1278_v14 }
 0x46d   : > { %v1309_v16 = vpop.permute.xlu1 %1308  ;;  %v1275_v17 = vpop.xlane.xlu0 %1274 }
 0x46e   : > { %6560 = vpow2.f32 %v1284_v15  ;;  %v1279_v18 = vsub.f32 %v1261_v1, %v1275_v17  ;;  %6161 = vmatpush3.msra.mxu0 %v1309_v16 }
 0x46f   : > { %6170 = vmatprep.subr.mxu0 %v6708_v8 }
 0x470   : > { %v1286_v19 = vmul.f32 1.442695, %v1279_v18 }
 0x472   : > { %6562 = vpow2.f32 %v1286_v19 }
 0x477   : > { %v6559_v20 = vpop.eup %6558 }
 0x478   : > { %v1291_v24 = vsel %vm961_vm4, %v6559_v20, 0.0 }
 0x479   : > { %1292 = vadd.xlane.f32.xlu0 %v1291_v24  ;;  %v1952_v24 = vld [vmem:[%s7767_s8 + $0x18] sm:$0xff] }
 0x47b   : > { %v6561_v26 = vpop.eup %6560 }
 0x47c   : > { %v1294_v27 = vsel %vm961_vm4, %v6561_v26, 0.0 }
 0x47d   : > { %1295 = vadd.xlane.f32.xlu1 %v1294_v27  ;;  %v1950_v27 = vld [vmem:[%s7767_s8 + $0x8] sm:$0xff] }
 0x47f   : > { %v6563_v28 = vpop.eup %6562 }
 0x480   : > { %v1297_v29 = vsel %vm961_vm4, %v6563_v28, 0.0 }
 0x481   : > { %1298 = vadd.xlane.f32.xlu0 %v1297_v29 }
 0x48e   : > { %1536 = vrot.lane.b32.xlu1 %v6970_v43, %s7793_s2  ;;  %v947_v43 = vld [vmem:[%s7830_s1] sm:$0xff] }
 0x497   : > { %1384 = vrot.lane.b32.xlu0 %v6965_v41, %s7793_s2  ;;  %s7834_s2 = sld [smem:[#allocation14_spill]] }
 0x49d   : > { %s7185_s25 = scalar_lea.vmem %s7834_s2, %s6882_s26  ;;  %s7835_s26 = smov 96  }
 0x49e   : > { %v1290_v30 = vpop.xlane.xlu1 %1289  ;;  %s7838_s2 = sld [smem:[#allocation20_spill]] }
 0x49f   : > { %6564 = vrcp.f32 %v1290_v30 }
 0x4a2   : > { %v1461_v33 = vpop.permute.xlu1 %1460 }
 0x4ac   : > { %v6565_v31 = vpop.eup %6564 }
 0x4ad   : > { %v1304_v32 = vmul.f32 %v6565_v31, %v6557_v7 }
 0x4af   : > { %6163 = vmatmul.mubr.msk.f32.vlgmr.msra.gmra.mxu0 %vm961_vm4, %v1304_v32 }
 0x4b0   : > { %6171 = vmatpush3.msra.mxu0 %v1461_v33  ;;  %6172 = vmatprep.mubr.msk.f32.mxu0 %vm6709_vm1, %v6708_v8 }
 0x4b1   : > { %6180 = vmatprep.subr.mxu0 %v6708_v8 }
 0x502   : > { %v1293_v34 = vpop.xlane.xlu0 %1292 }
 0x503   : > { %6566 = vrcp.f32 %v1293_v34 }
 0x506   : > { %v1296_v35 = vpop.xlane.xlu1 %1295 }
 0x507   : > { %6568 = vrcp.f32 %v1296_v35 }
 0x50a   : > { %v1299_v36 = vpop.xlane.xlu0 %1298  ;;  %v1537_v40 = vpop.permute.xlu1 %1536 }
 0x50b   : > { %6570 = vrcp.f32 %v1299_v36 }
 0x50e   : > { %v1385_v37 = vpop.permute.xlu0 %1384 }
 0x50f   : > { %6166 = vmatpush3.msra.mxu1 %v1385_v37  ;;  %v7122_v37 = vsub.s32 1, %v6915_v21 }
 0x510   : > { %v6567_v38 = vpop.eup %6566  ;;  %6175 = vmatprep.subr.mxu1 %v6708_v8 }
 0x511   : > { %v1305_v39 = vmul.f32 %v6567_v38, %v6559_v20  ;;  %v1939_v38 = vrot.slane %v6923_v23, %v7122_v37 }
 0x513   : > { %6168 = vmatmul.mubr.msk.f32.vlgmr.msra.gmra.mxu1 %vm961_vm4, %v1305_v39 }
 0x514   : > { %v6569_v41 = vpop.eup %6568  ;;  %6176 = vmatpush3.msra.mxu1 %v1537_v40  ;;  %6177 = vmatprep.mubr.msk.f32.mxu1 %vm6709_vm1, %v6708_v8  ;;  %v1947_v40 = vrot.slane %v6930_v25, %v7122_v37 }
 0x515   : > { %v1306_v42 = vmul.f32 %v6569_v41, %v6561_v26  ;;  %6185 = vmatprep.subr.mxu1 %v6708_v8  ;;  %v1951_v26 = vld [vmem:[%s7767_s8 + $0x10] sm:$0xff] }
 0x517   : > { %6173 = vmatmul.mubr.msk.f32.vlgmr.msra.gmra.mxu0 %vm961_vm4, %v1306_v42 }
 0x518   : > { %v6571_v44 = vpop.eup %6570  ;;  %6181 = vmatpush3.msra.mxu0 %v947_v43  ;;  %6182 = vmatprep.mubr.msk.f32.mxu0 %vm6709_vm1, %v6708_v8 }
 0x519   : > { %v1307_v45 = vmul.f32 %v6571_v44, %v6563_v28  ;;  %6190 = vmatprep.subr.mxu0 %v6708_v8  ;;  %v1949_v28 = vld [vmem:[%s7767_s8] sm:$0xff] }
 0x51b   : > { %6178 = vmatmul.mubr.msk.f32.vlgmr.msra.gmra.mxu1 %vm961_vm4, %v1307_v45 }
 0x51c   : > { %6187 = vmatprep.mubr.msk.f32.mxu1 %vm6709_vm1, %v6708_v8  ;;  %6186 = vmatpush3.msra.mxu1 %v948_v46  ;;  %v5836_v46 = vld [vmem:[%s7768_s9] ss:$0 sm:$0xff] }
 0x51d   : > { %6195 = vmatprep.subr.mxu1 %v6708_v8 }
 0x56f   : > { %v1380_v50 = vpop.f32.mrf.mxu0 }
 0x570   : > { %6183 = vmatmul.mubr.msk.f32.vlgmr.msra.gmra.mxu0 %vm961_vm4, %v1380_v50 }
 0x571   : > { %v6164_v51 = vpop.f32.mrf.mxu0  ;;  %6191 = vmatpush3.msra.mxu0 %v949_v47  ;;  %6192 = vmatprep.mubr.msk.f32.mxu0 %vm6709_vm1, %v6708_v8 }
 0x572   : > { %6200 = vmatprep.subr.mxu0 %v6708_v8 }
 0x5d3   : > { %v1456_v53 = vpop.f32.mrf.mxu1 }
 0x5d4   : > { %6188 = vmatmul.mubr.msk.f32.vlgmr.msra.gmra.mxu1 %vm961_vm4, %v1456_v53 }
 0x5d5   : > { %v6169_v54 = vpop.f32.mrf.mxu1  ;;  %6196 = vmatpush3.msra.mxu1 %v950_v52  ;;  %6197 = vmatprep.mubr.msk.f32.mxu1 %vm6709_vm1, %v6708_v8 }
 0x5d6   : > { %6211 = vmatprep.subr.mxu1 %v6708_v8 }
 0x5d7   : > { %v1532_v55 = vpop.f32.mrf.mxu0 }
 0x5d8   : > { %6193 = vmatmul.mubr.msk.f32.vlgmr.msra.gmra.mxu0 %vm961_vm4, %v1532_v55 }
 0x5d9   : > { %v6174_v57 = vpop.f32.mrf.mxu0  ;;  %6208 = vmatprep.mubr.msk.f32.mxu0 %vm6709_vm1, %v6708_v8  ;;  %6201 = vmatpush3.msra.mxu0 %v1952_v24 }
 0x5da   : > { %6202 = vmatprep.subr.mxu0 %v6708_v8 }
 0x5db   : > { %v1608_v59 = vpop.f32.mrf.mxu1  ;;  %6203 = vmatpush3.msra.mxu0 %v1951_v26 }
 0x5dc   : > { %6198 = vmatmul.mubr.msk.f32.vlgmr.msra.gmra.mxu1 %vm961_vm4, %v1608_v59  ;;  %6204 = vmatprep.subr.mxu0 %v6708_v8 }
 0x5dd   : > { %6212 = vmatpush3.xpose.msk.msra.mxu1 %vm961_vm4, %v7067_v58  ;;  %v6179_v60 = vpop.f32.mrf.mxu1  ;;  %6215 = vmatprep.mubr.msk.f32.mxu1 %vm6709_vm1, %v6708_v8 }
 0x5de   : > { %6213 = vmatprep.subr.mxu1 %v6708_v8  ;;  %6205 = vmatpush3.msra.mxu0 %v1950_v27  ;;  %v5838_v60 = vld [vmem:[%s7185_s25] ss:$0 sm:$0xff] }
 0x5df   : > { %6206 = vmatprep.subr.mxu0 %v6708_v8 }
 0x5e0   : > { %6207 = vmatpush3.msra.mxu0 %v1949_v28 }
 0x5e1   : > { %6214 = vmatpush3.xpose.msk.msra.mxu1 %vm961_vm4, %v7076_v61  ;;  %6218 = vmatprep.subr.mxu0 %v6708_v8 }
 0x5e2   : > { %6225 = vmatprep.subr.mxu1 %v6708_v8 }
 0x630   : > { %v1681_v48 = vpop.f32.mrf.mxu0 }
 0x631   : > { %v1904_v4 = vsel %vm748_vm0, %v1681_v48, 0.0 }
 0x632   : > { %v6184_v62 = vpop.f32.mrf.mxu0 }
 0x694   : > { %v1754_v63 = vpop.f32.mrf.mxu1 }
 0x695   : > { %v1905_v2 = vsel %vm748_vm0, %v1754_v63, 0.0 }
 0x696   : > { %v6189_v1 = vpop.f32.mrf.mxu1  ;;  %v1906_v6 = vadd.f32 %v1905_v2, %v1904_v4 }
 0x698   : > { %v1827_v3 = vpop.f32.mrf.mxu0 }
 0x699   : > { %v1907_v5 = vsel %vm748_vm0, %v1827_v3, 0.0 }
 0x69a   : > { %v6194_v7 = vpop.f32.mrf.mxu0  ;;  %v1908_v49 = vadd.f32 %v1907_v5, %v1906_v6 }
 0x69c   : > { %v1900_v9 = vpop.f32.mrf.mxu1 }
 0x69d   : > { %v1909_v11 = vsel %vm748_vm0, %v1900_v9, 0.0 }
 0x69e   : > { %v1910_v12 = vadd.f32 %v1909_v11, %v1908_v49  ;;  %v6199_v13 = vpop.f32.mrf.mxu1 }
 0x6a0   : > { %v1917_v14 = vadd.f32 %v5835_v10, %v1910_v12 }
 0x6a2   : > { %v7089_v15 = vadd.f32 %v1917_v14, %v6890_v0 }
 0x6a4   : > { %v1919_v16 = vsel %vm748_vm0, %v7089_v15, 0.0 }
 0x6a5   : > { %1920 = vadd.xlane.f32.xlu0 %v1919_v16 }
 0x6bb   : > { %2049 = vrot.lane.b32.xlu0 %v7067_v58, %s7799_s21 }
 0x6bf   : > { %2053 = vrot.lane.b32.xlu0 %v7067_v58, %s7797_s3 }
 0x6c3   : > { %2057 = vrot.lane.b32.xlu0 %v7067_v58, %s7801_s22 }
 0x6c7   : > { %2055 = vrot.lane.b32.xlu0 %v7076_v61, %s7801_s22 }
 0x72e   : > { %v1921_v17 = vpop.xlane.xlu0 %1920 }
 0x72f   : > { %v1922_v18 = vmul.f32 0.03125, %v1921_v17 }
 0x731   : > { %v1923_v0 = vsub.f32 %v7089_v15, %v1922_v18 }
 0x732   : > { %v7128_v44 = vpop.permute.xlu0 %2049 }
 0x733   : > { %v1924_v19 = vmul.f32 %v1923_v0, %v1923_v0  ;;  %v1940_v39 = vmul.f32 %v1939_v38, %v1923_v0 }
 0x735   : > { %v1925_v20 = vsel %vm748_vm0, %v1924_v19, 0.0 }
 0x736   : > { %1926 = vadd.xlane.f32.xlu1 %v1925_v20  ;;  %v7146_v52 = vpop.permute.xlu0 %2053 }
 0x73a   : > { %v7157_v53 = vpop.permute.xlu0 %2057 }
 0x73e   : > { %v7165_v55 = vpop.permute.xlu0 %2055 }
 0x747   : > { %2047 = vrot.lane.b32.xlu1 %v7076_v61, %s7799_s21  ;;  %s5949_s21 = sshll.u32 %s6853_s4, 7 }
 0x7bf   : > { %v1927_v29 = vpop.xlane.xlu1 %1926 }
 0x7c0   : > { %v1928_v30 = vmul.f32 0.032258064, %v1927_v29 }
 0x7c2   : > { %6572 = vrsqrt.f32 %v1928_v30  ;;  %vm1931_vm5 = vcmp.eq.f32.partialorder %v1928_v30, inf  ;;  %v1934_v33 = vand.u32 2147483648, %v1928_v30  ;;  %vm1933_vm6 = vcmp.eq.f32.partialorder %v1928_v30, 0.0 }
 0x7c3   : > { %v7136_v45 = vpop.permute.xlu1 %2047 }
 0x7cf   : > { %v6573_v31 = vpop.eup %6572 }
 0x7d0   : > { %v1930_v32 = vmul.f32 %v6573_v31, %v1928_v30 }
 0x7d2   : > { %v1932_v34 = vsel %vm1931_vm5, %v1928_v30, %v1930_v32 }
 0x7d3   : > { %v1935_v35 = vsel %vm1933_vm6, %v1934_v33, %v1932_v34 }
 0x7d4   : > { %v1941_v36 = vadd.f32 1e-06, %v1935_v35 }
 0x7d6   : > { %6574 = vrcp.f32 %v1941_v36 }
 0x7e3   : > { %v6575_v41 = vpop.eup %6574 }
 0x7e4   : > { %v1943_v42 = vmul.f32 %v6575_v41, %v1940_v39 }
 0x7e6   : > { %v1948_v43 = vadd.f32 %v1947_v40, %v1943_v42 }
 0x7e8   : > { %6209 = vmatmul.mubr.msk.f32.vlgmr.msra.gmra.mxu0 %vm748_vm0, %v1948_v43 }
 0x7e9   : > { %6219 = vmatpush3.xpose.msk.msra.mxu0 %vm961_vm4, %v7128_v44  ;;  %6222 = vmatprep.mubr.msk.f32.mxu0 %vm6709_vm1, %v6708_v8 }
 0x7ea   : > { %6220 = vmatprep.subr.mxu0 %v6708_v8 }
 0x7ed   : > { %6221 = vmatpush3.xpose.msk.msra.mxu0 %vm961_vm4, %v7136_v45 }
 0x7ee   : > { %6232 = vmatprep.subr.mxu0 %v6708_v8 }
 0x8a8   : > { %v2029_v47 = vpop.f32.mrf.mxu0 }
 0x8a9   : > { %v2030_v50 = vadd.f32 %v5836_v46, %v2029_v47 }
 0x8aa   : > { %v6210_v51 = vpop.f32.mrf.mxu0 }
 0x8ab   : > { %2043 = vrot.lane.b32.xlu0 %v2030_v50, %s7801_s22  ;;  %2039 = vrot.lane.b32.xlu1 %v2030_v50, %s7832_s30 }
 0x8ac   : > { %6216 = vmatmul.mubr.msk.f32.vlgmr.msra.gmra.mxu1 %vm961_vm4, %v2030_v50 }
 0x8ad   : > { %6226 = vmatpush3.xpose.msk.msra.mxu1 %vm961_vm4, %v7146_v52  ;;  %6229 = vmatprep.mubr.msk.f32.mxu1 %vm6709_vm1, %v6708_v8 }
 0x8ae   : > { %6227 = vmatprep.subr.mxu1 %v6708_v8 }
 0x8af   : > { %2051 = vrot.lane.b32.xlu1 %v7076_v61, %s7833_s5 }
 0x8b3   : > { %2041 = vrot.lane.b32.xlu1 %v2030_v50, %s7833_s5 }
 0x91d   : > { %v2040_v54 = vpop.permute.xlu1 %2039  ;;  %v2044_v57 = vpop.permute.xlu0 %2043 }
 0x91e   : > { %6223 = vmatmul.mubr.msk.f32.vlgmr.msra.gmra.mxu0 %vm961_vm4, %v2040_v54 }
 0x91f   : > { %6233 = vmatpush3.xpose.msk.msra.mxu0 %vm961_vm4, %v7157_v53  ;;  %6236 = vmatprep.mubr.msk.f32.mxu0 %vm6709_vm1, %v6708_v8 }
 0x920   : > { %6234 = vmatprep.subr.mxu0 %v6708_v8 }
 0x921   : > { %v7167_v56 = vpop.permute.xlu1 %2051 }
 0x922   : > { %6228 = vmatpush3.xpose.msk.msra.mxu1 %vm961_vm4, %v7167_v56 }
 0x923   : > { %6235 = vmatpush3.xpose.msk.msra.mxu0 %vm961_vm4, %v7165_v55  ;;  %6239 = vmatprep.subr.mxu1 %v6708_v8 }
 0x924   : > { %6253 = vmatprep.subr.mxu0 %v6708_v8 }
 0x925   : > { %v2042_v59 = vpop.permute.xlu1 %2041 }
 0x926   : > { %6237 = vmatmul.mubr.msk.f32.vlgmr.msra.gmra.mxu0 %vm961_vm4, %v2044_v57  ;;  %6230 = vmatmul.mubr.msk.f32.vlgmr.msra.gmra.mxu1 %vm961_vm4, %v2042_v59 }
 0x927   : > { %6243 = vmatprep.mubr.msk.f32.mxu1 %vm6709_vm1, %v6708_v8  ;;  %6257 = vmatprep.mubr.msk.f32.mxu0 %vm6709_vm1, %v6708_v8 }
 0x96c   : > { %v2137_v48 = vpop.f32.mrf.mxu1 }
 0x96d   : > { %v2138_v62 = vadd.f32 %v5838_v60, %v2137_v48 }
 0x96e   : > { %v6217_v63 = vpop.f32.mrf.mxu1 }
 0x96f   : > { %v2370_v1 = vsel %vm2369_vm7, %v2138_v62, -inf }
 0x970   : > { %2371 = vmax.xlane.f32.xlu1 %v2370_v1 }
 0x9de   : > { %v2213_v2 = vpop.f32.mrf.mxu0 }
 0x9df   : > { %v2214_v3 = vadd.f32 %v5838_v60, %v2213_v2 }
 0x9e0   : > { %v6224_v4 = vpop.f32.mrf.mxu0 }
 0x9e1   : > { %v2373_v5 = vsel %vm2369_vm7, %v2214_v3, -inf }
 0x9e2   : > { %2374 = vmax.xlane.f32.xlu0 %v2373_v5  ;;  %v2033_v5 = vld [vmem:[%s7771_s12] sm:$0xff] }
 0x9e6   : > { %v2365_v6 = vpop.f32.mrf.mxu0  ;;  %v2289_v7 = vpop.f32.mrf.mxu1 }
 0x9e7   : > { %v2366_v49 = vadd.f32 %v5838_v60, %v2365_v6  ;;  %v2290_v9 = vadd.f32 %v5838_v60, %v2289_v7  ;;  %v2034_v6 = vld [vmem:[%s7771_s12 + $0x8] sm:$0xff]  ;;  %v2035_v7 = vld [vmem:[%s7771_s12 + $0x10] sm:$0xff] }
 0x9e8   : > { %v6238_v10 = vpop.f32.mrf.mxu0  ;;  %v6231_v11 = vpop.f32.mrf.mxu1 }
 0x9e9   : > { %v2379_v12 = vsel %vm2369_vm7, %v2366_v49, -inf  ;;  %v2376_v13 = vsel %vm2369_vm7, %v2290_v9, -inf  ;;  %v2036_v10 = vld [vmem:[%s7771_s12 + $0x18] sm:$0xff] }
 0x9ea   : > { %2380 = vmax.xlane.f32.xlu1 %v2379_v12  ;;  %2377 = vmax.xlane.f32.xlu0 %v2376_v13 }
 0x9f9   : > { %v2372_v14 = vpop.xlane.xlu1 %2371 }
 0x9fa   : > { %v2382_v16 = vsub.f32 %v2138_v62, %v2372_v14 }
 0x9fb   : > { %2414 = vrot.lane.b32.xlu1 %v7076_v61, %s7835_s26 }
 0x9fc   : > { %v2386_v17 = vmul.f32 1.442695, %v2382_v16 }
 0x9fe   : > { %6576 = vpow2.f32 %v2386_v17 }
 0x9ff   : > { %2495 = vrot.lane.b32.xlu1 %v7128_v44, %s7835_s26 }
 0xa00   : > { %2416 = vrot.lane.b32.xlu0 %v7067_v58, %s7835_s26 }
 0xa03   : > { %2574 = vrot.lane.b32.xlu1 %v7146_v52, %s7835_s26 }
 0xa04   : > { %2493 = vrot.lane.b32.xlu0 %v7136_v45, %s7835_s26 }
 0xa08   : > { %2572 = vrot.lane.b32.xlu0 %v7167_v56, %s7835_s26 }
 0xa0b   : > { %v6577_v18 = vpop.eup %6576 }
 0xa0c   : > { %v2394_v0 = vsel %vm2369_vm7, %v6577_v18, 0.0 }
 0xa27   : > { %2395 = vadd.xlane.f32.xlu0 %v2394_v0 }
 0xa6b   : > { %v2375_v19 = vpop.xlane.xlu0 %2374 }
 0xa6c   : > { %v2383_v20 = vsub.f32 %v2214_v3, %v2375_v19 }
 0xa6e   : > { %v2388_v24 = vmul.f32 1.442695, %v2383_v20 }
 0xa70   : > { %6578 = vpow2.f32 %v2388_v24 }
 0xa73   : > { %v2381_v26 = vpop.xlane.xlu1 %2380  ;;  %v2378_v27 = vpop.xlane.xlu0 %2377 }
 0xa74   : > { %v2385_v28 = vsub.f32 %v2366_v49, %v2381_v26  ;;  %v2384_v29 = vsub.f32 %v2290_v9, %v2378_v27 }
 0xa76   : > { %v2392_v30 = vmul.f32 1.442695, %v2385_v28  ;;  %v2390_v31 = vmul.f32 1.442695, %v2384_v29 }
 0xa77   : > { %v2415_v32 = vpop.permute.xlu1 %2414  ;;  %v2417_v33 = vpop.permute.xlu0 %2416 }
 0xa78   : > { %6580 = vpow2.f32 %v2392_v30  ;;  %6240 = vmatpush3.msra.mxu1 %v2417_v33 }
 0xa79   : > { %6582 = vpow2.f32 %v2390_v31  ;;  %6241 = vmatprep.subr.mxu1 %v6708_v8 }
 0xa7a   : > { %6242 = vmatpush3.msra.mxu1 %v2415_v32 }
 0xa7b   : > { %v2496_v34 = vpop.permute.xlu1 %2495  ;;  %v2494_v35 = vpop.permute.xlu0 %2493  ;;  %6246 = vmatprep.subr.mxu1 %v6708_v8 }
 0xa7d   : > { %v6579_v36 = vpop.eup %6578 }
 0xa7e   : > { %v2397_v38 = vsel %vm2369_vm7, %v6579_v36, 0.0 }
 0xa7f   : > { %v2575_v39 = vpop.permute.xlu1 %2574  ;;  %2398 = vadd.xlane.f32.xlu1 %v2397_v38  ;;  %v2573_v40 = vpop.permute.xlu0 %2572 }
 0xa80   : > { %6254 = vmatpush3.msra.mxu0 %v2575_v39 }
 0xa81   : > { %6255 = vmatprep.subr.mxu0 %v6708_v8 }
 0xa82   : > { %6256 = vmatpush3.msra.mxu0 %v2573_v40 }
 0xa83   : > { %6267 = vmatprep.subr.mxu0 %v6708_v8 }
 0xa85   : > { %v6581_v41 = vpop.eup %6580 }
 0xa86   : > { %v6583_v42 = vpop.eup %6582  ;;  %v2403_v43 = vsel %vm2369_vm7, %v6581_v41, 0.0 }
 0xa87   : > { %2404 = vadd.xlane.f32.xlu1 %v2403_v43  ;;  %v2400_v46 = vsel %vm2369_vm7, %v6583_v42, 0.0 }
 0xa88   : > { %2401 = vadd.xlane.f32.xlu0 %v2400_v46 }
 0xa98   : > { %2653 = vrot.lane.b32.xlu1 %v7157_v53, %s7835_s26 }
 0xa9e   : > { %2651 = vrot.lane.b32.xlu0 %v7165_v55, %s7835_s26 }
 0xab0   : > { %v2396_v47 = vpop.xlane.xlu0 %2395 }
 0xab1   : > { %6584 = vrcp.f32 %v2396_v47 }
 0xabe   : > { %v6585_v50 = vpop.eup %6584 }
 0xabf   : > { %v2410_v51 = vmul.f32 %v6585_v50, %v6577_v18  ;;  %v3070_v50 = vld [vmem:[%s7773_s14 + $0x18] sm:$0xff] }
 0xac1   : > { %6244 = vmatmul.mubr.msk.f32.vlgmr.msra.gmra.mxu1 %vm2369_vm7, %v2410_v51  ;;  %v3068_v51 = vld [vmem:[%s7773_s14 + $0x8] sm:$0xff] }
 0xac2   : > { %6247 = vmatpush3.msra.mxu1 %v2496_v34  ;;  %6250 = vmatprep.mubr.msk.f32.mxu1 %vm6709_vm1, %v6708_v8 }
 0xac3   : > { %6248 = vmatprep.subr.mxu1 %v6708_v8 }
 0xac4   : > { %6249 = vmatpush3.msra.mxu1 %v2494_v35  ;;  %v5859_v35 = vld [vmem:[%s7772_s13] ss:$0 sm:$0xff] }
 0xac5   : > { %6260 = vmatprep.subr.mxu1 %v6708_v8 }
 0xb08   : > { %v2399_v54 = vpop.xlane.xlu1 %2398 }
 0xb09   : > { %6586 = vrcp.f32 %v2399_v54  ;;  %v3067_v54 = vld [vmem:[%s7773_s14] sm:$0xff] }
 0xb10   : > { %v2405_v57 = vpop.xlane.xlu1 %2404 }
 0xb11   : > { %6588 = vrcp.f32 %v2405_v57  ;;  %v2402_v59 = vpop.xlane.xlu0 %2401  ;;  %v3159_v57 = vld [vmem:[%s7775_s16 + $0x38] sm:$0xff] }
 0xb12   : > { %6590 = vrcp.f32 %v2402_v59  ;;  %v3158_v59 = vld [vmem:[%s7775_s16 + $0x30] sm:$0xff] }
 0xb14   : > { %v2654_v62 = vpop.permute.xlu1 %2653 }
 0xb15   : > { %v2652_v63 = vpop.permute.xlu0 %2651 }
 0xb16   : > { %v6587_v60 = vpop.eup %6586 }
 0xb17   : > { %v2411_v48 = vmul.f32 %v6587_v60, %v6579_v36  ;;  %v3157_v60 = vld [vmem:[%s7775_s16 + $0x28] sm:$0xff] }
 0xb19   : > { %6251 = vmatmul.mubr.msk.f32.vlgmr.msra.gmra.mxu1 %vm2369_vm7, %v2411_v48  ;;  %v3156_v48 = vld [vmem:[%s7775_s16 + $0x20] sm:$0xff] }
 0xb1a   : > { %6261 = vmatpush3.msra.mxu1 %v2654_v62  ;;  %6264 = vmatprep.mubr.msk.f32.mxu1 %vm6709_vm1, %v6708_v8  ;;  %v3155_v62 = vld [vmem:[%s7775_s16 + $0x18] sm:$0xff] }
 0xb1b   : > { %6262 = vmatprep.subr.mxu1 %v6708_v8 }
 0xb1c   : > { %6263 = vmatpush3.msra.mxu1 %v2652_v63 }
 0xb1d   : > { %6272 = vmatprep.subr.mxu1 %v6708_v8 }
 0xb1e   : > { %v6589_v1 = vpop.eup %6588 }
 0xb1f   : > { %v6591_v2 = vpop.eup %6590  ;;  %v2413_v3 = vmul.f32 %v6589_v1, %v6581_v41 }
 0xb20   : > { %v2412_v4 = vmul.f32 %v6591_v2, %v6583_v42 }
 0xb21   : > { %6265 = vmatmul.mubr.msk.f32.vlgmr.msra.gmra.mxu1 %vm2369_vm7, %v2413_v3 }
 0xb22   : > { %6258 = vmatmul.mubr.msk.f32.vlgmr.msra.gmra.mxu0 %vm2369_vm7, %v2412_v4  ;;  %6274 = vmatprep.mubr.msk.f32.mxu1 %vm6709_vm1, %v6708_v8 }
 0xb23   : > { %6268 = vmatpush3.msra.mxu0 %v2033_v5  ;;  %6269 = vmatprep.mubr.msk.f32.mxu0 %vm6709_vm1, %v6708_v8 }
 0xb24   : > { %6277 = vmatprep.subr.mxu0 %v6708_v8  ;;  %6273 = vmatpush3.msra.mxu1 %v2034_v6 }
 0xb25   : > { %6282 = vmatprep.subr.mxu1 %v6708_v8 }
 0xb81   : > { %v2489_v49 = vpop.f32.mrf.mxu1 }
 0xb82   : > { %6270 = vmatmul.mubr.msk.f32.vlgmr.msra.gmra.mxu0 %vm961_vm4, %v2489_v49  ;;  %v7311_v49 = vsub.s32 2, %v6915_v21  ;;  %v3154_v21 = vld [vmem:[%s7775_s16 + $0x10] sm:$0xff] }
 0xb83   : > { %v6245_v9 = vpop.f32.mrf.mxu1  ;;  %6278 = vmatpush3.msra.mxu0 %v2035_v7  ;;  %6279 = vmatprep.mubr.msk.f32.mxu0 %vm6709_vm1, %v6708_v8 }
 0xb84   : > { %6287 = vmatprep.subr.mxu0 %v6708_v8  ;;  %v3057_v9 = vrot.slane %v6923_v23, %v7311_v49  ;;  %v3153_v23 = vld [vmem:[%s7775_s16 + $0x8] sm:$0xff] }
 0xbd9   : > { %v2568_v11 = vpop.f32.mrf.mxu1 }
 0xbda   : > { %6275 = vmatmul.mubr.msk.f32.vlgmr.msra.gmra.mxu1 %vm961_vm4, %v2568_v11  ;;  %v3065_v11 = vrot.slane %v6930_v25, %v7311_v49  ;;  %v3152_v25 = vld [vmem:[%s7775_s16] sm:$0xff] }
 0xbdb   : > { %v6252_v12 = vpop.f32.mrf.mxu1  ;;  %6283 = vmatpush3.msra.mxu1 %v2036_v10  ;;  %6284 = vmatprep.mubr.msk.f32.mxu1 %vm6709_vm1, %v6708_v8 }
 0xbdc   : > { %6298 = vmatprep.subr.mxu1 %v6708_v8 }
 0xbe1   : > { %v2726_v13 = vpop.f32.mrf.mxu1 }
 0xbe2   : > { %v2647_v14 = vpop.f32.mrf.mxu0  ;;  %6285 = vmatmul.mubr.msk.f32.vlgmr.msra.gmra.mxu1 %vm961_vm4, %v2726_v13 }
 0xbe3   : > { %v6266_v16 = vpop.f32.mrf.mxu1  ;;  %6280 = vmatmul.mubr.msk.f32.vlgmr.msra.gmra.mxu0 %vm961_vm4, %v2647_v14  ;;  %6314 = vmatprep.mubr.msk.f32.mxu1 %vm6709_vm1, %v6708_v8 }
 0xbe4   : > { %v6259_v17 = vpop.f32.mrf.mxu0  ;;  %6295 = vmatprep.mubr.msk.f32.mxu0 %vm6709_vm1, %v6708_v8  ;;  %6288 = vmatpush3.msra.mxu0 %v3070_v50  ;;  %v5860_v16 = vld [vmem:[%s7774_s15] ss:$0 sm:$0xff] }
 0xbe5   : > { %6289 = vmatprep.subr.mxu0 %v6708_v8  ;;  %6299 = vmatpush3.msra.mxu1 %v3159_v57  ;;  %v7374_v57 = vld [vmem:[%s7778_s19 + $0x4] sm:$0x7] }
 0xbe6   : > { %6300 = vmatprep.subr.mxu1 %v6708_v8 }
 0xbe7   : > { %6301 = vmatpush3.msra.mxu1 %v3158_v59 }
 0xbe8   : > { %6302 = vmatprep.subr.mxu1 %v6708_v8 }
 0xbe9   : > { %6303 = vmatpush3.msra.mxu1 %v3157_v60  ;;  %v3275_v60 = vrot.slane %v7374_v57, %v6918_v22 }
 0xbea   : > { %6304 = vmatprep.subr.mxu1 %v6708_v8 }
 0xbeb   : > { %6305 = vmatpush3.msra.mxu1 %v3156_v48 }
 0xbec   : > { %6306 = vmatprep.subr.mxu1 %v6708_v8 }
 0xbed   : > { %6307 = vmatpush3.msra.mxu1 %v3155_v62 }
 0xbee   : > { %6308 = vmatprep.subr.mxu1 %v6708_v8 }
 0xbef   : > { %6309 = vmatpush3.msra.mxu1 %v3154_v21 }
 0xbf0   : > { %6310 = vmatprep.subr.mxu1 %v6708_v8 }
 0xbf1   : > { %6311 = vmatpush3.msra.mxu1 %v3153_v23 }
 0xbf2   : > { %6312 = vmatprep.subr.mxu1 %v6708_v8 }
 0xbf3   : > { %6313 = vmatpush3.msra.mxu1 %v3152_v25 }
 0xbf4   : > { %6333 = vmatprep.subr.mxu1 %v6708_v8 }
 0xc42   : > { %v2799_v18 = vpop.f32.mrf.mxu0 }
 0xc43   : > { %v3022_v26 = vsel %vm748_vm0, %v2799_v18, 0.0 }
 0xc44   : > { %v6271_v0 = vpop.f32.mrf.mxu0 }
 0xc9a   : > { %v2872_v19 = vpop.f32.mrf.mxu1 }
 0xc9b   : > { %v3023_v24 = vsel %vm748_vm0, %v2872_v19, 0.0 }
 0xc9c   : > { %v6276_v20 = vpop.f32.mrf.mxu1  ;;  %v3024_v28 = vadd.f32 %v3023_v24, %v3022_v26  ;;  %v5863_v24 = vld [vmem:[%s7776_s17] ss:$0 sm:$0xff] }
 0xca2   : > { %v3018_v27 = vpop.f32.mrf.mxu1 }
 0xca3   : > { %v2945_v29 = vpop.f32.mrf.mxu0  ;;  %v3027_v34 = vsel %vm748_vm0, %v3018_v27, 0.0 }
 0xca4   : > { %v3025_v30 = vsel %vm748_vm0, %v2945_v29, 0.0  ;;  %v6286_v31 = vpop.f32.mrf.mxu1 }
 0xca5   : > { %v3026_v32 = vadd.f32 %v3025_v30, %v3024_v28  ;;  %v6281_v33 = vpop.f32.mrf.mxu0 }
 0xca7   : > { %v3028_v36 = vadd.f32 %v3027_v34, %v3026_v32 }
 0xca9   : > { %v3035_v38 = vadd.f32 %v5859_v35, %v3028_v36  ;;  %v5869_v35 = vld [vmem:[%s7824_s23 + $0x38] sm:$0xff]  ;;  %v5868_v36 = vld [vmem:[%s7824_s23 + $0x30] sm:$0xff] }
 0xcab   : > { %v7268_v39 = vadd.f32 %v3035_v38, %v7089_v15  ;;  %v3069_v15 = vld [vmem:[%s7773_s14 + $0x10] sm:$0xff]  ;;  %v5867_v38 = vld [vmem:[%s7824_s23 + $0x28] sm:$0xff] }
 0xcac   : > { %6290 = vmatpush3.msra.mxu0 %v3069_v15 }
 0xcad   : > { %v3037_v40 = vsel %vm748_vm0, %v7268_v39, 0.0  ;;  %6291 = vmatprep.subr.mxu0 %v6708_v8 }
 0xcae   : > { %3038 = vadd.xlane.f32.xlu1 %v3037_v40  ;;  %6292 = vmatpush3.msra.mxu0 %v3068_v51  ;;  %v7367_v51 = vld [vmem:[%s7777_s18 + $0x4] sm:$0x7] }
 0xcaf   : > { %6293 = vmatprep.subr.mxu0 %v6708_v8 }
 0xcb0   : > { %6294 = vmatpush3.msra.mxu0 %v3067_v54  ;;  %v3267_v54 = vrot.slane %v7367_v51, %v6918_v22 }
 0xcb1   : > { %6317 = vmatprep.subr.mxu0 %v6708_v8 }
 0xd37   : > { %v3039_v41 = vpop.xlane.xlu1 %3038 }
 0xd38   : > { %v3040_v42 = vmul.f32 0.03125, %v3039_v41 }
 0xd3a   : > { %v3041_v43 = vsub.f32 %v7268_v39, %v3040_v42 }
 0xd3c   : > { %v3042_v46 = vmul.f32 %v3041_v43, %v3041_v43  ;;  %v3058_v10 = vmul.f32 %v3057_v9, %v3041_v43 }
 0xd3e   : > { %v3043_v47 = vsel %vm748_vm0, %v3042_v46, 0.0 }
 0xd3f   : > { %3044 = vadd.xlane.f32.xlu0 %v3043_v47 }
 0xdc8   : > { %v3045_v63 = vpop.xlane.xlu0 %3044 }
 0xdc9   : > { %v3046_v1 = vmul.f32 0.032258064, %v3045_v63 }
 0xdcb   : > { %6592 = vrsqrt.f32 %v3046_v1  ;;  %vm3049_vm8 = vcmp.eq.f32.partialorder %v3046_v1, inf  ;;  %v3052_v4 = vand.u32 2147483648, %v3046_v1  ;;  %vm3051_vm9 = vcmp.eq.f32.partialorder %v3046_v1, 0.0 }
 0xdd8   : > { %v6593_v2 = vpop.eup %6592 }
 0xdd9   : > { %v3048_v3 = vmul.f32 %v6593_v2, %v3046_v1 }
 0xddb   : > { %v3050_v5 = vsel %vm3049_vm8, %v3046_v1, %v3048_v3  ;;  %v5871_v1 = vld [vmem:[%s7827_s0 + $0x1] ss:$0 sm:$0xff]  ;;  %s5711_s0 = scalar_lea.hbm %s7839_s10, %s5949_s21 }
 0xddc   : > { %v3053_v6 = vsel %vm3051_vm9, %v3052_v4, %v3050_v5 }
 0xddd   : > { %v3059_v7 = vadd.f32 1e-06, %v3053_v6 }
 0xddf   : > { %6594 = vrcp.f32 %v3059_v7 }
 0xdec   : > { %v6595_v12 = vpop.eup %6594 }
 0xded   : > { %v3061_v13 = vmul.f32 %v6595_v12, %v3058_v10 }
 0xdef   : > { %v3066_v14 = vadd.f32 %v3065_v11, %v3061_v13  ;;  %v6644_v13 = vld [vmem:[%s7003_s24] sm:$0xff]  ;;  %s7837_s24 = smov 64  }
 0xdf1   : > { %6296 = vmatmul.mubr.msk.f32.vlgmr.msra.gmra.mxu0 %vm748_vm0, %v3066_v14 }
 0xdf2   : > { %6325 = vmatprep.mubr.msk.f32.mxu0 %vm6709_vm1, %v6708_v8  ;;  %6318 = vmatpush3.msra.mxu0 %v5869_v35 }
 0xdf3   : > { %6319 = vmatprep.subr.mxu0 %v6708_v8 }
 0xdf4   : > { %6320 = vmatpush3.msra.mxu0 %v5868_v36 }
 0xdf5   : > { %6321 = vmatprep.subr.mxu0 %v6708_v8 }
 0xdf6   : > { %6322 = vmatpush3.msra.mxu0 %v5867_v38 }
 0xdf7   : > { %6323 = vmatprep.subr.mxu0 %v6708_v8 }
 0xeb1   : > { %v3147_v17 = vpop.f32.mrf.mxu0 }
 0xeb2   : > { %v3148_v18 = vadd.f32 %v5860_v16, %v3147_v17 }
 0xeb3   : > { %v6297_v0 = vpop.f32.mrf.mxu0 }
 0xeb4   : > { %v3151_v19 = vmax.f32 %v3148_v18, 0.0 }
 0xeb6   : > { %6315 = vmatmul.mubr.msk.f32.vlgmr.msra.gmra.mxu1 %vm3160_vm10, %v3151_v19 }
 0xeb7   : > { %6335 = vmatprep.mubr.msk.f32.mxu1 %vm6709_vm1, %v6708_v8 }
 0xf76   : > { %v3230_v20 = vpop.f32.mrf.mxu1 }
 0xf77   : > { %v3234_v26 = vadd.f32 %v3230_v20, %v7268_v39  ;;  %v5866_v39 = vld [vmem:[%s7824_s23 + $0x20] sm:$0xff] }
 0xf78   : > { %v6316_v27 = vpop.f32.mrf.mxu1  ;;  %6324 = vmatpush3.msra.mxu0 %v5866_v39 }
 0xf79   : > { %v7342_v28 = vadd.f32 %v5863_v24, %v3234_v26  ;;  %6328 = vmatprep.subr.mxu0 %v6708_v8 }
 0xf7b   : > { %v3247_v29 = vsel %vm748_vm0, %v7342_v28, 0.0 }
 0xf7c   : > { %3248 = vadd.xlane.f32.xlu0 %v3247_v29 }
0x1005   : > { %v3249_v30 = vpop.xlane.xlu0 %3248 }
0x1006   : > { %v3250_v31 = vmul.f32 0.03125, %v3249_v30 }
0x1008   : > { %v3251_v32 = vsub.f32 %v7342_v28, %v3250_v31 }
0x100a   : > { %v3252_v33 = vmul.f32 %v3251_v32, %v3251_v32  ;;  %v3268_v59 = vmul.f32 %v3267_v54, %v3251_v32 }
0x100c   : > { %v3253_v34 = vsel %vm748_vm0, %v3252_v33, 0.0 }
0x100d   : > { %3254 = vadd.xlane.f32.xlu1 %v3253_v34 }
0x1096   : > { %v3255_v40 = vpop.xlane.xlu1 %3254 }
0x1097   : > { %v3256_v41 = vmul.f32 0.032258064, %v3255_v40 }
0x1099   : > { %6596 = vrsqrt.f32 %v3256_v41  ;;  %vm3259_vm11 = vcmp.eq.f32.partialorder %v3256_v41, inf  ;;  %v3262_v46 = vand.u32 2147483648, %v3256_v41  ;;  %vm3261_vm12 = vcmp.eq.f32.partialorder %v3256_v41, 0.0 }
0x10a6   : > { %v6597_v42 = vpop.eup %6596 }
0x10a7   : > { %v3258_v43 = vmul.f32 %v6597_v42, %v3256_v41 }
0x10a9   : > { %v3260_v47 = vsel %vm3259_vm11, %v3256_v41, %v3258_v43 }
0x10aa   : > { %v3263_v50 = vsel %vm3261_vm12, %v3262_v46, %v3260_v47 }
0x10ab   : > { %v3269_v15 = vadd.f32 1e-06, %v3263_v50 }
0x10ad   : > { %6598 = vrcp.f32 %v3269_v15 }
0x10ba   : > { %v6599_v48 = vpop.eup %6598 }
0x10bb   : > { %v3271_v62 = vmul.f32 %v6599_v48, %v3268_v59 }
0x10bd   : > { %v3276_v63 = vadd.f32 %v3275_v60, %v3271_v62 }
0x10bf   : > { %6326 = vmatmul.mubr.msk.f32.vlgmr.msra.gmra.mxu0 %vm748_vm0, %v3276_v63 }
0x10c0   : > { %6330 = vmatprep.mubr.msk.f32.mxu0 %vm6709_vm1, %v6708_v8 }
0x117f   : > { %v3359_v2 = vpop.f32.mrf.mxu0 }
0x1180   : > { %v3360_v3 = vadd.f32 %v5871_v1, %v3359_v2 }
0x1181   : > { %v6327_v4 = vpop.f32.mrf.mxu0 }
0x1182   : > { %3373 = vrot.lane.b32.xlu1 %v3360_v3, %s7833_s5  ;;  %3371 = vrot.lane.b32.xlu0 %v3360_v3, %s7832_s30 }
0x1186   : > { %3375 = vrot.lane.b32.xlu1 %v3360_v3, %s7836_s29  ;;  %3377 = vrot.lane.b32.xlu0 %v3360_v3, %s7835_s26 }
0x11f4   : > { %v7388_v22 = vpop.permute.xlu1 %3373  ;;  %v7390_v5 = vpop.permute.xlu0 %3371 }
0x11f5   : > { %3529 = vrot.lane.b32.xlu0 %v7388_v22, %s7835_s26  ;;  %3453 = vrot.lane.b32.xlu1 %v7390_v5, %s7835_s26 }
0x11f8   : > { %v7396_v6 = vpop.permute.xlu1 %3375  ;;  %v3378_v7 = vpop.permute.xlu0 %3377 }
0x11f9   : > { %3605 = vrot.lane.b32.xlu1 %v7396_v6, %s7835_s26  ;;  %6329 = vmatpush3.xpose.msk.msra.mxu0 %vm961_vm4, %v3378_v7 }
0x11fa   : > { %6338 = vmatprep.subr.mxu0 %v6708_v8 }
0x11fc   : > { %6331 = vmatmul.mubr.msk.f32.vlgmr.msra.gmra.mxu0 %vm961_vm4, %v3360_v3 }
0x11fd   : > { %6340 = vmatprep.mubr.msk.f32.mxu0 %vm6709_vm1, %v6708_v8 }
0x1267   : > { %v3454_v9 = vpop.permute.xlu1 %3453  ;;  %v3530_v10 = vpop.permute.xlu0 %3529 }
0x1268   : > { %6334 = vmatpush3.xpose.msk.msra.mxu1 %vm961_vm4, %v3454_v9  ;;  %6339 = vmatpush3.xpose.msk.msra.mxu0 %vm961_vm4, %v3530_v10 }
0x1269   : > { %6343 = vmatprep.subr.mxu1 %v6708_v8  ;;  %6348 = vmatprep.subr.mxu0 %v6708_v8 }
0x126b   : > { %6336 = vmatmul.mubr.msk.f32.vlgmr.msra.gmra.mxu1 %vm961_vm4, %v7390_v5  ;;  %v3606_v11 = vpop.permute.xlu1 %3605  ;;  %6341 = vmatmul.mubr.msk.f32.vlgmr.msra.gmra.mxu0 %vm961_vm4, %v7388_v22 }
0x126c   : > { %6344 = vmatpush3.xpose.msk.msra.mxu1 %vm961_vm4, %v3606_v11  ;;  %6345 = vmatprep.mubr.msk.f32.mxu1 %vm6709_vm1, %v6708_v8  ;;  %v5873_v11 = vld [vmem:[%s7830_s1 + $0x20] sm:$0xff] }
0x126d   : > { %6350 = vmatprep.mubr.msk.f32.mxu0 %vm6709_vm1, %v6708_v8  ;;  %6353 = vmatprep.subr.mxu1 %v6708_v8 }
0x126f   : > { %6346 = vmatmul.mubr.msk.f32.vlgmr.msra.gmra.mxu1 %vm961_vm4, %v7396_v6 }
0x1270   : > { %6355 = vmatprep.mubr.msk.f32.mxu1 %vm6709_vm1, %v6708_v8 }
0x12bc   : > { %v3449_v12 = vpop.f32.mrf.mxu0 }
0x12bd   : > { %v3450_v14 = vadd.f32 %v6644_v13, %v3449_v12 }
0x12be   : > { %v6332_v21 = vpop.f32.mrf.mxu0 }
0x12bf   : > { %v3681_v23 = vsel %vm961_vm4, %v3450_v14, -inf }
0x12c0   : > { %3682 = vmax.xlane.f32.xlu0 %v3681_v23  ;;  %v5874_v23 = vld [vmem:[%s7830_s1 + $0x28] sm:$0xff] }
0x132b   : > { %v3525_v25 = vpop.f32.mrf.mxu1  ;;  %v3601_v16 = vpop.f32.mrf.mxu0 }
0x132c   : > { %v3526_v17 = vadd.f32 %v6644_v13, %v3525_v25  ;;  %v3602_v18 = vadd.f32 %v6644_v13, %v3601_v16  ;;  %v5875_v25 = vld [vmem:[%s7830_s1 + $0x30] sm:$0xff] }
0x132d   : > { %v6337_v0 = vpop.f32.mrf.mxu1  ;;  %v6342_v19 = vpop.f32.mrf.mxu0 }
0x132e   : > { %v3687_v20 = vsel %vm961_vm4, %v3602_v18, -inf  ;;  %v3684_v24 = vsel %vm961_vm4, %v3526_v17, -inf  ;;  %v5876_v0 = vld [vmem:[%s7830_s1 + $0x38] sm:$0xff] }
0x132f   : > { %3688 = vmax.xlane.f32.xlu0 %v3687_v20  ;;  %3685 = vmax.xlane.f32.xlu1 %v3684_v24  ;;  %v3677_v26 = vpop.f32.mrf.mxu1 }
0x1330   : > { %v3678_v27 = vadd.f32 %v6644_v13, %v3677_v26 }
0x1331   : > { %v6347_v29 = vpop.f32.mrf.mxu1 }
0x1332   : > { %v3690_v30 = vsel %vm961_vm4, %v3678_v27, -inf }
0x1333   : > { %3691 = vmax.xlane.f32.xlu0 %v3690_v30 }
0x1340   : > { %3725 = vrot.lane.b32.xlu1 %v3360_v3, %s7837_s24 }
0x1349   : > { %v3683_v31 = vpop.xlane.xlu0 %3682 }
0x134a   : > { %v3693_v32 = vsub.f32 %v3450_v14, %v3683_v31 }
0x134c   : > { %v3697_v33 = vmul.f32 1.442695, %v3693_v32 }
0x134e   : > { %6600 = vpow2.f32 %v3697_v33 }
0x135b   : > { %v6601_v34 = vpop.eup %6600 }
0x135c   : > { %v3705_v35 = vsel %vm961_vm4, %v6601_v34, 0.0 }
0x1364   : > { %3706 = vadd.xlane.f32.xlu1 %v3705_v35 }
0x13b8   : > { %v3689_v36 = vpop.xlane.xlu0 %3688  ;;  %v3686_v38 = vpop.xlane.xlu1 %3685 }
0x13b9   : > { %v3695_v39 = vsub.f32 %v3602_v18, %v3689_v36  ;;  %v3694_v40 = vsub.f32 %v3526_v17, %v3686_v38 }
0x13bb   : > { %v3701_v41 = vmul.f32 1.442695, %v3695_v39  ;;  %v3699_v42 = vmul.f32 1.442695, %v3694_v40 }
0x13bc   : > { %v3726_v43 = vpop.permute.xlu1 %3725  ;;  %v3692_v46 = vpop.xlane.xlu0 %3691 }
0x13bd   : > { %6602 = vpow2.f32 %v3701_v41  ;;  %v3696_v47 = vsub.f32 %v3678_v27, %v3692_v46  ;;  %6349 = vmatpush3.msra.mxu0 %v3726_v43 }
0x13be   : > { %6604 = vpow2.f32 %v3699_v42  ;;  %6358 = vmatprep.subr.mxu0 %v6708_v8  ;;  %v5894_v42 = vld [vmem:[%s7766_s7 + $0x1] ss:$0 sm:$0xff] }
0x13bf   : > { %v3703_v50 = vmul.f32 1.442695, %v3696_v47 }
0x13c1   : > { %6606 = vpow2.f32 %v3703_v50 }
0x13ca   : > { %v6603_v15 = vpop.eup %6602 }
0x13cb   : > { %v6605_v54 = vpop.eup %6604  ;;  %v3711_v59 = vsel %vm961_vm4, %v6603_v15, 0.0 }
0x13cc   : > { %3712 = vadd.xlane.f32.xlu1 %v3711_v59  ;;  %v3708_v60 = vsel %vm961_vm4, %v6605_v54, 0.0 }
0x13cd   : > { %3709 = vadd.xlane.f32.xlu0 %v3708_v60 }
0x13ce   : > { %v6607_v48 = vpop.eup %6606 }
0x13cf   : > { %v3714_v62 = vsel %vm961_vm4, %v6607_v48, 0.0 }
0x13d1   : > { %3715 = vadd.xlane.f32.xlu0 %v3714_v62 }
0x13dd   : > { %3877 = vrot.lane.b32.xlu1 %v7388_v22, %s7837_s24 }
0x13e1   : > { %3953 = vrot.lane.b32.xlu1 %v7396_v6, %s7837_s24 }
0x13e7   : > { %3801 = vrot.lane.b32.xlu0 %v7390_v5, %s7837_s24 }
0x13ed   : > { %v3707_v63 = vpop.xlane.xlu1 %3706 }
0x13ee   : > { %6608 = vrcp.f32 %v3707_v63 }
0x13fb   : > { %v6609_v1 = vpop.eup %6608 }
0x13fc   : > { %v3721_v2 = vmul.f32 %v6609_v1, %v6601_v34 }
0x13fe   : > { %6351 = vmatmul.mubr.msk.f32.vlgmr.msra.gmra.mxu0 %vm961_vm4, %v3721_v2  ;;  %v5898_v2 = vld [vmem:[%s7767_s8 + $0x38] sm:$0xff] }
0x13ff   : > { %6360 = vmatprep.mubr.msk.f32.mxu0 %vm6709_vm1, %v6708_v8 }
0x1455   : > { %v3713_v3 = vpop.xlane.xlu1 %3712 }
0x1456   : > { %6610 = vrcp.f32 %v3713_v3  ;;  %v3710_v4 = vpop.xlane.xlu0 %3709  ;;  %v5897_v3 = vld [vmem:[%s7767_s8 + $0x30] sm:$0xff] }
0x1457   : > { %6612 = vrcp.f32 %v3710_v4  ;;  %v5896_v4 = vld [vmem:[%s7767_s8 + $0x28] sm:$0xff] }
0x1459   : > { %v3878_v22 = vpop.permute.xlu1 %3877 }
0x145a   : > { %v3716_v7 = vpop.xlane.xlu0 %3715  ;;  %6359 = vmatpush3.msra.mxu0 %v3878_v22  ;;  %v5895_v22 = vld [vmem:[%s7767_s8 + $0x20] sm:$0xff] }
0x145b   : > { %6614 = vrcp.f32 %v3716_v7  ;;  %6368 = vmatprep.subr.mxu0 %v6708_v8 }
0x145d   : > { %v3954_v13 = vpop.permute.xlu1 %3953 }
0x145e   : > { %v3802_v5 = vpop.permute.xlu0 %3801 }
0x145f   : > { %6354 = vmatpush3.msra.mxu1 %v3802_v5 }
0x1460   : > { %6363 = vmatprep.subr.mxu1 %v6708_v8 }
0x1463   : > { %v6611_v6 = vpop.eup %6610 }
0x1464   : > { %v6613_v9 = vpop.eup %6612  ;;  %v3723_v10 = vmul.f32 %v6611_v6, %v6603_v15 }
0x1465   : > { %v3722_v12 = vmul.f32 %v6613_v9, %v6605_v54 }
0x1466   : > { %6361 = vmatmul.mubr.msk.f32.vlgmr.msra.gmra.mxu0 %vm961_vm4, %v3723_v10 }
0x1467   : > { %6356 = vmatmul.mubr.msk.f32.vlgmr.msra.gmra.mxu1 %vm961_vm4, %v3722_v12  ;;  %6369 = vmatpush3.msra.mxu0 %v5873_v11 }
0x1468   : > { %v6615_v14 = vpop.eup %6614  ;;  %6364 = vmatpush3.msra.mxu1 %v3954_v13  ;;  %6365 = vmatprep.mubr.msk.f32.mxu1 %vm6709_vm1, %v6708_v8 }
0x1469   : > { %v3724_v21 = vmul.f32 %v6615_v14, %v6607_v48  ;;  %6370 = vmatprep.mubr.msk.f32.mxu0 %vm6709_vm1, %v6708_v8  ;;  %6373 = vmatprep.subr.mxu1 %v6708_v8  ;;  %v4356_v14 = vrot.slane %v7367_v51, %v7122_v37 }
0x146a   : > { %6378 = vmatprep.subr.mxu0 %v6708_v8 }
0x146b   : > { %6366 = vmatmul.mubr.msk.f32.vlgmr.msra.gmra.mxu1 %vm961_vm4, %v3724_v21 }
0x146c   : > { %6374 = vmatpush3.msra.mxu1 %v5874_v23  ;;  %6375 = vmatprep.mubr.msk.f32.mxu1 %vm6709_vm1, %v6708_v8  ;;  %v4364_v23 = vrot.slane %v7374_v57, %v7122_v37  ;;  %v5900_v37 = vld [vmem:[%s7768_s9 + $0x1] ss:$0 sm:$0xff] }
0x146d   : > { %6383 = vmatprep.subr.mxu1 %v6708_v8 }
0x14be   : > { %v3797_v16 = vpop.f32.mrf.mxu0 }
0x14bf   : > { %6371 = vmatmul.mubr.msk.f32.vlgmr.msra.gmra.mxu0 %vm961_vm4, %v3797_v16 }
0x14c0   : > { %v6352_v17 = vpop.f32.mrf.mxu0  ;;  %6379 = vmatpush3.msra.mxu0 %v5875_v25  ;;  %6380 = vmatprep.mubr.msk.f32.mxu0 %vm6709_vm1, %v6708_v8 }
0x14c1   : > { %6388 = vmatprep.subr.mxu0 %v6708_v8 }
0x1526   : > { %v3949_v18 = vpop.f32.mrf.mxu0 }
0x1527   : > { %v3873_v19 = vpop.f32.mrf.mxu1  ;;  %6381 = vmatmul.mubr.msk.f32.vlgmr.msra.gmra.mxu0 %vm961_vm4, %v3949_v18 }
0x1528   : > { %6376 = vmatmul.mubr.msk.f32.vlgmr.msra.gmra.mxu1 %vm961_vm4, %v3873_v19  ;;  %v6362_v20 = vpop.f32.mrf.mxu0  ;;  %6396 = vmatprep.mubr.msk.f32.mxu0 %vm6709_vm1, %v6708_v8 }
0x1529   : > { %v6357_v24 = vpop.f32.mrf.mxu1  ;;  %6384 = vmatpush3.msra.mxu1 %v5876_v0  ;;  %6385 = vmatprep.mubr.msk.f32.mxu1 %vm6709_vm1, %v6708_v8 }
0x152a   : > { %6399 = vmatprep.subr.mxu1 %v6708_v8  ;;  %6389 = vmatpush3.msra.mxu0 %v5898_v2 }
0x152b   : > { %v4025_v26 = vpop.f32.mrf.mxu1  ;;  %6390 = vmatprep.subr.mxu0 %v6708_v8 }
0x152c   : > { %6386 = vmatmul.mubr.msk.f32.vlgmr.msra.gmra.mxu1 %vm961_vm4, %v4025_v26  ;;  %6391 = vmatpush3.msra.mxu0 %v5897_v3 }
0x152d   : > { %v6367_v27 = vpop.f32.mrf.mxu1  ;;  %6403 = vmatprep.mubr.msk.f32.mxu1 %vm6709_vm1, %v6708_v8  ;;  %6392 = vmatprep.subr.mxu0 %v6708_v8 }
0x152e   : > { %6393 = vmatpush3.msra.mxu0 %v5896_v4 }
0x152f   : > { %6394 = vmatprep.subr.mxu0 %v6708_v8 }
0x1530   : > { %6395 = vmatpush3.msra.mxu0 %v5895_v22 }
0x1531   : > { %6406 = vmatprep.subr.mxu0 %v6708_v8 }
0x157f   : > { %v4098_v29 = vpop.f32.mrf.mxu0 }
0x1580   : > { %v4321_v33 = vsel %vm748_vm0, %v4098_v29, 0.0 }
0x1581   : > { %v6372_v30 = vpop.f32.mrf.mxu0 }
0x15e7   : > { %v4244_v31 = vpop.f32.mrf.mxu0 }
0x15e8   : > { %v4171_v32 = vpop.f32.mrf.mxu1  ;;  %v4324_v39 = vsel %vm748_vm0, %v4244_v31, 0.0 }
0x15e9   : > { %v4322_v34 = vsel %vm748_vm0, %v4171_v32, 0.0  ;;  %v6382_v35 = vpop.f32.mrf.mxu0 }
0x15ea   : > { %v4323_v36 = vadd.f32 %v4322_v34, %v4321_v33  ;;  %v6377_v38 = vpop.f32.mrf.mxu1  ;;  %v6645_v35 = vld [vmem:[%s7185_s25] ss:$0 sm:$0xff] }
0x15ec   : > { %v4325_v40 = vadd.f32 %v4324_v39, %v4323_v36  ;;  %v4317_v41 = vpop.f32.mrf.mxu1 }
0x15ed   : > { %v4326_v43 = vsel %vm748_vm0, %v4317_v41, 0.0 }
0x15ee   : > { %v4327_v46 = vadd.f32 %v4326_v43, %v4325_v40  ;;  %v6387_v47 = vpop.f32.mrf.mxu1 }
0x15f0   : > { %v4334_v50 = vadd.f32 %v5894_v42, %v4327_v46 }
0x15f2   : > { %v7491_v15 = vadd.f32 %v4334_v50, %v7342_v28 }
0x15f4   : > { %v4336_v54 = vsel %vm748_vm0, %v7491_v15, 0.0 }
0x15f5   : > { %4337 = vadd.xlane.f32.xlu0 %v4336_v54 }
0x160b   : > { %4468 = vrot.lane.b32.xlu0 %v7067_v58, %s7837_s24 }
0x160f   : > { %4466 = vrot.lane.b32.xlu0 %v7076_v61, %s7837_s24 }
0x1613   : > { %4628 = vrot.lane.b32.xlu0 %v7146_v52, %s7837_s24 }
0x1617   : > { %4708 = vrot.lane.b32.xlu0 %v7157_v53, %s7837_s24 }
0x161b   : > { %4706 = vrot.lane.b32.xlu0 %v7165_v55, %s7837_s24 }
0x167e   : > { %v4338_v28 = vpop.xlane.xlu0 %4337 }
0x167f   : > { %v4339_v59 = vmul.f32 0.03125, %v4338_v28 }
0x1681   : > { %v4340_v60 = vsub.f32 %v7491_v15, %v4339_v59 }
0x1682   : > { %v4469_v48 = vpop.permute.xlu0 %4468 }
0x1683   : > { %6400 = vmatpush3.xpose.msk.msra.mxu1 %vm961_vm4, %v4469_v48  ;;  %v4341_v62 = vmul.f32 %v4340_v60, %v4340_v60  ;;  %v4357_v21 = vmul.f32 %v4356_v14, %v4340_v60 }
0x1684   : > { %6401 = vmatprep.subr.mxu1 %v6708_v8 }
0x1685   : > { %v4342_v63 = vsel %vm748_vm0, %v4341_v62, 0.0 }
0x1686   : > { %4343 = vadd.xlane.f32.xlu1 %v4342_v63  ;;  %v4467_v1 = vpop.permute.xlu0 %4466 }
0x1687   : > { %6402 = vmatpush3.xpose.msk.msra.mxu1 %vm961_vm4, %v4467_v1 }
0x1688   : > { %6413 = vmatprep.subr.mxu1 %v6708_v8 }
0x168a   : > { %v4629_v26 = vpop.permute.xlu0 %4628 }
0x168e   : > { %v4709_v27 = vpop.permute.xlu0 %4708 }
0x1692   : > { %v4707_v30 = vpop.permute.xlu0 %4706 }
0x1697   : > { %4548 = vrot.lane.b32.xlu1 %v7128_v44, %s7837_s24 }
0x169b   : > { %4546 = vrot.lane.b32.xlu1 %v7136_v45, %s7837_s24 }
0x170f   : > { %v4344_v7 = vpop.xlane.xlu1 %4343 }
0x1710   : > { %v4345_v5 = vmul.f32 0.032258064, %v4344_v7 }
0x1712   : > { %6616 = vrsqrt.f32 %v4345_v5  ;;  %vm4348_vm13 = vcmp.eq.f32.partialorder %v4345_v5, inf  ;;  %v4351_v10 = vand.u32 2147483648, %v4345_v5  ;;  %vm4350_vm14 = vcmp.eq.f32.partialorder %v4345_v5, 0.0 }
0x1713   : > { %v4549_v17 = vpop.permute.xlu1 %4548 }
0x1717   : > { %v4547_v0 = vpop.permute.xlu1 %4546 }
0x171f   : > { %v6617_v6 = vpop.eup %6616 }
0x1720   : > { %v4347_v9 = vmul.f32 %v6617_v6, %v4345_v5 }
0x1722   : > { %v4349_v11 = vsel %vm4348_vm13, %v4345_v5, %v4347_v9 }
0x1723   : > { %v4352_v12 = vsel %vm4350_vm14, %v4351_v10, %v4349_v11 }
0x1724   : > { %v4358_v13 = vadd.f32 1e-06, %v4352_v12 }
0x1726   : > { %6618 = vrcp.f32 %v4358_v13 }
0x1733   : > { %v6619_v25 = vpop.eup %6618 }
0x1734   : > { %v4360_v16 = vmul.f32 %v6619_v25, %v4357_v21 }
0x1736   : > { %v4365_v18 = vadd.f32 %v4364_v23, %v4360_v16 }
0x1738   : > { %6397 = vmatmul.mubr.msk.f32.vlgmr.msra.gmra.mxu0 %vm748_vm0, %v4365_v18 }
0x1739   : > { %6407 = vmatpush3.xpose.msk.msra.mxu0 %vm961_vm4, %v4549_v17  ;;  %6410 = vmatprep.mubr.msk.f32.mxu0 %vm6709_vm1, %v6708_v8 }
0x173a   : > { %6408 = vmatprep.subr.mxu0 %v6708_v8 }
0x173d   : > { %6409 = vmatpush3.xpose.msk.msra.mxu0 %vm961_vm4, %v4547_v0 }
0x173e   : > { %6420 = vmatprep.subr.mxu0 %v6708_v8 }
0x17f8   : > { %v4448_v19 = vpop.f32.mrf.mxu0 }
0x17f9   : > { %v4449_v20 = vadd.f32 %v5900_v37, %v4448_v19 }
0x17fa   : > { %v6398_v24 = vpop.f32.mrf.mxu0 }
0x17fb   : > { %4464 = vrot.lane.b32.xlu0 %v4449_v20, %s7836_s29  ;;  %4460 = vrot.lane.b32.xlu1 %v4449_v20, %s7832_s30  ;;  %s6715_s30 = smov 32  }
0x17fc   : > { %6404 = vmatmul.mubr.msk.f32.vlgmr.msra.gmra.mxu1 %vm961_vm4, %v4449_v20 }
0x17fd   : > { %6414 = vmatpush3.xpose.msk.msra.mxu1 %vm961_vm4, %v4629_v26  ;;  %6417 = vmatprep.mubr.msk.f32.mxu1 %vm6709_vm1, %v6708_v8 }
0x17fe   : > { %6415 = vmatprep.subr.mxu1 %v6708_v8 }
0x17ff   : > { %4626 = vrot.lane.b32.xlu1 %v7167_v56, %s7837_s24  ;;  %s6716_s24 = smov [#allocation2]  }
0x1800   : > { %s6650_s11 = sshll.u32 %s6716_s24, 4  ;;  %s6651_s11 = int_to_ptr.vmem [resolvable:$false] %s6650_s11 }
0x1801   : > { %s6652_s4 = scalar_lea.vmem %s6651_s11, 256 }
0x1803   : > { %4462 = vrot.lane.b32.xlu1 %v4449_v20, %s7833_s5 }
0x186d   : > { %v4461_v29 = vpop.permute.xlu1 %4460  ;;  %v4465_v32 = vpop.permute.xlu0 %4464 }
0x186e   : > { %6411 = vmatmul.mubr.msk.f32.vlgmr.msra.gmra.mxu0 %vm961_vm4, %v4461_v29 }
0x186f   : > { %6421 = vmatpush3.xpose.msk.msra.mxu0 %vm961_vm4, %v4709_v27  ;;  %6424 = vmatprep.mubr.msk.f32.mxu0 %vm6709_vm1, %v6708_v8 }
0x1870   : > { %6422 = vmatprep.subr.mxu0 %v6708_v8 }
0x1871   : > { %v4627_v31 = vpop.permute.xlu1 %4626 }
0x1872   : > { %6416 = vmatpush3.xpose.msk.msra.mxu1 %vm961_vm4, %v4627_v31 }
0x1873   : > { %6423 = vmatpush3.xpose.msk.msra.mxu0 %vm961_vm4, %v4707_v30  ;;  %6427 = vmatprep.subr.mxu1 %v6708_v8 }
0x1874   : > { %6441 = vmatprep.subr.mxu0 %v6708_v8 }
0x1875   : > { %v4463_v33 = vpop.permute.xlu1 %4462 }
0x1876   : > { %6425 = vmatmul.mubr.msk.f32.vlgmr.msra.gmra.mxu0 %vm961_vm4, %v4465_v32  ;;  %6418 = vmatmul.mubr.msk.f32.vlgmr.msra.gmra.mxu1 %vm961_vm4, %v4463_v33  ;;  %v5902_v32 = vld [vmem:[%s7771_s12 + $0x20] sm:$0xff]  ;;  %v5903_v33 = vld [vmem:[%s7771_s12 + $0x28] sm:$0xff] }
0x1877   : > { %6431 = vmatprep.mubr.msk.f32.mxu1 %vm6709_vm1, %v6708_v8  ;;  %6445 = vmatprep.mubr.msk.f32.mxu0 %vm6709_vm1, %v6708_v8 }
0x18bc   : > { %v4542_v34 = vpop.f32.mrf.mxu1 }
0x18bd   : > { %v4543_v36 = vadd.f32 %v6645_v35, %v4542_v34  ;;  %v5904_v34 = vld [vmem:[%s7771_s12 + $0x30] sm:$0xff] }
0x18be   : > { %v6405_v38 = vpop.f32.mrf.mxu1 }
0x18bf   : > { %v4786_v39 = vsel %vm2369_vm7, %v4543_v36, -inf  ;;  %v5905_v38 = vld [vmem:[%s7771_s12 + $0x38] sm:$0xff] }
0x18c0   : > { %4787 = vmax.xlane.f32.xlu1 %v4786_v39 }
0x192e   : > { %v4622_v40 = vpop.f32.mrf.mxu0 }
0x192f   : > { %v4623_v41 = vadd.f32 %v6645_v35, %v4622_v40 }
0x1930   : > { %v6412_v42 = vpop.f32.mrf.mxu0 }
0x1931   : > { %v4789_v43 = vsel %vm2369_vm7, %v4623_v41, -inf }
0x1932   : > { %4790 = vmax.xlane.f32.xlu0 %v4789_v43 }
0x1936   : > { %v4782_v46 = vpop.f32.mrf.mxu0  ;;  %v4702_v47 = vpop.f32.mrf.mxu1 }
0x1937   : > { %v4783_v50 = vadd.f32 %v6645_v35, %v4782_v46  ;;  %v4703_v54 = vadd.f32 %v6645_v35, %v4702_v47 }
0x1938   : > { %v6426_v28 = vpop.f32.mrf.mxu0  ;;  %v6419_v59 = vpop.f32.mrf.mxu1 }
0x1939   : > { %v4795_v60 = vsel %vm2369_vm7, %v4783_v50, -inf  ;;  %v4792_v48 = vsel %vm2369_vm7, %v4703_v54, -inf }
0x193a   : > { %4796 = vmax.xlane.f32.xlu1 %v4795_v60  ;;  %4793 = vmax.xlane.f32.xlu0 %v4792_v48 }
0x1949   : > { %v4788_v62 = vpop.xlane.xlu1 %4787 }
0x194a   : > { %v4798_v63 = vsub.f32 %v4543_v36, %v4788_v62 }
0x194b   : > { %4830 = vrot.lane.b32.xlu1 %v7076_v61, %s6715_s30 }
0x194c   : > { %v4802_v1 = vmul.f32 1.442695, %v4798_v63 }
0x194e   : > { %6620 = vpow2.f32 %v4802_v1 }
0x194f   : > { %4911 = vrot.lane.b32.xlu1 %v7128_v44, %s6715_s30 }
0x1950   : > { %4832 = vrot.lane.b32.xlu0 %v7067_v58, %s6715_s30 }
0x1953   : > { %4990 = vrot.lane.b32.xlu1 %v7146_v52, %s6715_s30 }
0x1954   : > { %4909 = vrot.lane.b32.xlu0 %v7136_v45, %s6715_s30 }
0x1958   : > { %4988 = vrot.lane.b32.xlu0 %v7167_v56, %s6715_s30 }
0x195b   : > { %v6621_v61 = vpop.eup %6620 }
0x195c   : > { %v4810_v2 = vsel %vm2369_vm7, %v6621_v61, 0.0 }
0x1977   : > { %4811 = vadd.xlane.f32.xlu0 %v4810_v2 }
0x19bb   : > { %v4791_v44 = vpop.xlane.xlu0 %4790 }
0x19bc   : > { %v4799_v3 = vsub.f32 %v4623_v41, %v4791_v44 }
0x19be   : > { %v4804_v58 = vmul.f32 1.442695, %v4799_v3 }
0x19c0   : > { %6622 = vpow2.f32 %v4804_v58  ;;  %v5927_v58 = vld [vmem:[%s7772_s13 + $0x1] ss:$0 sm:$0xff] }
0x19c3   : > { %v4797_v4 = vpop.xlane.xlu1 %4796  ;;  %v4794_v52 = vpop.xlane.xlu0 %4793 }
0x19c4   : > { %v4801_v22 = vsub.f32 %v4783_v50, %v4797_v4  ;;  %v4800_v7 = vsub.f32 %v4703_v54, %v4794_v52 }
0x19c6   : > { %v4808_v45 = vmul.f32 1.442695, %v4801_v22  ;;  %v4806_v5 = vmul.f32 1.442695, %v4800_v7 }
0x19c7   : > { %v4831_v6 = vpop.permute.xlu1 %4830  ;;  %v4833_v56 = vpop.permute.xlu0 %4832 }
0x19c8   : > { %6624 = vpow2.f32 %v4808_v45  ;;  %6428 = vmatpush3.msra.mxu1 %v4833_v56 }
0x19c9   : > { %6626 = vpow2.f32 %v4806_v5  ;;  %6429 = vmatprep.subr.mxu1 %v6708_v8 }
0x19ca   : > { %6430 = vmatpush3.msra.mxu1 %v4831_v6 }
0x19cb   : > { %v4912_v9 = vpop.permute.xlu1 %4911  ;;  %v4910_v10 = vpop.permute.xlu0 %4909  ;;  %6434 = vmatprep.subr.mxu1 %v6708_v8 }
0x19cd   : > { %v6623_v11 = vpop.eup %6622 }
0x19ce   : > { %v4813_v12 = vsel %vm2369_vm7, %v6623_v11, 0.0 }
0x19cf   : > { %v4991_v13 = vpop.permute.xlu1 %4990  ;;  %4814 = vadd.xlane.f32.xlu1 %v4813_v12  ;;  %v4989_v14 = vpop.permute.xlu0 %4988  ;;  %v5928_v12 = vld [vmem:[%s7773_s14 + $0x20] sm:$0xff] }
0x19d0   : > { %6442 = vmatpush3.msra.mxu0 %v4991_v13  ;;  %v5942_v13 = vld [vmem:[%s7775_s16 + $0x78] sm:$0xff] }
0x19d1   : > { %6443 = vmatprep.subr.mxu0 %v6708_v8 }
0x19d2   : > { %6444 = vmatpush3.msra.mxu0 %v4989_v14  ;;  %v5941_v14 = vld [vmem:[%s7775_s16 + $0x70] sm:$0xff] }
0x19d3   : > { %6455 = vmatprep.subr.mxu0 %v6708_v8 }
0x19d5   : > { %v6625_v21 = vpop.eup %6624 }
0x19d6   : > { %v6627_v23 = vpop.eup %6626  ;;  %v4819_v25 = vsel %vm2369_vm7, %v6625_v21, 0.0 }
0x19d7   : > { %4820 = vadd.xlane.f32.xlu1 %v4819_v25  ;;  %v4816_v16 = vsel %vm2369_vm7, %v6627_v23, 0.0  ;;  %v5938_v25 = vld [vmem:[%s7775_s16 + $0x58] sm:$0xff] }
0x19d8   : > { %4817 = vadd.xlane.f32.xlu0 %v4816_v16 }
0x19e8   : > { %5069 = vrot.lane.b32.xlu1 %v7157_v53, %s6715_s30 }
0x19ee   : > { %5067 = vrot.lane.b32.xlu0 %v7165_v55, %s6715_s30  ;;  %s712_s30 = sand.u32 1, %s6698_s28  }
0x19ef   : > { %s5809_s5 = sshll.u32 %s712_s30, 3  ;;  %s5700_s25 = scalar_lea.sflag [#allocation3], %s712_s30 }
0x19f0   : > { %s714_s3 = scalar_lea.vmem [#allocation2], %s5809_s5 }
0x19f1   : > { %s5713_s26 = sshll.u32 %s714_s3, 4  ;;  %s5714_s26 = int_to_ptr.vmem [resolvable:$true] %s5713_s26 }
0x19f2   : > { %s6646_s29 = scalar_lea.vmem %s5714_s26, 128  ;;  %p6653_p1 = scmp.lt.s32.totalorder %s5714_s26, %s6651_s11 }
0x19f3   : > { %p6647_p12 = scmp.ne.s32.totalorder %s5714_s26, %s6646_s29  ;;  %p6654_p2 = scmp.lt.s32.totalorder %s6652_s4, %s6646_s29 }
0x19f5   : > { %p6648_p13 = pnand %p6647_p12, %p6870_p5  ;;  %p6655_p3 = por %p6654_p2, %p6653_p1 }
0x19f7   : > { %p6649_p0 = pneg %p6648_p13 }
0x19f9   : > { %p6656_p4 = pnand %p6655_p3, %p6649_p0 }
0x1a00   : > { %v4812_v17 = vpop.xlane.xlu0 %4811 }
0x1a01   : > { %6628 = vrcp.f32 %v4812_v17 }
0x1a0e   : > { %v6629_v18 = vpop.eup %6628 }
0x1a0f   : > { %v4826_v0 = vmul.f32 %v6629_v18, %v6621_v61 }
0x1a11   : > { %6432 = vmatmul.mubr.msk.f32.vlgmr.msra.gmra.mxu1 %vm2369_vm7, %v4826_v0 }
0x1a12   : > { %6435 = vmatpush3.msra.mxu1 %v4912_v9  ;;  %6438 = vmatprep.mubr.msk.f32.mxu1 %vm6709_vm1, %v6708_v8 }
0x1a13   : > { %6436 = vmatprep.subr.mxu1 %v6708_v8 }
0x1a14   : > { %6437 = vmatpush3.msra.mxu1 %v4910_v10  ;;  %v5931_v10 = vld [vmem:[%s7773_s14 + $0x38] sm:$0xff] }
0x1a15   : > { %6448 = vmatprep.subr.mxu1 %v6708_v8 }
0x1a58   : > { %v4815_v37 = vpop.xlane.xlu1 %4814 }
0x1a59   : > { %6630 = vrcp.f32 %v4815_v37 }
0x1a60   : > { %v4821_v53 = vpop.xlane.xlu1 %4820 }
0x1a61   : > { %6632 = vrcp.f32 %v4821_v53  ;;  %v4818_v55 = vpop.xlane.xlu0 %4817 }
0x1a62   : > { %6634 = vrcp.f32 %v4818_v55 }
0x1a64   : > { %v5070_v24 = vpop.permute.xlu1 %5069 }
0x1a65   : > { %v5068_v26 = vpop.permute.xlu0 %5067 }
0x1a66   : > { %v6631_v19 = vpop.eup %6630 }
0x1a67   : > { %v4827_v20 = vmul.f32 %v6631_v19, %v6623_v11  ;;  %v5929_v11 = vld [vmem:[%s7773_s14 + $0x28] sm:$0xff] }
0x1a69   : > { %6439 = vmatmul.mubr.msk.f32.vlgmr.msra.gmra.mxu1 %vm2369_vm7, %v4827_v20  ;;  %v5473_v20 = vrot.slane %v7367_v51, %v7311_v49  ;;  %v5936_v51 = vld [vmem:[%s7775_s16 + $0x48] sm:$0xff] }
0x1a6a   : > { %6449 = vmatpush3.msra.mxu1 %v5070_v24  ;;  %6452 = vmatprep.mubr.msk.f32.mxu1 %vm6709_vm1, %v6708_v8 }
0x1a6b   : > { %6450 = vmatprep.subr.mxu1 %v6708_v8 }
0x1a6c   : > { %6451 = vmatpush3.msra.mxu1 %v5068_v26  ;;  %v5481_v26 = vrot.slane %v7374_v57, %v7311_v49  ;;  %v5935_v49 = vld [vmem:[%s7775_s16 + $0x40] sm:$0xff] }
0x1a6d   : > { %6460 = vmatprep.subr.mxu1 %v6708_v8  ;;  %v5933_v57 = vld [vmem:[%s7774_s15 + $0x1] ss:$0 sm:$0xff] }
0x1a6e   : > { %v6633_v27 = vpop.eup %6632 }
0x1a6f   : > { %v6635_v29 = vpop.eup %6634  ;;  %v4829_v30 = vmul.f32 %v6633_v27, %v6625_v21  ;;  %v5940_v21 = vld [vmem:[%s7775_s16 + $0x68] sm:$0xff] }
0x1a70   : > { %v4828_v31 = vmul.f32 %v6635_v29, %v6627_v23  ;;  %v5939_v23 = vld [vmem:[%s7775_s16 + $0x60] sm:$0xff] }
0x1a71   : > { %6453 = vmatmul.mubr.msk.f32.vlgmr.msra.gmra.mxu1 %vm2369_vm7, %v4829_v30 }
0x1a72   : > { %6446 = vmatmul.mubr.msk.f32.vlgmr.msra.gmra.mxu0 %vm2369_vm7, %v4828_v31  ;;  %6462 = vmatprep.mubr.msk.f32.mxu1 %vm6709_vm1, %v6708_v8  ;;  %v5937_v31 = vld [vmem:[%s7775_s16 + $0x50] sm:$0xff] }
0x1a73   : > { %6456 = vmatpush3.msra.mxu0 %v5902_v32  ;;  %6457 = vmatprep.mubr.msk.f32.mxu0 %vm6709_vm1, %v6708_v8 }
0x1a74   : > { %6465 = vmatprep.subr.mxu0 %v6708_v8  ;;  %6461 = vmatpush3.msra.mxu1 %v5903_v33 }
0x1a75   : > { %6470 = vmatprep.subr.mxu1 %v6708_v8 }
0x1ad1   : > { %v4905_v35 = vpop.f32.mrf.mxu1 }
0x1ad2   : > { %6458 = vmatmul.mubr.msk.f32.vlgmr.msra.gmra.mxu0 %vm961_vm4, %v4905_v35 }
0x1ad3   : > { %v6433_v36 = vpop.f32.mrf.mxu1  ;;  %6466 = vmatpush3.msra.mxu0 %v5904_v34  ;;  %6467 = vmatprep.mubr.msk.f32.mxu0 %vm6709_vm1, %v6708_v8 }
0x1ad4   : > { %6475 = vmatprep.subr.mxu0 %v6708_v8 }
0x1b29   : > { %v4984_v39 = vpop.f32.mrf.mxu1 }
0x1b2a   : > { %6463 = vmatmul.mubr.msk.f32.vlgmr.msra.gmra.mxu1 %vm961_vm4, %v4984_v39 }
0x1b2b   : > { %v6440_v40 = vpop.f32.mrf.mxu1  ;;  %6471 = vmatpush3.msra.mxu1 %v5905_v38  ;;  %6472 = vmatprep.mubr.msk.f32.mxu1 %vm6709_vm1, %v6708_v8  ;;  %v5945_v38 = vld [vmem:[%s7776_s17 + $0x1] ss:$0 sm:$0xff] }
0x1b2c   : > { %6486 = vmatprep.subr.mxu1 %v6708_v8 }
0x1b31   : > { %v5142_v41 = vpop.f32.mrf.mxu1 }
0x1b32   : > { %v5063_v42 = vpop.f32.mrf.mxu0  ;;  %6473 = vmatmul.mubr.msk.f32.vlgmr.msra.gmra.mxu1 %vm961_vm4, %v5142_v41 }
0x1b33   : > { %v6454_v43 = vpop.f32.mrf.mxu1  ;;  %6468 = vmatmul.mubr.msk.f32.vlgmr.msra.gmra.mxu0 %vm961_vm4, %v5063_v42  ;;  %6502 = vmatprep.mubr.msk.f32.mxu1 %vm6709_vm1, %v6708_v8 }
0x1b34   : > { %v6447_v46 = vpop.f32.mrf.mxu0  ;;  %6483 = vmatprep.mubr.msk.f32.mxu0 %vm6709_vm1, %v6708_v8  ;;  %6476 = vmatpush3.msra.mxu0 %v5931_v10 }
0x1b35   : > { %6477 = vmatprep.subr.mxu0 %v6708_v8  ;;  %6487 = vmatpush3.msra.mxu1 %v5942_v13 }
0x1b36   : > { %6488 = vmatprep.subr.mxu1 %v6708_v8 }
0x1b37   : > { %6489 = vmatpush3.msra.mxu1 %v5941_v14 }
0x1b38   : > { %6490 = vmatprep.subr.mxu1 %v6708_v8 }
0x1b39   : > { %6491 = vmatpush3.msra.mxu1 %v5940_v21 }
0x1b3a   : > { %6492 = vmatprep.subr.mxu1 %v6708_v8 }
0x1b3b   : > { %6493 = vmatpush3.msra.mxu1 %v5939_v23 }
0x1b3c   : > { %6494 = vmatprep.subr.mxu1 %v6708_v8 }
0x1b3d   : > { %6495 = vmatpush3.msra.mxu1 %v5938_v25 }
0x1b3e   : > { %6496 = vmatprep.subr.mxu1 %v6708_v8 }
0x1b3f   : > { %6497 = vmatpush3.msra.mxu1 %v5937_v31 }
0x1b40   : > { %6498 = vmatprep.subr.mxu1 %v6708_v8 }
0x1b41   : > { %6499 = vmatpush3.msra.mxu1 %v5936_v51 }
0x1b42   : > { %6500 = vmatprep.subr.mxu1 %v6708_v8 }
0x1b43   : > { %6501 = vmatpush3.msra.mxu1 %v5935_v49 }
0x1b92   : > { %v5215_v47 = vpop.f32.mrf.mxu0 }
0x1b93   : > { %v5438_v60 = vsel %vm748_vm0, %v5215_v47, 0.0 }
0x1b94   : > { %v6459_v50 = vpop.f32.mrf.mxu0 }
0x1bea   : > { %v5288_v54 = vpop.f32.mrf.mxu1 }
0x1beb   : > { %v5439_v59 = vsel %vm748_vm0, %v5288_v54, 0.0 }
0x1bec   : > { %v6464_v28 = vpop.f32.mrf.mxu1  ;;  %v5440_v62 = vadd.f32 %v5439_v59, %v5438_v60 }
0x1bf2   : > { %v5434_v48 = vpop.f32.mrf.mxu1 }
0x1bf3   : > { %v5361_v63 = vpop.f32.mrf.mxu0  ;;  %v5443_v3 = vsel %vm748_vm0, %v5434_v48, 0.0 }
0x1bf4   : > { %v5441_v1 = vsel %vm748_vm0, %v5361_v63, 0.0  ;;  %v6474_v61 = vpop.f32.mrf.mxu1 }
0x1bf5   : > { %v5442_v2 = vadd.f32 %v5441_v1, %v5440_v62  ;;  %v6469_v44 = vpop.f32.mrf.mxu0  ;;  %v5946_v61 = vld [vmem:[%s7779_s20] ss:$0 sm:$0xff] }
0x1bf7   : > { %v5444_v4 = vadd.f32 %v5443_v3, %v5442_v2  ;;  %v5947_v3 = vld [vmem:[%s7838_s2] ss:$0 sm:$0xff] }
0x1bf9   : > { %v5451_v52 = vadd.f32 %v5927_v58, %v5444_v4 }
0x1bfb   : > { %v7651_v22 = vadd.f32 %v5451_v52, %v7491_v15  ;;  %v5930_v15 = vld [vmem:[%s7773_s14 + $0x30] sm:$0xff] }
0x1bfc   : > { %6478 = vmatpush3.msra.mxu0 %v5930_v15 }
0x1bfd   : > { %v5453_v7 = vsel %vm748_vm0, %v7651_v22, 0.0  ;;  %6479 = vmatprep.subr.mxu0 %v6708_v8 }
0x1bfe   : > { %5454 = vadd.xlane.f32.xlu1 %v5453_v7  ;;  %6480 = vmatpush3.msra.mxu0 %v5929_v11 }
0x1bff   : > { %6481 = vmatprep.subr.mxu0 %v6708_v8 }
0x1c00   : > { %6482 = vmatpush3.msra.mxu0 %v5928_v12 }
0x1c87   : > { %v5455_v45 = vpop.xlane.xlu1 %5454 }
0x1c88   : > { %v5456_v5 = vmul.f32 0.03125, %v5455_v45 }
0x1c8a   : > { %v5457_v6 = vsub.f32 %v7651_v22, %v5456_v5 }
0x1c8c   : > { %v5458_v56 = vmul.f32 %v5457_v6, %v5457_v6  ;;  %v5474_v24 = vmul.f32 %v5473_v20, %v5457_v6 }
0x1c8e   : > { %v5459_v9 = vsel %vm748_vm0, %v5458_v56, 0.0 }
0x1c8f   : > { %5460 = vadd.xlane.f32.xlu0 %v5459_v9 }
0x1d18   : > { %v5461_v16 = vpop.xlane.xlu0 %5460 }
0x1d19   : > { %v5462_v17 = vmul.f32 0.032258064, %v5461_v16 }
0x1d1b   : > { %6636 = vrsqrt.f32 %v5462_v17  ;;  %vm5465_vm15 = vcmp.eq.f32.partialorder %v5462_v17, inf  ;;  %v5468_v37 = vand.u32 2147483648, %v5462_v17  ;;  %vm5467_vm1 = vcmp.eq.f32.partialorder %v5462_v17, 0.0 }
0x1d28   : > { %v6637_v18 = vpop.eup %6636 }
0x1d29   : > { %v5464_v0 = vmul.f32 %v6637_v18, %v5462_v17 }
0x1d2b   : > { %v5466_v53 = vsel %vm5465_vm15, %v5462_v17, %v5464_v0 }
0x1d2c   : > { %v5469_v55 = vsel %vm5467_vm1, %v5468_v37, %v5466_v53 }
0x1d2d   : > { %v5475_v19 = vadd.f32 1e-06, %v5469_v55 }
0x1d2f   : > { %6638 = vrcp.f32 %v5475_v19 }
0x1d3c   : > { %v6639_v27 = vpop.eup %6638 }
0x1d3d   : > { %v5477_v29 = vmul.f32 %v6639_v27, %v5474_v24 }
0x1d3f   : > { %v5482_v30 = vadd.f32 %v5481_v26, %v5477_v29 }
0x1d41   : > { %6484 = vmatmul.mubr.msk.f32.vlgmr.msra.gmra.mxu0 %vm748_vm0, %v5482_v30 }
0x1e01   : > { %v5565_v32 = vpop.f32.mrf.mxu0 }
0x1e02   : > { %v5566_v33 = vadd.f32 %v5933_v57, %v5565_v32 }
0x1e03   : > { %v6485_v34 = vpop.f32.mrf.mxu0 }
0x1e04   : > { %v5569_v35 = vmax.f32 %v5566_v33, 0.0 }
0x1e06   : > { %6503 = vmatmul.mubr.msk.f32.vlgmr.msra.gmra.mxu1 %vm3160_vm10, %v5569_v35 }
0x1ec6   : > { %v5648_v36 = vpop.f32.mrf.mxu1 }
0x1ec7   : > { %v5652_v39 = vadd.f32 %v5648_v36, %v7651_v22 }
0x1ec8   : > { %v6504_v40 = vpop.f32.mrf.mxu1 }
0x1ec9   : > { %v5661_v8 = vadd.f32 %v5945_v38, %v5652_v39 }
0x1ecb   : > { %v5664_v41 = vsel %vm748_vm0, %v5661_v8, 0.0 }
0x1ecc   : > { %5665 = vadd.xlane.f32.xlu0 %v5664_v41 }
0x1f55   : > { %v5666_v42 = vpop.xlane.xlu0 %5665 }
0x1f56   : > { %v5667_v43 = vmul.f32 0.03125, %v5666_v42 }
0x1f58   : > { %v5668_v46 = vsub.f32 %v5661_v8, %v5667_v43 }
0x1f5a   : > { %v5669_v47 = vmul.f32 %v5668_v46, %v5668_v46  ;;  %v5687_v2 = vmul.f32 %v5946_v61, %v5668_v46 }
0x1f5c   : > { %v5670_v50 = vsel %vm748_vm0, %v5669_v47, 0.0 }
0x1f5d   : > { %5671 = vadd.xlane.f32.xlu1 %v5670_v50 }
0x1fe6   : > { %v5672_v54 = vpop.xlane.xlu1 %5671 }
0x1fe7   : > { %v5673_v28 = vmul.f32 0.032258064, %v5672_v54 }
0x1fe9   : > { %6640 = vrsqrt.f32 %v5673_v28  ;;  %vm5676_vm2 = vcmp.eq.f32.partialorder %v5673_v28, inf  ;;  %v5679_v48 = vand.u32 2147483648, %v5673_v28  ;;  %vm5678_vm3 = vcmp.eq.f32.partialorder %v5673_v28, 0.0 }
0x1ff6   : > { %v6641_v59 = vpop.eup %6640 }
0x1ff7   : > { %v5675_v60 = vmul.f32 %v6641_v59, %v5673_v28 }
0x1ff9   : > { %v5677_v62 = vsel %vm5676_vm2, %v5673_v28, %v5675_v60 }
0x1ffa   : > { %v5680_v63 = vsel %vm5678_vm3, %v5679_v48, %v5677_v62 }
0x1ffb   : > { %v5688_v1 = vadd.f32 1e-06, %v5680_v63 }
0x1ffd   : > { %6642 = vrcp.f32 %v5688_v1 }
0x200a   : > { %v6643_v44 = vpop.eup %6642 }
0x200b   : > { %v5690_v58 = vmul.f32 %v6643_v44, %v5687_v2 }
0x200d   : > { %v5697_v4 = vadd.f32 %v5947_v3, %v5690_v58 }
0x200f   : > { %5698 = vst.msk [vmem:[%s714_s3] sm:$0xff] %vm748_vm0, %v5697_v4 }
0x2010   : > { %6659 = shalt.err (!%p6656_p4)
}
0x2011   : > { %s6660_s5 = scalar_lea.hbm %s5711_s0, 128  ;;  %s6664_s21 = scalar_lea.hbm %s7839_s10, 256 }
0x2012   : > { %p6661_p7 = scmp.ne.s32.totalorder %s5711_s0, %s6660_s5  ;;  %p6665_p10 = scmp.lt.s32.totalorder %s5711_s0, %s7839_s10 }
0x2013   : > { %p6666_p11 = scmp.lt.s32.totalorder %s6664_s21, %s6660_s5 }
0x2014   : > { %p6662_p8 = pnand %p6661_p7, %p6870_p5 }
0x2015   : > { %p6667_p12 = por %p6666_p11, %p6665_p10 }
0x2016   : > { %p6663_p9 = pneg %p6662_p8 }
0x2018   : > { %p6668_p13 = pnand %p6667_p12, %p6663_p9 }
0x201a   : > { %6671 = shalt.err (!%p6668_p13)
}
0x201b   : > { %6505 = dma.vmem_to_hbm [thread:$0]  (%p6870_p5), %s5714_s26, 128, %s5711_s0, %s5700_s25  }
0x201c PF: > { %s7840_s27 = sld [smem:[#allocation7_spill]] }
0x201d   : > { %s7841_s29 = sld [smem:[#allocation5_spill]] }
0x2022   : > { %p6511_p0 = scmp.ge.s32.totalorder %s7840_s27, 2 }
0x2023   : > { %s5725_s11 = sand.u32 1, %s7841_s29  }
0x2024   : > { %p6508_p1 = pnand %p6511_p0, %p6874_p6  ;;  %s5726_s4 = scalar_lea.sflag [#allocation3], %s5725_s11 }
0x2026   : > { %p6509_p2 = pneg %p6508_p1 }
0x2028   : > { %6689 = dma.done.wait (%p6509_p2), %s5726_s4, 128  }
0x2029   : > { %6691 = vsyncadd (%p6509_p2), %s5726_s4, 4294967168  ;;  %s7843_s30 = sld [smem:[#allocation8_spill]]  ;;  %s7846_s3 = smov %s6698_s28 }
0x202a   : > { %s7844_s5 = sld [smem:[#allocation6_spill]] }
0x202b   : > { %s7845_s29 = sld [smem:[#allocation9_spill]] }
0x202f   : > { %p32_p3 = scmp.ge.s32.totalorder %s7843_s30, 4  }
0x2030   : > { %s7847_s28 = smov %s7844_s5 }
0x2031   :  { %34 = sbr.rel (!%p32_p3) target bundleno = 15 (0xf), region = 166 }
0x2036   :  { %5731 = vsyncpa [#allocation3], 1 }
0x2037   :  { %5733 = vsyncpa [#allocation3 + $0x1], 1 }

</bundles_post_ra>
